<compile_context>
chip_gen: v7x
topology: tpu7x:2x2x1
jax: 0.10.0
libtpu: 0.0.40
codegen_flags: <defaults>
</compile_context>

<pallas_src>
import functools

import jax
import jax.numpy as jnp
from jax.experimental import pallas as pl
from jax.experimental.pallas import tpu as pltpu

_EPS = 1e-5
_MXU_DTYPE = jnp.bfloat16  # MXU operand dtype; accumulation/epilogue stay fp32


# ----------------------------------------------------------------------------
# Bilinear x2 interpolation matrix (align_corners=True), wrapper-side, tiny
# ----------------------------------------------------------------------------
def _interp_matrix_x2(n_in):
    """(2*n_in, n_in) bilinear x2 interpolation matrix, align_corners=True."""
    n_out = 2 * n_in
    if n_in == 1:
        return jnp.ones((n_out, 1), jnp.float32)
    src = jnp.arange(n_out, dtype=jnp.float32) * (n_in - 1) / (n_out - 1)
    i0 = jnp.clip(jnp.floor(src).astype(jnp.int32), 0, n_in - 1)
    i1 = jnp.clip(i0 + 1, 0, n_in - 1)
    w = src - i0.astype(jnp.float32)
    oh0 = jax.nn.one_hot(i0, n_in, dtype=jnp.float32)
    oh1 = jax.nn.one_hot(i1, n_in, dtype=jnp.float32)
    return (1.0 - w)[:, None] * oh0 + w[:, None] * oh1


# ----------------------------------------------------------------------------
# Fused kernel: pad + conv1 + ReLU + BN1 + pad + conv2 + ReLU + BN2 (one image)
# ----------------------------------------------------------------------------
def _fused_expansive_kernel(has_e, ho, wo, *refs):
    if has_e:
        (dup_ref, e_ref, w1e_ref, w1d_ref, b1_ref, s1_ref, t1_ref,
         w2_ref, b2_ref, s2_ref, t2_ref,
         o_ref, sd_ref, se_ref, sh_ref) = refs
    else:
        (dup_ref, w1d_ref, b1_ref, s1_ref, t1_ref,
         w2_ref, b2_ref, s2_ref, t2_ref,
         o_ref, sd_ref, sh_ref) = refs
        e_ref = se_ref = w1e_ref = None

    def fill_padded(s_ref, interior):
        # Zero the 1-pixel border (conv padding=1) with four small stores, then
        # write the interior.  Done every grid step: the scratch is per-core and
        # persistent, and under megacore "parallel" splitting program_id()==0
        # never runs on the second core, so zero-once-at-step-0 would be wrong.
        c = s_ref.shape[-1]
        dt = s_ref.dtype
        s_ref[0:1, :, :] = jnp.zeros((1, wo + 2, c), dt)
        s_ref[ho + 1:ho + 2, :, :] = jnp.zeros((1, wo + 2, c), dt)
        s_ref[:, 0:1, :] = jnp.zeros((ho + 2, 1, c), dt)
        s_ref[:, wo + 1:wo + 2, :] = jnp.zeros((ho + 2, 1, c), dt)
        s_ref[1:ho + 1, 1:wo + 1, :] = interior.astype(dt)

    def conv3x3(pairs, bias):
        # pairs: [(zero-padded (ho+2, wo+2, cin) fp32 scratch ref,
        #          (9, cin, cout) bf16 weight ref)]
        # 9 taps, each a 2-D (H*W, Cin) @ (Cin, Cout) MXU matmul, fp32 acc.
        loaded = [(s_ref[...].astype(_MXU_DTYPE), w_ref) for s_ref, w_ref in pairs]
        acc = None
        for dy in range(3):
            for dx in range(3):
                tap = dy * 3 + dx
                for xpad, w_ref in loaded:
                    cin = xpad.shape[-1]
                    patch = xpad[dy:dy + ho, dx:dx + wo, :].reshape(ho * wo, cin)
                    mm = jnp.dot(patch, w_ref[tap],
                                 preferred_element_type=jnp.float32)
                    # first tap initializes the accumulator (+ broadcast bias)
                    acc = (mm + bias) if acc is None else acc + mm
        return acc                                        # (H*W, cout) fp32

    # ---- stage 0: scatter inputs into zero-padded VMEM scratches ----
    fill_padded(sd_ref, dup_ref[0])                       # upsampled d (NHWC)
    pairs1 = [(sd_ref, w1d_ref)]
    if has_e:
        # skip connection arrives NCHW-flat (Ce, H*W): transpose to
        # channels-last once in VMEM (XLU) instead of a wrapper HBM pass.
        ce = e_ref.shape[1]
        e_hwc = jnp.transpose(e_ref[0]).reshape(ho, wo, ce)
        fill_padded(se_ref, e_hwc)
        pairs1 = [(se_ref, w1e_ref)] + pairs1             # torch.cat([e, d], 1)

    # ---- conv1 (3x3, pad=1) + bias + ReLU + BatchNorm1 (eval, folded) ----
    cm = w1d_ref.shape[-1]
    h = conv3x3(pairs1, b1_ref[...])
    h = jnp.maximum(h, 0.0) * s1_ref[...] + t1_ref[...]
    # (BN1's shift is applied here, not folded into conv2's bias: that fold is
    #  not exact at the image border because conv2 zero-pads its input.)

    # ---- conv2 (3x3, pad=1) + bias + ReLU + BatchNorm2 (eval, folded) ----
    fill_padded(sh_ref, h.reshape(ho, wo, cm))
    y = conv3x3([(sh_ref, w2_ref)], b2_ref[...])
    y = jnp.maximum(y, 0.0) * s2_ref[...] + t2_ref[...]

    # ---- lane-dense NCHW output: (H*W, Co) -> (Co, H*W), unmasked stores ----
    o_ref[0] = jnp.transpose(y).astype(o_ref.dtype)


# ----------------------------------------------------------------------------
# Parameter init (deterministic, eval-mode BN folded) + forward wrapper
# ----------------------------------------------------------------------------
def init_expansive_block_params(key, in_channels, mid_channels, out_channels):
    ks = jax.random.split(key, 12)

    def conv_params(kw, kb, cin, cout):
        w = jax.random.normal(kw, (3, 3, cin, cout), jnp.float32) * 0.1   # HWIO
        b = jax.random.normal(kb, (cout,), jnp.float32) * 0.1
        return w, b

    def bn_params(kg, kb, km, kv, c):
        gamma = 1.0 + 0.1 * jax.random.normal(kg, (c,), jnp.float32)
        beta = 0.1 * jax.random.normal(kb, (c,), jnp.float32)
        rmean = 0.1 * jax.random.normal(km, (c,), jnp.float32)
        rvar = 1.0 + 0.1 * jnp.abs(jax.random.normal(kv, (c,), jnp.float32))
        scale = gamma / jnp.sqrt(rvar + _EPS)       # fold eval-mode BN
        shift = beta - rmean * scale
        return scale, shift

    w1, b1 = conv_params(ks[0], ks[1], in_channels, mid_channels)
    s1, t1 = bn_params(ks[2], ks[3], ks[4], ks[5], mid_channels)
    w2, b2 = conv_params(ks[6], ks[7], mid_channels, out_channels)
    s2, t2 = bn_params(ks[8], ks[9], ks[10], ks[11], out_channels)
    return dict(w1=w1, b1=b1, s1=s1, t1=t1, w2=w2, b2=b2, s2=s2, t2=t2)


@jax.jit
def expansive_block_forward(params, d_nchw, e_nchw=None):
    n, cd, hd, wd = d_nchw.shape
    ho, wo = 2 * hd, 2 * wd

    # ---- bilinear x2 upsample (align_corners=True), wrapper-side XLA ----
    # Produces NHWC directly from NCHW (no separate transpose pass) and is
    # written to HBM in bf16 (halves d_up HBM traffic into the kernel).
    my = _interp_matrix_x2(hd)                                       # (ho, hd)
    mx = _interp_matrix_x2(wd)                                       # (wo, wd)
    t = jnp.einsum("oh,nchw->ncow", my, d_nchw.astype(jnp.float32))
    d_up = jnp.einsum("pw,ncow->nopc", mx, t).astype(_MXU_DTYPE)     # (n,ho,wo,cd)

    w1 = params["w1"]
    cin1, cm = w1.shape[2], w1.shape[3]
    w2 = params["w2"]
    co = w2.shape[3]
    w1r = w1.reshape(9, cin1, cm).astype(_MXU_DTYPE)                 # (tap,Cin,Cm)
    w2r = w2.reshape(9, cm, co).astype(_MXU_DTYPE)                   # (tap,Cm,Co)
    b1 = params["b1"].reshape(1, cm).astype(jnp.float32)
    s1 = params["s1"].reshape(1, cm).astype(jnp.float32)
    t1 = params["t1"].reshape(1, cm).astype(jnp.float32)
    b2 = params["b2"].reshape(1, co).astype(jnp.float32)
    s2 = params["s2"].reshape(1, co).astype(jnp.float32)
    t2 = params["t2"].reshape(1, co).astype(jnp.float32)

    has_e = e_nchw is not None
    inputs = [d_up]
    in_specs = [pl.BlockSpec((1, ho, wo, cd), lambda i: (i, 0, 0, 0))]
    if has_e:
        ce = e_nchw.shape[1]
        assert e_nchw.shape == (n, ce, ho, wo), e_nchw.shape
        assert cin1 == ce + cd
        # NCHW with flattened spatial; transposed to channels-last in-kernel.
        inputs.append(e_nchw.reshape(n, ce, ho * wo))
        in_specs.append(pl.BlockSpec((1, ce, ho * wo), lambda i: (i, 0, 0)))
        w_consts = [w1r[:, :ce, :], w1r[:, ce:, :]]   # torch.cat([e, d], dim=1)
    else:
        assert cin1 == cd
        w_consts = [w1r]

    consts = w_consts + [b1, s1, t1, w2r, b2, s2, t2]

    def const_spec(a):
        return pl.BlockSpec(a.shape, lambda i, _nd=a.ndim: (0,) * _nd)

    inputs += consts
    in_specs += [const_spec(a) for a in consts]

    # fp32 zero-bordered pad scratches (cast to bf16 once per conv at the load)
    scratch = [pltpu.VMEM((ho + 2, wo + 2, cd), jnp.float32)]
    if has_e:
        scratch.append(pltpu.VMEM((ho + 2, wo + 2, e_nchw.shape[1]), jnp.float32))
    scratch.append(pltpu.VMEM((ho + 2, wo + 2, cm), jnp.float32))

    kernel = functools.partial(_fused_expansive_kernel, has_e, ho, wo)

    out = pl.pallas_call(
        kernel,
        out_shape=jax.ShapeDtypeStruct((n, co, ho * wo), d_nchw.dtype),
        grid=(n,),
        in_specs=in_specs,
        out_specs=pl.BlockSpec((1, co, ho * wo), lambda i: (i, 0, 0)),
        scratch_shapes=scratch,
        compiler_params=pltpu.CompilerParams(
            dimension_semantics=("parallel",),
            # ample at these shapes; re-derive per chip once row-tiled (TODO)
            vmem_limit_bytes=32 * 1024 * 1024,
        ),
    )(*inputs)
    # Kernel already produced NCHW per image; reshape is metadata-only.
    return out.reshape(n, co, ho, wo)


# ----------------------------------------------------------------------------
# Pure-JAX reference (for a correctness check in __main__)
# ----------------------------------------------------------------------------
def _reference_forward(params, d_nchw, e_nchw=None):
    d = jnp.transpose(d_nchw, (0, 2, 3, 1)).astype(jnp.float32)
    _, hd, wd, _ = d.shape
    my = _interp_matrix_x2(hd)
    mx = _interp_matrix_x2(wd)
    d_up = jnp.einsum("oh,nhwc->nowc", my, d)
    d_up = jnp.einsum("pw,nowc->nopc", mx, d_up)
    x = d_up
    if e_nchw is not None:
        e = jnp.transpose(e_nchw, (0, 2, 3, 1)).astype(jnp.float32)
        x = jnp.concatenate([e, d_up], axis=-1)

    def conv_relu_bn(x, w, b, s, t):
        y = jax.lax.conv_general_dilated(
            x, w.astype(jnp.float32), window_strides=(1, 1), padding="SAME",
            dimension_numbers=("NHWC", "HWIO", "NHWC"))
        y = jnp.maximum(y + b, 0.0)
        return y * s + t

    h = conv_relu_bn(x, params["w1"], params["b1"], params["s1"], params["t1"])
    y = conv_relu_bn(h, params["w2"], params["b2"], params["s2"], params["t2"])
    return jnp.transpose(y, (0, 3, 1, 2))


if __name__ == "__main__":
    key = jax.random.PRNGKey(0)
    k_d, k_e, k_p, k_p2 = jax.random.split(key, 4)

    # d: decoder feature to upsample; e: skip connection (matches 2x spatial)
    N, C_d, H, W = 2, 4, 8, 8
    C_e = 4
    d = jax.random.normal(k_d, (N, C_d, H, W), jnp.float32)            # NCHW
    e = jax.random.normal(k_e, (N, C_e, 2 * H, 2 * W), jnp.float32)    # NCHW

    mid_channels = 8
    out_channels = 8

    # --- with skip connection ---
    params = init_expansive_block_params(k_p, C_e + C_d, mid_channels,
                                         out_channels)
    out = expansive_block_forward(params, d, e)
    jax.block_until_ready(out)
    assert out.shape == (N, out_channels, 2 * H, 2 * W), out.shape
    ref = _reference_forward(params, d, e)
    max_err = float(jnp.max(jnp.abs(out - ref)))
    mean_err = float(jnp.mean(jnp.abs(out - ref)))
    # bf16 MXU operands vs fp32 reference: loose max tolerance, tight mean
    assert max_err < 6e-2, max_err
    assert mean_err < 1e-2, mean_err

    # --- without skip connection (e=None path) ---
    params2 = init_expansive_block_params(k_p2, C_d, mid_channels, out_channels)
    out2 = expansive_block_forward(params2, d)
    jax.block_until_ready(out2)
    assert out2.shape == (N, out_channels, 2 * H, 2 * W), out2.shape
    ref2 = _reference_forward(params2, d)
    max_err2 = float(jnp.max(jnp.abs(out2 - ref2)))
    mean_err2 = float(jnp.mean(jnp.abs(out2 - ref2)))
    assert max_err2 < 6e-2, max_err2
    assert mean_err2 < 1e-2, mean_err2

    print("KERNEL_OK")
</pallas_src>

<mosaic_0001>
module attributes {stable_mosaic.version = 11 : i64} {
  func.func @_fused_expansive_kernel(%arg0: i32, %arg1: memref<1x16x16x4xbf16, #tpu.memory_space<vmem>>, %arg2: memref<1x4x256xf32, #tpu.memory_space<vmem>>, %arg3: memref<9x4x8xbf16, #tpu.memory_space<vmem>>, %arg4: memref<9x4x8xbf16, #tpu.memory_space<vmem>>, %arg5: memref<1x8xf32, #tpu.memory_space<vmem>>, %arg6: memref<1x8xf32, #tpu.memory_space<vmem>>, %arg7: memref<1x8xf32, #tpu.memory_space<vmem>>, %arg8: memref<9x8x8xbf16, #tpu.memory_space<vmem>>, %arg9: memref<1x8xf32, #tpu.memory_space<vmem>>, %arg10: memref<1x8xf32, #tpu.memory_space<vmem>>, %arg11: memref<1x8xf32, #tpu.memory_space<vmem>>, %arg12: memref<1x8x256xf32, #tpu.memory_space<vmem>>, %arg13: memref<18x18x4xf32, #tpu.memory_space<vmem>>, %arg14: memref<18x18x4xf32, #tpu.memory_space<vmem>>, %arg15: memref<18x18x8xf32, #tpu.memory_space<vmem>>) attributes {dimension_semantics = [#tpu.dimension_semantics<parallel>], iteration_bounds = array<i64: 2>, scalar_prefetch = 0 : i64, scratch_operands = 3 : i64, tpu.core_type = #tpu.core_type<tc>, window_params = [{transform_indices = @transform_0, window_bounds = array<i64: 1, 16, 16, 4>}, {transform_indices = @transform_1, window_bounds = array<i64: 1, 4, 256>}, {pipeline_mode = #tpu.pipeline_mode<synchronous>, transform_indices = @transform_2, window_bounds = array<i64: 9, 4, 8>}, {pipeline_mode = #tpu.pipeline_mode<synchronous>, transform_indices = @transform_3, window_bounds = array<i64: 9, 4, 8>}, {pipeline_mode = #tpu.pipeline_mode<synchronous>, transform_indices = @transform_4, window_bounds = array<i64: 1, 8>}, {pipeline_mode = #tpu.pipeline_mode<synchronous>, transform_indices = @transform_5, window_bounds = array<i64: 1, 8>}, {pipeline_mode = #tpu.pipeline_mode<synchronous>, transform_indices = @transform_6, window_bounds = array<i64: 1, 8>}, {pipeline_mode = #tpu.pipeline_mode<synchronous>, transform_indices = @transform_7, window_bounds = array<i64: 9, 8, 8>}, {pipeline_mode = #tpu.pipeline_mode<synchronous>, transform_indices = @transform_8, window_bounds = array<i64: 1, 8>}, {pipeline_mode = #tpu.pipeline_mode<synchronous>, transform_indices = @transform_9, window_bounds = array<i64: 1, 8>}, {pipeline_mode = #tpu.pipeline_mode<synchronous>, transform_indices = @transform_10, window_bounds = array<i64: 1, 8>}, {transform_indices = @transform_11, window_bounds = array<i64: 1, 8, 256>}]} {
    %c0 = arith.constant 0 : index
    %c0_0 = arith.constant 0 : index
    %c0_1 = arith.constant 0 : index
    %c0_2 = arith.constant 0 : index
    %0 = vector.load %arg1[%c0, %c0_0, %c0_1, %c0_2] : memref<1x16x16x4xbf16, #tpu.memory_space<vmem>>, vector<1x16x16x4xbf16>
    %1 = vector.shape_cast %0 : vector<1x16x16x4xbf16> to vector<16x16x4xbf16>
    %cst = arith.constant 0.000000e+00 : f32
    %2 = vector.broadcast %cst : f32 to vector<1x18x4xf32>
    %c0_3 = arith.constant 0 : index
    %c0_4 = arith.constant 0 : index
    %c0_5 = arith.constant 0 : index
    %3 = vector.load %arg13[%c0_3, %c0_4, %c0_5] : memref<18x18x4xf32, #tpu.memory_space<vmem>>, vector<1x18x4xf32>
    tpu.vector_store %arg13[%c0_3, %c0_4, %c0_5], %2 {strides = array<i32>} : memref<18x18x4xf32, #tpu.memory_space<vmem>>, vector<1x18x4xf32>,
    %cst_6 = arith.constant 0.000000e+00 : f32
    %4 = vector.broadcast %cst_6 : f32 to vector<1x18x4xf32>
    %c17 = arith.constant 17 : index
    %c0_7 = arith.constant 0 : index
    %c0_8 = arith.constant 0 : index
    %5 = vector.load %arg13[%c17, %c0_7, %c0_8] : memref<18x18x4xf32, #tpu.memory_space<vmem>>, vector<1x18x4xf32>
    tpu.vector_store %arg13[%c17, %c0_7, %c0_8], %4 {strides = array<i32>} : memref<18x18x4xf32, #tpu.memory_space<vmem>>, vector<1x18x4xf32>,
    %cst_9 = arith.constant 0.000000e+00 : f32
    %6 = vector.broadcast %cst_9 : f32 to vector<18x1x4xf32>
    %c0_10 = arith.constant 0 : index
    %c0_11 = arith.constant 0 : index
    %c0_12 = arith.constant 0 : index
    %7 = vector.load %arg13[%c0_10, %c0_11, %c0_12] : memref<18x18x4xf32, #tpu.memory_space<vmem>>, vector<18x1x4xf32>
    tpu.vector_store %arg13[%c0_10, %c0_11, %c0_12], %6 {strides = array<i32>} : memref<18x18x4xf32, #tpu.memory_space<vmem>>, vector<18x1x4xf32>,
    %cst_13 = arith.constant 0.000000e+00 : f32
    %8 = vector.broadcast %cst_13 : f32 to vector<18x1x4xf32>
    %c0_14 = arith.constant 0 : index
    %c17_15 = arith.constant 17 : index
    %c0_16 = arith.constant 0 : index
    %9 = vector.load %arg13[%c0_14, %c17_15, %c0_16] : memref<18x18x4xf32, #tpu.memory_space<vmem>>, vector<18x1x4xf32>
    tpu.vector_store %arg13[%c0_14, %c17_15, %c0_16], %8 {strides = array<i32>} : memref<18x18x4xf32, #tpu.memory_space<vmem>>, vector<18x1x4xf32>,
    %10 = arith.extf %1 : vector<16x16x4xbf16> to vector<16x16x4xf32>
    %c1 = arith.constant 1 : index
    %c1_17 = arith.constant 1 : index
    %c0_18 = arith.constant 0 : index
    %11 = vector.load %arg13[%c1, %c1_17, %c0_18] : memref<18x18x4xf32, #tpu.memory_space<vmem>>, vector<16x16x4xf32>
    tpu.vector_store %arg13[%c1, %c1_17, %c0_18], %10 {strides = array<i32>} : memref<18x18x4xf32, #tpu.memory_space<vmem>>, vector<16x16x4xf32>,
    %c0_19 = arith.constant 0 : index
    %c0_20 = arith.constant 0 : index
    %c0_21 = arith.constant 0 : index
    %12 = vector.load %arg2[%c0_19, %c0_20, %c0_21] : memref<1x4x256xf32, #tpu.memory_space<vmem>>, vector<1x4x256xf32>
    %13 = vector.shape_cast %12 : vector<1x4x256xf32> to vector<4x256xf32>
    %14 = tpu.transpose %13, [1, 0] : vector<4x256xf32> -> vector<256x4xf32>
    %15 = vector.shape_cast %14 : vector<256x4xf32> to vector<16x16x4xf32>
    %cst_22 = arith.constant 0.000000e+00 : f32
    %16 = vector.broadcast %cst_22 : f32 to vector<1x18x4xf32>
    %c0_23 = arith.constant 0 : index
    %c0_24 = arith.constant 0 : index
    %c0_25 = arith.constant 0 : index
    %17 = vector.load %arg14[%c0_23, %c0_24, %c0_25] : memref<18x18x4xf32, #tpu.memory_space<vmem>>, vector<1x18x4xf32>
    tpu.vector_store %arg14[%c0_23, %c0_24, %c0_25], %16 {strides = array<i32>} : memref<18x18x4xf32, #tpu.memory_space<vmem>>, vector<1x18x4xf32>,
    %cst_26 = arith.constant 0.000000e+00 : f32
    %18 = vector.broadcast %cst_26 : f32 to vector<1x18x4xf32>
    %c17_27 = arith.constant 17 : index
    %c0_28 = arith.constant 0 : index
    %c0_29 = arith.constant 0 : index
    %19 = vector.load %arg14[%c17_27, %c0_28, %c0_29] : memref<18x18x4xf32, #tpu.memory_space<vmem>>, vector<1x18x4xf32>
    tpu.vector_store %arg14[%c17_27, %c0_28, %c0_29], %18 {strides = array<i32>} : memref<18x18x4xf32, #tpu.memory_space<vmem>>, vector<1x18x4xf32>,
    %cst_30 = arith.constant 0.000000e+00 : f32
    %20 = vector.broadcast %cst_30 : f32 to vector<18x1x4xf32>
    %c0_31 = arith.constant 0 : index
    %c0_32 = arith.constant 0 : index
    %c0_33 = arith.constant 0 : index
    %21 = vector.load %arg14[%c0_31, %c0_32, %c0_33] : memref<18x18x4xf32, #tpu.memory_space<vmem>>, vector<18x1x4xf32>
    tpu.vector_store %arg14[%c0_31, %c0_32, %c0_33], %20 {strides = array<i32>} : memref<18x18x4xf32, #tpu.memory_space<vmem>>, vector<18x1x4xf32>,
    %cst_34 = arith.constant 0.000000e+00 : f32
    %22 = vector.broadcast %cst_34 : f32 to vector<18x1x4xf32>
    %c0_35 = arith.constant 0 : index
    %c17_36 = arith.constant 17 : index
    %c0_37 = arith.constant 0 : index
    %23 = vector.load %arg14[%c0_35, %c17_36, %c0_37] : memref<18x18x4xf32, #tpu.memory_space<vmem>>, vector<18x1x4xf32>
    tpu.vector_store %arg14[%c0_35, %c17_36, %c0_37], %22 {strides = array<i32>} : memref<18x18x4xf32, #tpu.memory_space<vmem>>, vector<18x1x4xf32>,
    %c1_38 = arith.constant 1 : index
    %c1_39 = arith.constant 1 : index
    %c0_40 = arith.constant 0 : index
    %24 = vector.load %arg14[%c1_38, %c1_39, %c0_40] : memref<18x18x4xf32, #tpu.memory_space<vmem>>, vector<16x16x4xf32>
    tpu.vector_store %arg14[%c1_38, %c1_39, %c0_40], %15 {strides = array<i32>} : memref<18x18x4xf32, #tpu.memory_space<vmem>>, vector<16x16x4xf32>,
    %c0_41 = arith.constant 0 : index
    %c0_42 = arith.constant 0 : index
    %25 = vector.load %arg5[%c0_41, %c0_42] : memref<1x8xf32, #tpu.memory_space<vmem>>, vector<1x8xf32>
    %c0_43 = arith.constant 0 : index
    %c0_44 = arith.constant 0 : index
    %c0_45 = arith.constant 0 : index
    %26 = vector.load %arg14[%c0_43, %c0_44, %c0_45] : memref<18x18x4xf32, #tpu.memory_space<vmem>>, vector<18x18x4xf32>
    %27 = arith.truncf %26 : vector<18x18x4xf32> to vector<18x18x4xbf16>
    %c0_46 = arith.constant 0 : index
    %c0_47 = arith.constant 0 : index
    %c0_48 = arith.constant 0 : index
    %28 = vector.load %arg13[%c0_46, %c0_47, %c0_48] : memref<18x18x4xf32, #tpu.memory_space<vmem>>, vector<18x18x4xf32>
    %29 = arith.truncf %28 : vector<18x18x4xf32> to vector<18x18x4xbf16>
    %30 = vector.extract_strided_slice %27 {offsets = [0, 0, 0], sizes = [16, 16, 4], strides = [1, 1, 1]} : vector<18x18x4xbf16> to vector<16x16x4xbf16>
    %31 = vector.shape_cast %30 : vector<16x16x4xbf16> to vector<256x4xbf16>
    %c0_49 = arith.constant 0 : index
    %c0_50 = arith.constant 0 : index
    %c0_51 = arith.constant 0 : index
    %32 = vector.load %arg3[%c0_49, %c0_50, %c0_51] : memref<9x4x8xbf16, #tpu.memory_space<vmem>>, vector<1x4x8xbf16>
    %33 = vector.shape_cast %32 : vector<1x4x8xbf16> to vector<4x8xbf16>
    %cst_52 = arith.constant dense<0.000000e+00> : vector<256x8xf32>
    %34 = tpu.matmul %31, %33, %cst_52 {dimension_numbers = #tpu.dot_dimension_numbers<[1], [0], [0], [1], [0, 0, 1, 1], [], []>} : vector<256x4xbf16>, vector<4x8xbf16>, vector<256x8xf32> -> vector<256x8xf32>
    %35 = vector.broadcast %25 : vector<1x8xf32> to vector<256x8xf32>
    %36 = arith.addf %34, %35 : vector<256x8xf32>
    %37 = vector.extract_strided_slice %29 {offsets = [0, 0, 0], sizes = [16, 16, 4], strides = [1, 1, 1]} : vector<18x18x4xbf16> to vector<16x16x4xbf16>
    %38 = vector.shape_cast %37 : vector<16x16x4xbf16> to vector<256x4xbf16>
    %c0_53 = arith.constant 0 : index
    %c0_54 = arith.constant 0 : index
    %c0_55 = arith.constant 0 : index
    %39 = vector.load %arg4[%c0_53, %c0_54, %c0_55] : memref<9x4x8xbf16, #tpu.memory_space<vmem>>, vector<1x4x8xbf16>
    %40 = vector.shape_cast %39 : vector<1x4x8xbf16> to vector<4x8xbf16>
    %cst_56 = arith.constant dense<0.000000e+00> : vector<256x8xf32>
    %41 = tpu.matmul %38, %40, %cst_56 {dimension_numbers = #tpu.dot_dimension_numbers<[1], [0], [0], [1], [0, 0, 1, 1], [], []>} : vector<256x4xbf16>, vector<4x8xbf16>, vector<256x8xf32> -> vector<256x8xf32>
    %42 = arith.addf %36, %41 : vector<256x8xf32>
    %43 = vector.extract_strided_slice %27 {offsets = [0, 1, 0], sizes = [16, 16, 4], strides = [1, 1, 1]} : vector<18x18x4xbf16> to vector<16x16x4xbf16>
    %44 = vector.shape_cast %43 : vector<16x16x4xbf16> to vector<256x4xbf16>
    %c1_57 = arith.constant 1 : index
    %c0_58 = arith.constant 0 : index
    %c0_59 = arith.constant 0 : index
    %45 = vector.load %arg3[%c1_57, %c0_58, %c0_59] : memref<9x4x8xbf16, #tpu.memory_space<vmem>>, vector<1x4x8xbf16>
    %46 = vector.shape_cast %45 : vector<1x4x8xbf16> to vector<4x8xbf16>
    %cst_60 = arith.constant dense<0.000000e+00> : vector<256x8xf32>
    %47 = tpu.matmul %44, %46, %cst_60 {dimension_numbers = #tpu.dot_dimension_numbers<[1], [0], [0], [1], [0, 0, 1, 1], [], []>} : vector<256x4xbf16>, vector<4x8xbf16>, vector<256x8xf32> -> vector<256x8xf32>
    %48 = arith.addf %42, %47 : vector<256x8xf32>
    %49 = vector.extract_strided_slice %29 {offsets = [0, 1, 0], sizes = [16, 16, 4], strides = [1, 1, 1]} : vector<18x18x4xbf16> to vector<16x16x4xbf16>
    %50 = vector.shape_cast %49 : vector<16x16x4xbf16> to vector<256x4xbf16>
    %c1_61 = arith.constant 1 : index
    %c0_62 = arith.constant 0 : index
    %c0_63 = arith.constant 0 : index
    %51 = vector.load %arg4[%c1_61, %c0_62, %c0_63] : memref<9x4x8xbf16, #tpu.memory_space<vmem>>, vector<1x4x8xbf16>
    %52 = vector.shape_cast %51 : vector<1x4x8xbf16> to vector<4x8xbf16>
    %cst_64 = arith.constant dense<0.000000e+00> : vector<256x8xf32>
    %53 = tpu.matmul %50, %52, %cst_64 {dimension_numbers = #tpu.dot_dimension_numbers<[1], [0], [0], [1], [0, 0, 1, 1], [], []>} : vector<256x4xbf16>, vector<4x8xbf16>, vector<256x8xf32> -> vector<256x8xf32>
    %54 = arith.addf %48, %53 : vector<256x8xf32>
    %55 = vector.extract_strided_slice %27 {offsets = [0, 2, 0], sizes = [16, 16, 4], strides = [1, 1, 1]} : vector<18x18x4xbf16> to vector<16x16x4xbf16>
    %56 = vector.shape_cast %55 : vector<16x16x4xbf16> to vector<256x4xbf16>
    %c2 = arith.constant 2 : index
    %c0_65 = arith.constant 0 : index
    %c0_66 = arith.constant 0 : index
    %57 = vector.load %arg3[%c2, %c0_65, %c0_66] : memref<9x4x8xbf16, #tpu.memory_space<vmem>>, vector<1x4x8xbf16>
    %58 = vector.shape_cast %57 : vector<1x4x8xbf16> to vector<4x8xbf16>
    %cst_67 = arith.constant dense<0.000000e+00> : vector<256x8xf32>
    %59 = tpu.matmul %56, %58, %cst_67 {dimension_numbers = #tpu.dot_dimension_numbers<[1], [0], [0], [1], [0, 0, 1, 1], [], []>} : vector<256x4xbf16>, vector<4x8xbf16>, vector<256x8xf32> -> vector<256x8xf32>
    %60 = arith.addf %54, %59 : vector<256x8xf32>
    %61 = vector.extract_strided_slice %29 {offsets = [0, 2, 0], sizes = [16, 16, 4], strides = [1, 1, 1]} : vector<18x18x4xbf16> to vector<16x16x4xbf16>
    %62 = vector.shape_cast %61 : vector<16x16x4xbf16> to vector<256x4xbf16>
    %c2_68 = arith.constant 2 : index
    %c0_69 = arith.constant 0 : index
    %c0_70 = arith.constant 0 : index
    %63 = vector.load %arg4[%c2_68, %c0_69, %c0_70] : memref<9x4x8xbf16, #tpu.memory_space<vmem>>, vector<1x4x8xbf16>
    %64 = vector.shape_cast %63 : vector<1x4x8xbf16> to vector<4x8xbf16>
    %cst_71 = arith.constant dense<0.000000e+00> : vector<256x8xf32>
    %65 = tpu.matmul %62, %64, %cst_71 {dimension_numbers = #tpu.dot_dimension_numbers<[1], [0], [0], [1], [0, 0, 1, 1], [], []>} : vector<256x4xbf16>, vector<4x8xbf16>, vector<256x8xf32> -> vector<256x8xf32>
    %66 = arith.addf %60, %65 : vector<256x8xf32>
    %67 = vector.extract_strided_slice %27 {offsets = [1, 0, 0], sizes = [16, 16, 4], strides = [1, 1, 1]} : vector<18x18x4xbf16> to vector<16x16x4xbf16>
    %68 = vector.shape_cast %67 : vector<16x16x4xbf16> to vector<256x4xbf16>
    %c3 = arith.constant 3 : index
    %c0_72 = arith.constant 0 : index
    %c0_73 = arith.constant 0 : index
    %69 = vector.load %arg3[%c3, %c0_72, %c0_73] : memref<9x4x8xbf16, #tpu.memory_space<vmem>>, vector<1x4x8xbf16>
    %70 = vector.shape_cast %69 : vector<1x4x8xbf16> to vector<4x8xbf16>
    %cst_74 = arith.constant dense<0.000000e+00> : vector<256x8xf32>
    %71 = tpu.matmul %68, %70, %cst_74 {dimension_numbers = #tpu.dot_dimension_numbers<[1], [0], [0], [1], [0, 0, 1, 1], [], []>} : vector<256x4xbf16>, vector<4x8xbf16>, vector<256x8xf32> -> vector<256x8xf32>
    %72 = arith.addf %66, %71 : vector<256x8xf32>
    %73 = vector.extract_strided_slice %29 {offsets = [1, 0, 0], sizes = [16, 16, 4], strides = [1, 1, 1]} : vector<18x18x4xbf16> to vector<16x16x4xbf16>
    %74 = vector.shape_cast %73 : vector<16x16x4xbf16> to vector<256x4xbf16>
    %c3_75 = arith.constant 3 : index
    %c0_76 = arith.constant 0 : index
    %c0_77 = arith.constant 0 : index
    %75 = vector.load %arg4[%c3_75, %c0_76, %c0_77] : memref<9x4x8xbf16, #tpu.memory_space<vmem>>, vector<1x4x8xbf16>
    %76 = vector.shape_cast %75 : vector<1x4x8xbf16> to vector<4x8xbf16>
    %cst_78 = arith.constant dense<0.000000e+00> : vector<256x8xf32>
    %77 = tpu.matmul %74, %76, %cst_78 {dimension_numbers = #tpu.dot_dimension_numbers<[1], [0], [0], [1], [0, 0, 1, 1], [], []>} : vector<256x4xbf16>, vector<4x8xbf16>, vector<256x8xf32> -> vector<256x8xf32>
    %78 = arith.addf %72, %77 : vector<256x8xf32>
    %79 = vector.extract_strided_slice %27 {offsets = [1, 1, 0], sizes = [16, 16, 4], strides = [1, 1, 1]} : vector<18x18x4xbf16> to vector<16x16x4xbf16>
    %80 = vector.shape_cast %79 : vector<16x16x4xbf16> to vector<256x4xbf16>
    %c4 = arith.constant 4 : index
    %c0_79 = arith.constant 0 : index
    %c0_80 = arith.constant 0 : index
    %81 = vector.load %arg3[%c4, %c0_79, %c0_80] : memref<9x4x8xbf16, #tpu.memory_space<vmem>>, vector<1x4x8xbf16>
    %82 = vector.shape_cast %81 : vector<1x4x8xbf16> to vector<4x8xbf16>
    %cst_81 = arith.constant dense<0.000000e+00> : vector<256x8xf32>
    %83 = tpu.matmul %80, %82, %cst_81 {dimension_numbers = #tpu.dot_dimension_numbers<[1], [0], [0], [1], [0, 0, 1, 1], [], []>} : vector<256x4xbf16>, vector<4x8xbf16>, vector<256x8xf32> -> vector<256x8xf32>
    %84 = arith.addf %78, %83 : vector<256x8xf32>
    %85 = vector.extract_strided_slice %29 {offsets = [1, 1, 0], sizes = [16, 16, 4], strides = [1, 1, 1]} : vector<18x18x4xbf16> to vector<16x16x4xbf16>
    %86 = vector.shape_cast %85 : vector<16x16x4xbf16> to vector<256x4xbf16>
    %c4_82 = arith.constant 4 : index
    %c0_83 = arith.constant 0 : index
    %c0_84 = arith.constant 0 : index
    %87 = vector.load %arg4[%c4_82, %c0_83, %c0_84] : memref<9x4x8xbf16, #tpu.memory_space<vmem>>, vector<1x4x8xbf16>
    %88 = vector.shape_cast %87 : vector<1x4x8xbf16> to vector<4x8xbf16>
    %cst_85 = arith.constant dense<0.000000e+00> : vector<256x8xf32>
    %89 = tpu.matmul %86, %88, %cst_85 {dimension_numbers = #tpu.dot_dimension_numbers<[1], [0], [0], [1], [0, 0, 1, 1], [], []>} : vector<256x4xbf16>, vector<4x8xbf16>, vector<256x8xf32> -> vector<256x8xf32>
    %90 = arith.addf %84, %89 : vector<256x8xf32>
    %91 = vector.extract_strided_slice %27 {offsets = [1, 2, 0], sizes = [16, 16, 4], strides = [1, 1, 1]} : vector<18x18x4xbf16> to vector<16x16x4xbf16>
    %92 = vector.shape_cast %91 : vector<16x16x4xbf16> to vector<256x4xbf16>
    %c5 = arith.constant 5 : index
    %c0_86 = arith.constant 0 : index
    %c0_87 = arith.constant 0 : index
    %93 = vector.load %arg3[%c5, %c0_86, %c0_87] : memref<9x4x8xbf16, #tpu.memory_space<vmem>>, vector<1x4x8xbf16>
    %94 = vector.shape_cast %93 : vector<1x4x8xbf16> to vector<4x8xbf16>
    %cst_88 = arith.constant dense<0.000000e+00> : vector<256x8xf32>
    %95 = tpu.matmul %92, %94, %cst_88 {dimension_numbers = #tpu.dot_dimension_numbers<[1], [0], [0], [1], [0, 0, 1, 1], [], []>} : vector<256x4xbf16>, vector<4x8xbf16>, vector<256x8xf32> -> vector<256x8xf32>
    %96 = arith.addf %90, %95 : vector<256x8xf32>
    %97 = vector.extract_strided_slice %29 {offsets = [1, 2, 0], sizes = [16, 16, 4], strides = [1, 1, 1]} : vector<18x18x4xbf16> to vector<16x16x4xbf16>
    %98 = vector.shape_cast %97 : vector<16x16x4xbf16> to vector<256x4xbf16>
    %c5_89 = arith.constant 5 : index
    %c0_90 = arith.constant 0 : index
    %c0_91 = arith.constant 0 : index
    %99 = vector.load %arg4[%c5_89, %c0_90, %c0_91] : memref<9x4x8xbf16, #tpu.memory_space<vmem>>, vector<1x4x8xbf16>
    %100 = vector.shape_cast %99 : vector<1x4x8xbf16> to vector<4x8xbf16>
    %cst_92 = arith.constant dense<0.000000e+00> : vector<256x8xf32>
    %101 = tpu.matmul %98, %100, %cst_92 {dimension_numbers = #tpu.dot_dimension_numbers<[1], [0], [0], [1], [0, 0, 1, 1], [], []>} : vector<256x4xbf16>, vector<4x8xbf16>, vector<256x8xf32> -> vector<256x8xf32>
    %102 = arith.addf %96, %101 : vector<256x8xf32>
    %103 = vector.extract_strided_slice %27 {offsets = [2, 0, 0], sizes = [16, 16, 4], strides = [1, 1, 1]} : vector<18x18x4xbf16> to vector<16x16x4xbf16>
    %104 = vector.shape_cast %103 : vector<16x16x4xbf16> to vector<256x4xbf16>
    %c6 = arith.constant 6 : index
    %c0_93 = arith.constant 0 : index
    %c0_94 = arith.constant 0 : index
    %105 = vector.load %arg3[%c6, %c0_93, %c0_94] : memref<9x4x8xbf16, #tpu.memory_space<vmem>>, vector<1x4x8xbf16>
    %106 = vector.shape_cast %105 : vector<1x4x8xbf16> to vector<4x8xbf16>
    %cst_95 = arith.constant dense<0.000000e+00> : vector<256x8xf32>
    %107 = tpu.matmul %104, %106, %cst_95 {dimension_numbers = #tpu.dot_dimension_numbers<[1], [0], [0], [1], [0, 0, 1, 1], [], []>} : vector<256x4xbf16>, vector<4x8xbf16>, vector<256x8xf32> -> vector<256x8xf32>
    %108 = arith.addf %102, %107 : vector<256x8xf32>
    %109 = vector.extract_strided_slice %29 {offsets = [2, 0, 0], sizes = [16, 16, 4], strides = [1, 1, 1]} : vector<18x18x4xbf16> to vector<16x16x4xbf16>
    %110 = vector.shape_cast %109 : vector<16x16x4xbf16> to vector<256x4xbf16>
    %c6_96 = arith.constant 6 : index
    %c0_97 = arith.constant 0 : index
    %c0_98 = arith.constant 0 : index
    %111 = vector.load %arg4[%c6_96, %c0_97, %c0_98] : memref<9x4x8xbf16, #tpu.memory_space<vmem>>, vector<1x4x8xbf16>
    %112 = vector.shape_cast %111 : vector<1x4x8xbf16> to vector<4x8xbf16>
    %cst_99 = arith.constant dense<0.000000e+00> : vector<256x8xf32>
    %113 = tpu.matmul %110, %112, %cst_99 {dimension_numbers = #tpu.dot_dimension_numbers<[1], [0], [0], [1], [0, 0, 1, 1], [], []>} : vector<256x4xbf16>, vector<4x8xbf16>, vector<256x8xf32> -> vector<256x8xf32>
    %114 = arith.addf %108, %113 : vector<256x8xf32>
    %115 = vector.extract_strided_slice %27 {offsets = [2, 1, 0], sizes = [16, 16, 4], strides = [1, 1, 1]} : vector<18x18x4xbf16> to vector<16x16x4xbf16>
    %116 = vector.shape_cast %115 : vector<16x16x4xbf16> to vector<256x4xbf16>
    %c7 = arith.constant 7 : index
    %c0_100 = arith.constant 0 : index
    %c0_101 = arith.constant 0 : index
    %117 = vector.load %arg3[%c7, %c0_100, %c0_101] : memref<9x4x8xbf16, #tpu.memory_space<vmem>>, vector<1x4x8xbf16>
    %118 = vector.shape_cast %117 : vector<1x4x8xbf16> to vector<4x8xbf16>
    %cst_102 = arith.constant dense<0.000000e+00> : vector<256x8xf32>
    %119 = tpu.matmul %116, %118, %cst_102 {dimension_numbers = #tpu.dot_dimension_numbers<[1], [0], [0], [1], [0, 0, 1, 1], [], []>} : vector<256x4xbf16>, vector<4x8xbf16>, vector<256x8xf32> -> vector<256x8xf32>
    %120 = arith.addf %114, %119 : vector<256x8xf32>
    %121 = vector.extract_strided_slice %29 {offsets = [2, 1, 0], sizes = [16, 16, 4], strides = [1, 1, 1]} : vector<18x18x4xbf16> to vector<16x16x4xbf16>
    %122 = vector.shape_cast %121 : vector<16x16x4xbf16> to vector<256x4xbf16>
    %c7_103 = arith.constant 7 : index
    %c0_104 = arith.constant 0 : index
    %c0_105 = arith.constant 0 : index
    %123 = vector.load %arg4[%c7_103, %c0_104, %c0_105] : memref<9x4x8xbf16, #tpu.memory_space<vmem>>, vector<1x4x8xbf16>
    %124 = vector.shape_cast %123 : vector<1x4x8xbf16> to vector<4x8xbf16>
    %cst_106 = arith.constant dense<0.000000e+00> : vector<256x8xf32>
    %125 = tpu.matmul %122, %124, %cst_106 {dimension_numbers = #tpu.dot_dimension_numbers<[1], [0], [0], [1], [0, 0, 1, 1], [], []>} : vector<256x4xbf16>, vector<4x8xbf16>, vector<256x8xf32> -> vector<256x8xf32>
    %126 = arith.addf %120, %125 : vector<256x8xf32>
    %127 = vector.extract_strided_slice %27 {offsets = [2, 2, 0], sizes = [16, 16, 4], strides = [1, 1, 1]} : vector<18x18x4xbf16> to vector<16x16x4xbf16>
    %128 = vector.shape_cast %127 : vector<16x16x4xbf16> to vector<256x4xbf16>
    %c8 = arith.constant 8 : index
    %c0_107 = arith.constant 0 : index
    %c0_108 = arith.constant 0 : index
    %129 = vector.load %arg3[%c8, %c0_107, %c0_108] : memref<9x4x8xbf16, #tpu.memory_space<vmem>>, vector<1x4x8xbf16>
    %130 = vector.shape_cast %129 : vector<1x4x8xbf16> to vector<4x8xbf16>
    %cst_109 = arith.constant dense<0.000000e+00> : vector<256x8xf32>
    %131 = tpu.matmul %128, %130, %cst_109 {dimension_numbers = #tpu.dot_dimension_numbers<[1], [0], [0], [1], [0, 0, 1, 1], [], []>} : vector<256x4xbf16>, vector<4x8xbf16>, vector<256x8xf32> -> vector<256x8xf32>
    %132 = arith.addf %126, %131 : vector<256x8xf32>
    %133 = vector.extract_strided_slice %29 {offsets = [2, 2, 0], sizes = [16, 16, 4], strides = [1, 1, 1]} : vector<18x18x4xbf16> to vector<16x16x4xbf16>
    %134 = vector.shape_cast %133 : vector<16x16x4xbf16> to vector<256x4xbf16>
    %c8_110 = arith.constant 8 : index
    %c0_111 = arith.constant 0 : index
    %c0_112 = arith.constant 0 : index
    %135 = vector.load %arg4[%c8_110, %c0_111, %c0_112] : memref<9x4x8xbf16, #tpu.memory_space<vmem>>, vector<1x4x8xbf16>
    %136 = vector.shape_cast %135 : vector<1x4x8xbf16> to vector<4x8xbf16>
    %cst_113 = arith.constant dense<0.000000e+00> : vector<256x8xf32>
    %137 = tpu.matmul %134, %136, %cst_113 {dimension_numbers = #tpu.dot_dimension_numbers<[1], [0], [0], [1], [0, 0, 1, 1], [], []>} : vector<256x4xbf16>, vector<4x8xbf16>, vector<256x8xf32> -> vector<256x8xf32>
    %138 = arith.addf %132, %137 : vector<256x8xf32>
    %cst_114 = arith.constant 0.000000e+00 : f32
    %139 = vector.broadcast %cst_114 : f32 to vector<256x8xf32>
    %140 = arith.maximumf %138, %139 : vector<256x8xf32>
    %c0_115 = arith.constant 0 : index
    %c0_116 = arith.constant 0 : index
    %141 = vector.load %arg6[%c0_115, %c0_116] : memref<1x8xf32, #tpu.memory_space<vmem>>, vector<1x8xf32>
    %142 = vector.broadcast %141 : vector<1x8xf32> to vector<256x8xf32>
    %143 = arith.mulf %140, %142 : vector<256x8xf32>
    %c0_117 = arith.constant 0 : index
    %c0_118 = arith.constant 0 : index
    %144 = vector.load %arg7[%c0_117, %c0_118] : memref<1x8xf32, #tpu.memory_space<vmem>>, vector<1x8xf32>
    %145 = vector.broadcast %144 : vector<1x8xf32> to vector<256x8xf32>
    %146 = arith.addf %143, %145 : vector<256x8xf32>
    %147 = vector.shape_cast %146 : vector<256x8xf32> to vector<16x16x8xf32>
    %cst_119 = arith.constant 0.000000e+00 : f32
    %148 = vector.broadcast %cst_119 : f32 to vector<1x18x8xf32>
    %c0_120 = arith.constant 0 : index
    %c0_121 = arith.constant 0 : index
    %c0_122 = arith.constant 0 : index
    %149 = vector.load %arg15[%c0_120, %c0_121, %c0_122] : memref<18x18x8xf32, #tpu.memory_space<vmem>>, vector<1x18x8xf32>
    tpu.vector_store %arg15[%c0_120, %c0_121, %c0_122], %148 {strides = array<i32>} : memref<18x18x8xf32, #tpu.memory_space<vmem>>, vector<1x18x8xf32>,
    %cst_123 = arith.constant 0.000000e+00 : f32
    %150 = vector.broadcast %cst_123 : f32 to vector<1x18x8xf32>
    %c17_124 = arith.constant 17 : index
    %c0_125 = arith.constant 0 : index
    %c0_126 = arith.constant 0 : index
    %151 = vector.load %arg15[%c17_124, %c0_125, %c0_126] : memref<18x18x8xf32, #tpu.memory_space<vmem>>, vector<1x18x8xf32>
    tpu.vector_store %arg15[%c17_124, %c0_125, %c0_126], %150 {strides = array<i32>} : memref<18x18x8xf32, #tpu.memory_space<vmem>>, vector<1x18x8xf32>,
    %cst_127 = arith.constant 0.000000e+00 : f32
    %152 = vector.broadcast %cst_127 : f32 to vector<18x1x8xf32>
    %c0_128 = arith.constant 0 : index
    %c0_129 = arith.constant 0 : index
    %c0_130 = arith.constant 0 : index
    %153 = vector.load %arg15[%c0_128, %c0_129, %c0_130] : memref<18x18x8xf32, #tpu.memory_space<vmem>>, vector<18x1x8xf32>
    tpu.vector_store %arg15[%c0_128, %c0_129, %c0_130], %152 {strides = array<i32>} : memref<18x18x8xf32, #tpu.memory_space<vmem>>, vector<18x1x8xf32>,
    %cst_131 = arith.constant 0.000000e+00 : f32
    %154 = vector.broadcast %cst_131 : f32 to vector<18x1x8xf32>
    %c0_132 = arith.constant 0 : index
    %c17_133 = arith.constant 17 : index
    %c0_134 = arith.constant 0 : index
    %155 = vector.load %arg15[%c0_132, %c17_133, %c0_134] : memref<18x18x8xf32, #tpu.memory_space<vmem>>, vector<18x1x8xf32>
    tpu.vector_store %arg15[%c0_132, %c17_133, %c0_134], %154 {strides = array<i32>} : memref<18x18x8xf32, #tpu.memory_space<vmem>>, vector<18x1x8xf32>,
    %c1_135 = arith.constant 1 : index
    %c1_136 = arith.constant 1 : index
    %c0_137 = arith.constant 0 : index
    %156 = vector.load %arg15[%c1_135, %c1_136, %c0_137] : memref<18x18x8xf32, #tpu.memory_space<vmem>>, vector<16x16x8xf32>
    tpu.vector_store %arg15[%c1_135, %c1_136, %c0_137], %147 {strides = array<i32>} : memref<18x18x8xf32, #tpu.memory_space<vmem>>, vector<16x16x8xf32>,
    %c0_138 = arith.constant 0 : index
    %c0_139 = arith.constant 0 : index
    %157 = vector.load %arg9[%c0_138, %c0_139] : memref<1x8xf32, #tpu.memory_space<vmem>>, vector<1x8xf32>
    %c0_140 = arith.constant 0 : index
    %c0_141 = arith.constant 0 : index
    %c0_142 = arith.constant 0 : index
    %158 = vector.load %arg15[%c0_140, %c0_141, %c0_142] : memref<18x18x8xf32, #tpu.memory_space<vmem>>, vector<18x18x8xf32>
    %159 = arith.truncf %158 : vector<18x18x8xf32> to vector<18x18x8xbf16>
    %160 = vector.extract_strided_slice %159 {offsets = [0, 0, 0], sizes = [16, 16, 8], strides = [1, 1, 1]} : vector<18x18x8xbf16> to vector<16x16x8xbf16>
    %161 = vector.shape_cast %160 : vector<16x16x8xbf16> to vector<256x8xbf16>
    %c0_143 = arith.constant 0 : index
    %c0_144 = arith.constant 0 : index
    %c0_145 = arith.constant 0 : index
    %162 = vector.load %arg8[%c0_143, %c0_144, %c0_145] : memref<9x8x8xbf16, #tpu.memory_space<vmem>>, vector<1x8x8xbf16>
    %163 = vector.shape_cast %162 : vector<1x8x8xbf16> to vector<8x8xbf16>
    %cst_146 = arith.constant dense<0.000000e+00> : vector<256x8xf32>
    %164 = tpu.matmul %161, %163, %cst_146 {dimension_numbers = #tpu.dot_dimension_numbers<[1], [0], [0], [1], [0, 0, 1, 1], [], []>} : vector<256x8xbf16>, vector<8x8xbf16>, vector<256x8xf32> -> vector<256x8xf32>
    %165 = vector.broadcast %157 : vector<1x8xf32> to vector<256x8xf32>
    %166 = arith.addf %164, %165 : vector<256x8xf32>
    %167 = vector.extract_strided_slice %159 {offsets = [0, 1, 0], sizes = [16, 16, 8], strides = [1, 1, 1]} : vector<18x18x8xbf16> to vector<16x16x8xbf16>
    %168 = vector.shape_cast %167 : vector<16x16x8xbf16> to vector<256x8xbf16>
    %c1_147 = arith.constant 1 : index
    %c0_148 = arith.constant 0 : index
    %c0_149 = arith.constant 0 : index
    %169 = vector.load %arg8[%c1_147, %c0_148, %c0_149] : memref<9x8x8xbf16, #tpu.memory_space<vmem>>, vector<1x8x8xbf16>
    %170 = vector.shape_cast %169 : vector<1x8x8xbf16> to vector<8x8xbf16>
    %cst_150 = arith.constant dense<0.000000e+00> : vector<256x8xf32>
    %171 = tpu.matmul %168, %170, %cst_150 {dimension_numbers = #tpu.dot_dimension_numbers<[1], [0], [0], [1], [0, 0, 1, 1], [], []>} : vector<256x8xbf16>, vector<8x8xbf16>, vector<256x8xf32> -> vector<256x8xf32>
    %172 = arith.addf %166, %171 : vector<256x8xf32>
    %173 = vector.extract_strided_slice %159 {offsets = [0, 2, 0], sizes = [16, 16, 8], strides = [1, 1, 1]} : vector<18x18x8xbf16> to vector<16x16x8xbf16>
    %174 = vector.shape_cast %173 : vector<16x16x8xbf16> to vector<256x8xbf16>
    %c2_151 = arith.constant 2 : index
    %c0_152 = arith.constant 0 : index
    %c0_153 = arith.constant 0 : index
    %175 = vector.load %arg8[%c2_151, %c0_152, %c0_153] : memref<9x8x8xbf16, #tpu.memory_space<vmem>>, vector<1x8x8xbf16>
    %176 = vector.shape_cast %175 : vector<1x8x8xbf16> to vector<8x8xbf16>
    %cst_154 = arith.constant dense<0.000000e+00> : vector<256x8xf32>
    %177 = tpu.matmul %174, %176, %cst_154 {dimension_numbers = #tpu.dot_dimension_numbers<[1], [0], [0], [1], [0, 0, 1, 1], [], []>} : vector<256x8xbf16>, vector<8x8xbf16>, vector<256x8xf32> -> vector<256x8xf32>
    %178 = arith.addf %172, %177 : vector<256x8xf32>
    %179 = vector.extract_strided_slice %159 {offsets = [1, 0, 0], sizes = [16, 16, 8], strides = [1, 1, 1]} : vector<18x18x8xbf16> to vector<16x16x8xbf16>
    %180 = vector.shape_cast %179 : vector<16x16x8xbf16> to vector<256x8xbf16>
    %c3_155 = arith.constant 3 : index
    %c0_156 = arith.constant 0 : index
    %c0_157 = arith.constant 0 : index
    %181 = vector.load %arg8[%c3_155, %c0_156, %c0_157] : memref<9x8x8xbf16, #tpu.memory_space<vmem>>, vector<1x8x8xbf16>
    %182 = vector.shape_cast %181 : vector<1x8x8xbf16> to vector<8x8xbf16>
    %cst_158 = arith.constant dense<0.000000e+00> : vector<256x8xf32>
    %183 = tpu.matmul %180, %182, %cst_158 {dimension_numbers = #tpu.dot_dimension_numbers<[1], [0], [0], [1], [0, 0, 1, 1], [], []>} : vector<256x8xbf16>, vector<8x8xbf16>, vector<256x8xf32> -> vector<256x8xf32>
    %184 = arith.addf %178, %183 : vector<256x8xf32>
    %185 = vector.extract_strided_slice %159 {offsets = [1, 1, 0], sizes = [16, 16, 8], strides = [1, 1, 1]} : vector<18x18x8xbf16> to vector<16x16x8xbf16>
    %186 = vector.shape_cast %185 : vector<16x16x8xbf16> to vector<256x8xbf16>
    %c4_159 = arith.constant 4 : index
    %c0_160 = arith.constant 0 : index
    %c0_161 = arith.constant 0 : index
    %187 = vector.load %arg8[%c4_159, %c0_160, %c0_161] : memref<9x8x8xbf16, #tpu.memory_space<vmem>>, vector<1x8x8xbf16>
    %188 = vector.shape_cast %187 : vector<1x8x8xbf16> to vector<8x8xbf16>
    %cst_162 = arith.constant dense<0.000000e+00> : vector<256x8xf32>
    %189 = tpu.matmul %186, %188, %cst_162 {dimension_numbers = #tpu.dot_dimension_numbers<[1], [0], [0], [1], [0, 0, 1, 1], [], []>} : vector<256x8xbf16>, vector<8x8xbf16>, vector<256x8xf32> -> vector<256x8xf32>
    %190 = arith.addf %184, %189 : vector<256x8xf32>
    %191 = vector.extract_strided_slice %159 {offsets = [1, 2, 0], sizes = [16, 16, 8], strides = [1, 1, 1]} : vector<18x18x8xbf16> to vector<16x16x8xbf16>
    %192 = vector.shape_cast %191 : vector<16x16x8xbf16> to vector<256x8xbf16>
    %c5_163 = arith.constant 5 : index
    %c0_164 = arith.constant 0 : index
    %c0_165 = arith.constant 0 : index
    %193 = vector.load %arg8[%c5_163, %c0_164, %c0_165] : memref<9x8x8xbf16, #tpu.memory_space<vmem>>, vector<1x8x8xbf16>
    %194 = vector.shape_cast %193 : vector<1x8x8xbf16> to vector<8x8xbf16>
    %cst_166 = arith.constant dense<0.000000e+00> : vector<256x8xf32>
    %195 = tpu.matmul %192, %194, %cst_166 {dimension_numbers = #tpu.dot_dimension_numbers<[1], [0], [0], [1], [0, 0, 1, 1], [], []>} : vector<256x8xbf16>, vector<8x8xbf16>, vector<256x8xf32> -> vector<256x8xf32>
    %196 = arith.addf %190, %195 : vector<256x8xf32>
    %197 = vector.extract_strided_slice %159 {offsets = [2, 0, 0], sizes = [16, 16, 8], strides = [1, 1, 1]} : vector<18x18x8xbf16> to vector<16x16x8xbf16>
    %198 = vector.shape_cast %197 : vector<16x16x8xbf16> to vector<256x8xbf16>
    %c6_167 = arith.constant 6 : index
    %c0_168 = arith.constant 0 : index
    %c0_169 = arith.constant 0 : index
    %199 = vector.load %arg8[%c6_167, %c0_168, %c0_169] : memref<9x8x8xbf16, #tpu.memory_space<vmem>>, vector<1x8x8xbf16>
    %200 = vector.shape_cast %199 : vector<1x8x8xbf16> to vector<8x8xbf16>
    %cst_170 = arith.constant dense<0.000000e+00> : vector<256x8xf32>
    %201 = tpu.matmul %198, %200, %cst_170 {dimension_numbers = #tpu.dot_dimension_numbers<[1], [0], [0], [1], [0, 0, 1, 1], [], []>} : vector<256x8xbf16>, vector<8x8xbf16>, vector<256x8xf32> -> vector<256x8xf32>
    %202 = arith.addf %196, %201 : vector<256x8xf32>
    %203 = vector.extract_strided_slice %159 {offsets = [2, 1, 0], sizes = [16, 16, 8], strides = [1, 1, 1]} : vector<18x18x8xbf16> to vector<16x16x8xbf16>
    %204 = vector.shape_cast %203 : vector<16x16x8xbf16> to vector<256x8xbf16>
    %c7_171 = arith.constant 7 : index
    %c0_172 = arith.constant 0 : index
    %c0_173 = arith.constant 0 : index
    %205 = vector.load %arg8[%c7_171, %c0_172, %c0_173] : memref<9x8x8xbf16, #tpu.memory_space<vmem>>, vector<1x8x8xbf16>
    %206 = vector.shape_cast %205 : vector<1x8x8xbf16> to vector<8x8xbf16>
    %cst_174 = arith.constant dense<0.000000e+00> : vector<256x8xf32>
    %207 = tpu.matmul %204, %206, %cst_174 {dimension_numbers = #tpu.dot_dimension_numbers<[1], [0], [0], [1], [0, 0, 1, 1], [], []>} : vector<256x8xbf16>, vector<8x8xbf16>, vector<256x8xf32> -> vector<256x8xf32>
    %208 = arith.addf %202, %207 : vector<256x8xf32>
    %209 = vector.extract_strided_slice %159 {offsets = [2, 2, 0], sizes = [16, 16, 8], strides = [1, 1, 1]} : vector<18x18x8xbf16> to vector<16x16x8xbf16>
    %210 = vector.shape_cast %209 : vector<16x16x8xbf16> to vector<256x8xbf16>
    %c8_175 = arith.constant 8 : index
    %c0_176 = arith.constant 0 : index
    %c0_177 = arith.constant 0 : index
    %211 = vector.load %arg8[%c8_175, %c0_176, %c0_177] : memref<9x8x8xbf16, #tpu.memory_space<vmem>>, vector<1x8x8xbf16>
    %212 = vector.shape_cast %211 : vector<1x8x8xbf16> to vector<8x8xbf16>
    %cst_178 = arith.constant dense<0.000000e+00> : vector<256x8xf32>
    %213 = tpu.matmul %210, %212, %cst_178 {dimension_numbers = #tpu.dot_dimension_numbers<[1], [0], [0], [1], [0, 0, 1, 1], [], []>} : vector<256x8xbf16>, vector<8x8xbf16>, vector<256x8xf32> -> vector<256x8xf32>
    %214 = arith.addf %208, %213 : vector<256x8xf32>
    %cst_179 = arith.constant 0.000000e+00 : f32
    %215 = vector.broadcast %cst_179 : f32 to vector<256x8xf32>
    %216 = arith.maximumf %214, %215 : vector<256x8xf32>
    %c0_180 = arith.constant 0 : index
    %c0_181 = arith.constant 0 : index
    %217 = vector.load %arg10[%c0_180, %c0_181] : memref<1x8xf32, #tpu.memory_space<vmem>>, vector<1x8xf32>
    %218 = vector.broadcast %217 : vector<1x8xf32> to vector<256x8xf32>
    %219 = arith.mulf %216, %218 : vector<256x8xf32>
    %c0_182 = arith.constant 0 : index
    %c0_183 = arith.constant 0 : index
    %220 = vector.load %arg11[%c0_182, %c0_183] : memref<1x8xf32, #tpu.memory_space<vmem>>, vector<1x8xf32>
    %221 = vector.broadcast %220 : vector<1x8xf32> to vector<256x8xf32>
    %222 = arith.addf %219, %221 : vector<256x8xf32>
    %223 = tpu.transpose %222, [1, 0] : vector<256x8xf32> -> vector<8x256xf32>
    %c0_184 = arith.constant 0 : index
    %c0_185 = arith.constant 0 : index
    %c0_186 = arith.constant 0 : index
    %224 = vector.load %arg12[%c0_184, %c0_185, %c0_186] : memref<1x8x256xf32, #tpu.memory_space<vmem>>, vector<1x8x256xf32>
    %225 = vector.shape_cast %224 : vector<1x8x256xf32> to vector<8x256xf32>
    %226 = vector.shape_cast %223 : vector<8x256xf32> to vector<1x8x256xf32>
    tpu.vector_store %arg12[%c0_184, %c0_185, %c0_186], %226 {strides = array<i32>} : memref<1x8x256xf32, #tpu.memory_space<vmem>>, vector<1x8x256xf32>,
    return
  }
  func.func @transform_0(%arg0: i32) -> (i32, i32, i32, i32) {
    %c0_i32 = arith.constant 0 : i32
    %c0_i32_0 = arith.constant 0 : i32
    %c0_i32_1 = arith.constant 0 : i32
    %c0_i32_2 = arith.constant 0 : i32
    return %arg0, %c0_i32, %c0_i32_0, %c0_i32_1 : i32, i32, i32, i32
  }
  func.func @transform_1(%arg0: i32) -> (i32, i32, i32) {
    %c0_i32 = arith.constant 0 : i32
    %c0_i32_0 = arith.constant 0 : i32
    %c0_i32_1 = arith.constant 0 : i32
    return %arg0, %c0_i32, %c0_i32_0 : i32, i32, i32
  }
  func.func @transform_2(%arg0: i32) -> (i32, i32, i32) {
    %c0_i32 = arith.constant 0 : i32
    %c0_i32_0 = arith.constant 0 : i32
    %c0_i32_1 = arith.constant 0 : i32
    %c0_i32_2 = arith.constant 0 : i32
    return %c0_i32, %c0_i32_0, %c0_i32_1 : i32, i32, i32
  }
  func.func @transform_3(%arg0: i32) -> (i32, i32, i32) {
    %c0_i32 = arith.constant 0 : i32
    %c0_i32_0 = arith.constant 0 : i32
    %c0_i32_1 = arith.constant 0 : i32
    %c0_i32_2 = arith.constant 0 : i32
    return %c0_i32, %c0_i32_0, %c0_i32_1 : i32, i32, i32
  }
  func.func @transform_4(%arg0: i32) -> (i32, i32) {
    %c0_i32 = arith.constant 0 : i32
    %c0_i32_0 = arith.constant 0 : i32
    %c0_i32_1 = arith.constant 0 : i32
    return %c0_i32, %c0_i32_0 : i32, i32
  }
  func.func @transform_5(%arg0: i32) -> (i32, i32) {
    %c0_i32 = arith.constant 0 : i32
    %c0_i32_0 = arith.constant 0 : i32
    %c0_i32_1 = arith.constant 0 : i32
    return %c0_i32, %c0_i32_0 : i32, i32
  }
  func.func @transform_6(%arg0: i32) -> (i32, i32) {
    %c0_i32 = arith.constant 0 : i32
    %c0_i32_0 = arith.constant 0 : i32
    %c0_i32_1 = arith.constant 0 : i32
    return %c0_i32, %c0_i32_0 : i32, i32
  }
  func.func @transform_7(%arg0: i32) -> (i32, i32, i32) {
    %c0_i32 = arith.constant 0 : i32
    %c0_i32_0 = arith.constant 0 : i32
    %c0_i32_1 = arith.constant 0 : i32
    %c0_i32_2 = arith.constant 0 : i32
    return %c0_i32, %c0_i32_0, %c0_i32_1 : i32, i32, i32
  }
  func.func @transform_8(%arg0: i32) -> (i32, i32) {
    %c0_i32 = arith.constant 0 : i32
    %c0_i32_0 = arith.constant 0 : i32
    %c0_i32_1 = arith.constant 0 : i32
    return %c0_i32, %c0_i32_0 : i32, i32
  }
  func.func @transform_9(%arg0: i32) -> (i32, i32) {
    %c0_i32 = arith.constant 0 : i32
    %c0_i32_0 = arith.constant 0 : i32
    %c0_i32_1 = arith.constant 0 : i32
    return %c0_i32, %c0_i32_0 : i32, i32
  }
  func.func @transform_10(%arg0: i32) -> (i32, i32) {
    %c0_i32 = arith.constant 0 : i32
    %c0_i32_0 = arith.constant 0 : i32
    %c0_i32_1 = arith.constant 0 : i32
    return %c0_i32, %c0_i32_0 : i32, i32
  }
  func.func @transform_11(%arg0: i32) -> (i32, i32, i32) {
    %c0_i32 = arith.constant 0 : i32
    %c0_i32_0 = arith.constant 0 : i32
    %c0_i32_1 = arith.constant 0 : i32
    return %arg0, %c0_i32, %c0_i32_0 : i32, i32, i32
  }
}

</mosaic_0001>

<bundles_post_ra>
// kernel: expansive_block_forward.1
= control target key start
LH: loop header
LB: loop body
LE: loop exit
PB: predicated region body
PF: predicated region fallthrough
CT: control target
= control target key end

     0   :  { %s10951_s17 = smov 0   ;;  %s13498_s0 = inlined_call_operand.vmem [shape: bf16[2,16,16,4], index: 0, kind: input, shape index: {}]   ;;  %s13499_s1 = inlined_call_operand.vmem [shape: f32[2,4,256], index: 1, kind: input, shape index: {}]   ;;  %s13500_s2 = inlined_call_operand.vmem [shape: bf16[9,4,8], index: 2, kind: input, shape index: {}]   ;;  %s13501_s3 = inlined_call_operand.vmem [shape: bf16[9,4,8], index: 3, kind: input, shape index: {}]   ;;  %s13502_s4 = inlined_call_operand.vmem [shape: f32[1,8], index: 4, kind: input, shape index: {}]   ;;  %s13503_s5 = inlined_call_operand.vmem [shape: f32[1,8], index: 5, kind: input, shape index: {}]   ;;  %s13504_s6 = inlined_call_operand.vmem [shape: f32[1,8], index: 6, kind: input, shape index: {}]   ;;  %s13505_s7 = inlined_call_operand.vmem [shape: bf16[9,8,8], index: 7, kind: input, shape index: {}]   ;;  %s13506_s8 = inlined_call_operand.vmem [shape: f32[1,8], index: 8, kind: input, shape index: {}]   ;;  %s13507_s9 = inlined_call_operand.vmem [shape: f32[1,8], index: 9, kind: input, shape index: {}]   ;;  %s13508_s10 = inlined_call_operand.vmem [shape: f32[1,8], index: 10, kind: input, shape index: {}]   ;;  %s13509_s11 = inlined_call_operand.vmem [shape: f32[2,8,256], index: 11, kind: output, shape index: {}]  }
   0x1 LB: > { %s8044_s18 = sadd.s32 4294967295, %s10888_s17   ;;  %p8048_p0 = scmp.ge.s32.totalorder %s10888_s17, 1  ;;  %s10888_s17 = sphi %s10951_s17, %s21_s17  }
   0x2   : > { %p347_p1 = scmp.lt.s32.totalorder %s10888_s17, 3 }
   0x4   : > { %p348_p2 = pnand %p8048_p0, %p347_p1 }
   0x6   : > { %351 = sbr.rel (%p348_p2) target bundleno = 2149 (0x865), region = 64 }
   0xd   : > { %p392_p3 = scmp.lt.s32.totalorder %s8044_s18, 1  ;;  %vm440_vm0 = vcmask 31744   ;;  %vm449_vm1 = vcmask 24576   ;;  %v13510_v1 = vmov 0.0   ;;  %vm443_vm2 = vcmask 25600  }
   0xe   : > { %619 = vst.msk [vmem:[#allocation3] sm:$0xff] %vm440_vm0, %v13510_v1  ;;  %620 = vst.msk [vmem:[#allocation3 + $0x8] sm:$0xff] %vm440_vm0, %v13510_v1  ;;  %v876_v2 = vld [vmem:[%s13500_s2] sm:$0x3]  ;;  %vm931_vm3 = vcmask 1041408   ;;  %vm2218_vm4 = vcmask 1046528  }
   0xf   : > { %s13780_s18 = smov (!%p392_p3, %s8044_s18), 1  ;;  %441 = vst.msk [vmem:[#allocation2] sm:$0xff] %vm440_vm0, %v13510_v1  ;;  %442 = vst.msk [vmem:[#allocation2 + $0x8] sm:$0xff] %vm440_vm0, %v13510_v1  ;;  %10844 = vmatprep.subr.msk.bf16.mxu1 %vm931_vm3, %v876_v2  ;;  %v933_v3 = vsel %vm931_vm3, %v876_v2, 0  ;;  %v11144_v9 = vld [vmem:[%s13500_s2 + $0x4] sm:$0x3] }
  0x10   : > { %s8520_s19 = sshll.u32 %s13780_s18, 3  ;;  %446 = vst.msk [vmem:[#allocation2 + $0x198] sm:$0xff] %vm440_vm0, %v13510_v1  ;;  %447 = vst.msk [vmem:[#allocation2 + $0x1a0] sm:$0xff] %vm440_vm0, %v13510_v1  ;;  %9061 = vmatpush3.bf16.msra.mxu1 %v933_v3  ;;  %10848 = vmatprep.subr.msk.bf16.mxu0 %vm931_vm3, %v11144_v9  ;;  %v11152_v10 = vsel %vm931_vm3, %v11144_v9, 0  ;;  %v11162_v14 = vld [vmem:[%s13501_s3 + $0x4] sm:$0x3] }
  0x11   : > { %s401_s22 = scalar_lea.vmem %s13499_s1, %s8520_s19  ;;  %451 = vst.msk [vmem:[#allocation2 + $0x18] sm:$0x1] %vm449_vm1, %v13510_v1  ;;  %452 = vst.msk [vmem:[#allocation2 + $0x30] sm:$0x1] %vm449_vm1, %v13510_v1  ;;  %9197 = vmatpush3.bf16.msra.mxu0 %v11152_v10  ;;  %s8519_s29 = sshll.u32 %s13780_s18, 7  ;;  %vm5650_vm6 = vcmask 1043456  }
  0x12   : > { %v10965_v0 = vld [vmem:[%s401_s22] sm:$0xff]  ;;  %453 = vst.msk [vmem:[#allocation2 + $0x48] sm:$0x1] %vm449_vm1, %v13510_v1  ;;  %454 = vst.msk [vmem:[#allocation2 + $0x60] sm:$0x1] %vm449_vm1, %v13510_v1  ;;  %10850 = vmatprep.subr.msk.bf16.mxu0 %vm931_vm3, %v11162_v14  ;;  %s11170_s13 = scalar_lea.vmem %s13498_s0, %s8519_s29  ;;  %vm5425_vm7 = vcmask 64512  }
  0x13   : > { %555 = vxpose.xlu0.b32.start.end [1/1] (short) %v10965_v0, 128  ;;  %455 = vst.msk [vmem:[#allocation2 + $0x78] sm:$0x1] %vm449_vm1, %v13510_v1  ;;  %456 = vst.msk [vmem:[#allocation2 + $0x90] sm:$0x1] %vm449_vm1, %v13510_v1  ;;  %v553_v15 = vcombine.high %v10965_v0, %v10965_v0  ;;  %v8523_v16 = vld [vmem:[%s11170_s13] sm:$0xff]   ;;  %v8586_v19 = vld [vmem:[%s11170_s13 + $0x8] sm:$0xff]  }
  0x14   : > { %457 = vst.msk [vmem:[#allocation2 + $0xa8] sm:$0x1] %vm449_vm1, %v13510_v1  ;;  %458 = vst.msk [vmem:[#allocation2 + $0xc0] sm:$0x1] %vm449_vm1, %v13510_v1  ;;  %v8524_v17 = vunpack.c.l.bf16 %v8523_v16  ;;  %v8525_v18 = vunpack.c.h.bf16 %v8523_v16  ;;  %v8528_v20 = vunpack.c.l.bf16 %v8586_v19  ;;  %v8529_v21 = vunpack.c.h.bf16 %v8586_v19  ;;  %v8587_v22 = vld [vmem:[%s11170_s13 + $0x10] sm:$0xff]   ;;  %v8588_v25 = vld [vmem:[%s11170_s13 + $0x18] sm:$0xff]  }
  0x15   : > { %459 = vst.msk [vmem:[#allocation2 + $0xd8] sm:$0x1] %vm449_vm1, %v13510_v1  ;;  %460 = vst.msk [vmem:[#allocation2 + $0xf0] sm:$0x1] %vm449_vm1, %v13510_v1  ;;  %v697_v5 = vld [vmem:[#allocation3 + $0x8] sm:$0xff]  ;;  %v8532_v23 = vunpack.c.l.bf16 %v8587_v22  ;;  %v8533_v24 = vunpack.c.h.bf16 %v8587_v22  ;;  %v8536_v26 = vunpack.c.l.bf16 %v8588_v25  ;;  %v8537_v27 = vunpack.c.h.bf16 %v8588_v25  ;;  %v8589_v28 = vld [vmem:[%s11170_s13 + $0x20] sm:$0xff]  }
  0x16   : > { %461 = vst.msk [vmem:[#allocation2 + $0x108] sm:$0x1] %vm449_vm1, %v13510_v1  ;;  %462 = vst.msk [vmem:[#allocation2 + $0x120] sm:$0x1] %vm449_vm1, %v13510_v1  ;;  %v8540_v29 = vunpack.c.l.bf16 %v8589_v28  ;;  %v8541_v30 = vunpack.c.h.bf16 %v8589_v28  ;;  %v8590_v31 = vld [vmem:[%s11170_s13 + $0x28] sm:$0xff]   ;;  %v8591_v34 = vld [vmem:[%s11170_s13 + $0x30] sm:$0xff]  }
  0x17   : > { %463 = vst.msk [vmem:[#allocation2 + $0x138] sm:$0x1] %vm449_vm1, %v13510_v1  ;;  %464 = vst.msk [vmem:[#allocation2 + $0x150] sm:$0x1] %vm449_vm1, %v13510_v1  ;;  %v8544_v32 = vunpack.c.l.bf16 %v8590_v31  ;;  %v8545_v33 = vunpack.c.h.bf16 %v8590_v31  ;;  %v8548_v35 = vunpack.c.l.bf16 %v8591_v34  ;;  %v8549_v36 = vunpack.c.h.bf16 %v8591_v34  ;;  %v8592_v37 = vld [vmem:[%s11170_s13 + $0x38] sm:$0xff]   ;;  %v8593_v40 = vld [vmem:[%s11170_s13 + $0x40] sm:$0xff]  }
  0x18   : > { %465 = vst.msk [vmem:[#allocation2 + $0x168] sm:$0x1] %vm449_vm1, %v13510_v1  ;;  %466 = vst.msk [vmem:[#allocation2 + $0x180] sm:$0x1] %vm449_vm1, %v13510_v1  ;;  %v8552_v38 = vunpack.c.l.bf16 %v8592_v37  ;;  %v8553_v39 = vunpack.c.h.bf16 %v8592_v37  ;;  %v8556_v41 = vunpack.c.l.bf16 %v8593_v40  ;;  %v8557_v42 = vunpack.c.h.bf16 %v8593_v40  ;;  %v8594_v43 = vld [vmem:[%s11170_s13 + $0x48] sm:$0xff]   ;;  %v8595_v46 = vld [vmem:[%s11170_s13 + $0x50] sm:$0xff]  }
  0x19   : > { %469 = vst.msk [vmem:[#allocation2 + $0x29] sm:$0x1] %vm449_vm1, %v13510_v1  ;;  %470 = vst.msk [vmem:[#allocation2 + $0x41] sm:$0x1] %vm449_vm1, %v13510_v1  ;;  %v8560_v44 = vunpack.c.l.bf16 %v8594_v43  ;;  %v8561_v45 = vunpack.c.h.bf16 %v8594_v43  ;;  %v8564_v47 = vunpack.c.l.bf16 %v8595_v46  ;;  %v8565_v48 = vunpack.c.h.bf16 %v8595_v46  ;;  %v8596_v49 = vld [vmem:[%s11170_s13 + $0x58] sm:$0xff]   ;;  %v8597_v52 = vld [vmem:[%s11170_s13 + $0x60] sm:$0xff]  }
  0x1a   : > { %471 = vst.msk [vmem:[#allocation2 + $0x59] sm:$0x1] %vm449_vm1, %v13510_v1  ;;  %472 = vst.msk [vmem:[#allocation2 + $0x71] sm:$0x1] %vm449_vm1, %v13510_v1  ;;  %v8568_v50 = vunpack.c.l.bf16 %v8596_v49  ;;  %v8569_v51 = vunpack.c.h.bf16 %v8596_v49  ;;  %v8572_v53 = vunpack.c.l.bf16 %v8597_v52  ;;  %v8573_v54 = vunpack.c.h.bf16 %v8597_v52  ;;  %v8598_v55 = vld [vmem:[%s11170_s13 + $0x68] sm:$0xff]   ;;  %v8599_v58 = vld [vmem:[%s11170_s13 + $0x70] sm:$0xff]  }
  0x1b   : > { %473 = vst.msk [vmem:[#allocation2 + $0x89] sm:$0x1] %vm449_vm1, %v13510_v1  ;;  %474 = vst.msk [vmem:[#allocation2 + $0xa1] sm:$0x1] %vm449_vm1, %v13510_v1  ;;  %v8576_v56 = vunpack.c.l.bf16 %v8598_v55  ;;  %v8577_v57 = vunpack.c.h.bf16 %v8598_v55  ;;  %v8580_v59 = vunpack.c.l.bf16 %v8599_v58  ;;  %v8581_v60 = vunpack.c.h.bf16 %v8599_v58  ;;  %v1096_v62 = vld [vmem:[%s13501_s3] sm:$0x3] }
  0x1c   : > { %475 = vst.msk [vmem:[#allocation2 + $0xb9] sm:$0x1] %vm449_vm1, %v13510_v1  ;;  %476 = vst.msk [vmem:[#allocation2 + $0xd1] sm:$0x1] %vm449_vm1, %v13510_v1  ;;  %10845 = vmatprep.subr.msk.bf16.mxu1 %vm931_vm3, %v1096_v62  ;;  %v11245_v19 = vld [vmem:[%s13500_s2 + $0x6] sm:$0x3] }
  0x1d   : > { %477 = vst.msk [vmem:[#allocation2 + $0xe9] sm:$0x1] %vm449_vm1, %v13510_v1  ;;  %478 = vst.msk [vmem:[#allocation2 + $0x101] sm:$0x1] %vm449_vm1, %v13510_v1  ;;  %vm1341_vm5 = vsmask.f32 7424 }
  0x1e   : > { %479 = vst.msk [vmem:[#allocation2 + $0x119] sm:$0x1] %vm449_vm1, %v13510_v1  ;;  %480 = vst.msk [vmem:[#allocation2 + $0x131] sm:$0x1] %vm449_vm1, %v13510_v1  ;;  %vm5434_vm8 = vcmask 57344   ;;  %vm5428_vm9 = vcmask 58368  }
  0x1f   : > { %481 = vst.msk [vmem:[#allocation2 + $0x149] sm:$0x1] %vm449_vm1, %v13510_v1  ;;  %482 = vst.msk [vmem:[#allocation2 + $0x161] sm:$0x1] %vm449_vm1, %v13510_v1  ;;  %s8521_s25 = sshll.u32 %s13780_s18, 4 }
  0x20   : > { %483 = vst.msk [vmem:[#allocation2 + $0x179] sm:$0x1] %vm449_vm1, %v13510_v1  ;;  %484 = vst.msk [vmem:[#allocation2 + $0x191] sm:$0x1] %vm449_vm1, %v13510_v1  ;;  %s406_s28 = scalar_lea.vmem %s13509_s11, %s8521_s25 }
  0x21   : > { %623 = vst.msk [vmem:[#allocation3 + $0x198] sm:$0xff] %vm440_vm0, %v13510_v1  ;;  %624 = vst.msk [vmem:[#allocation3 + $0x1a0] sm:$0xff] %vm440_vm0, %v13510_v1 }
  0x22   : > { %627 = vst.msk [vmem:[#allocation3 + $0x18] sm:$0x1] %vm449_vm1, %v13510_v1  ;;  %628 = vst.msk [vmem:[#allocation3 + $0x30] sm:$0x1] %vm449_vm1, %v13510_v1 }
  0x23   : > { %629 = vst.msk [vmem:[#allocation3 + $0x48] sm:$0x1] %vm449_vm1, %v13510_v1  ;;  %630 = vst.msk [vmem:[#allocation3 + $0x60] sm:$0x1] %vm449_vm1, %v13510_v1 }
  0x24   : > { %631 = vst.msk [vmem:[#allocation3 + $0x78] sm:$0x1] %vm449_vm1, %v13510_v1  ;;  %632 = vst.msk [vmem:[#allocation3 + $0x90] sm:$0x1] %vm449_vm1, %v13510_v1 }
  0x25   : > { %633 = vst.msk [vmem:[#allocation3 + $0xa8] sm:$0x1] %vm449_vm1, %v13510_v1  ;;  %634 = vst.msk [vmem:[#allocation3 + $0xc0] sm:$0x1] %vm449_vm1, %v13510_v1 }
  0x26   : > { %635 = vst.msk [vmem:[#allocation3 + $0xd8] sm:$0x1] %vm449_vm1, %v13510_v1  ;;  %636 = vst.msk [vmem:[#allocation3 + $0xf0] sm:$0x1] %vm449_vm1, %v13510_v1 }
  0x27   : > { %637 = vst.msk [vmem:[#allocation3 + $0x108] sm:$0x1] %vm449_vm1, %v13510_v1  ;;  %638 = vst.msk [vmem:[#allocation3 + $0x120] sm:$0x1] %vm449_vm1, %v13510_v1 }
  0x28   : > { %639 = vst.msk [vmem:[#allocation3 + $0x138] sm:$0x1] %vm449_vm1, %v13510_v1  ;;  %640 = vst.msk [vmem:[#allocation3 + $0x150] sm:$0x1] %vm449_vm1, %v13510_v1 }
  0x29   : > { %641 = vst.msk [vmem:[#allocation3 + $0x168] sm:$0x1] %vm449_vm1, %v13510_v1  ;;  %642 = vst.msk [vmem:[#allocation3 + $0x180] sm:$0x1] %vm449_vm1, %v13510_v1 }
  0x2a   : > { %645 = vst.msk [vmem:[#allocation3 + $0x29] sm:$0x1] %vm449_vm1, %v13510_v1  ;;  %646 = vst.msk [vmem:[#allocation3 + $0x41] sm:$0x1] %vm449_vm1, %v13510_v1 }
  0x2b   : > { %647 = vst.msk [vmem:[#allocation3 + $0x59] sm:$0x1] %vm449_vm1, %v13510_v1  ;;  %648 = vst.msk [vmem:[#allocation3 + $0x71] sm:$0x1] %vm449_vm1, %v13510_v1 }
  0x2c   : > { %649 = vst.msk [vmem:[#allocation3 + $0x89] sm:$0x1] %vm449_vm1, %v13510_v1  ;;  %650 = vst.msk [vmem:[#allocation3 + $0xa1] sm:$0x1] %vm449_vm1, %v13510_v1 }
  0x2d   : > { %651 = vst.msk [vmem:[#allocation3 + $0xb9] sm:$0x1] %vm449_vm1, %v13510_v1  ;;  %652 = vst.msk [vmem:[#allocation3 + $0xd1] sm:$0x1] %vm449_vm1, %v13510_v1 }
  0x2e   : > { %653 = vst.msk [vmem:[#allocation3 + $0xe9] sm:$0x1] %vm449_vm1, %v13510_v1  ;;  %654 = vst.msk [vmem:[#allocation3 + $0x101] sm:$0x1] %vm449_vm1, %v13510_v1 }
  0x2f   : > { %655 = vst.msk [vmem:[#allocation3 + $0x119] sm:$0x1] %vm449_vm1, %v13510_v1  ;;  %656 = vst.msk [vmem:[#allocation3 + $0x131] sm:$0x1] %vm449_vm1, %v13510_v1 }
  0x30   : > { %657 = vst.msk [vmem:[#allocation3 + $0x149] sm:$0x1] %vm449_vm1, %v13510_v1  ;;  %658 = vst.msk [vmem:[#allocation3 + $0x161] sm:$0x1] %vm449_vm1, %v13510_v1 }
  0x31   : > { %659 = vst.msk [vmem:[#allocation3 + $0x179] sm:$0x1] %vm449_vm1, %v13510_v1  ;;  %660 = vst.msk [vmem:[#allocation3 + $0x191] sm:$0x1] %vm449_vm1, %v13510_v1 }
  0x32   : > { %626 = vst.msk [vmem:[#allocation3] sm:$0x1] %vm449_vm1, %v13510_v1  ;;  %450 = vst.msk [vmem:[#allocation2] sm:$0x1] %vm449_vm1, %v13510_v1 }
  0x33   : > { %467 = vst.msk [vmem:[#allocation2 + $0x198] sm:$0x1] %vm449_vm1, %v13510_v1  ;;  %643 = vst.msk [vmem:[#allocation3 + $0x198] sm:$0x1] %vm449_vm1, %v13510_v1 }
  0x34   : > { %621 = vst.msk [vmem:[#allocation3 + $0x10] sm:$0x3] %vm443_vm2, %v13510_v1  ;;  %444 = vst.msk [vmem:[#allocation2 + $0x10] sm:$0x3] %vm443_vm2, %v13510_v1 }
  0x35   : > { %448 = vst.msk [vmem:[#allocation2 + $0x1a8] sm:$0x3] %vm443_vm2, %v13510_v1  ;;  %625 = vst.msk [vmem:[#allocation3 + $0x1a8] sm:$0x3] %vm443_vm2, %v13510_v1 }
  0x36   : > { %644 = vst.msk [vmem:[#allocation3 + $0x11] sm:$0x1] %vm449_vm1, %v13510_v1  ;;  %468 = vst.msk [vmem:[#allocation2 + $0x11] sm:$0x1] %vm449_vm1, %v13510_v1 }
  0x37   : > { %485 = vst.msk [vmem:[#allocation2 + $0x1a9] sm:$0x1] %vm449_vm1, %v13510_v1  ;;  %661 = vst.msk [vmem:[#allocation3 + $0x1a9] sm:$0x1] %vm449_vm1, %v13510_v1 }
  0x38   : > { %13597 = vst [vmem:[#allocation5_spill] sm:$0xff] %v11152_v10  ;;  %519 = vst.msk [vmem:[#allocation2 + $0x19] sm:$0xff] %vm440_vm0, %v8524_v17  ;;  %v2644_v17 = vsel %vm931_vm3, %v11162_v14, 0 }
  0x39   : > { %v696_v4 = vld [vmem:[#allocation3] sm:$0xff]  ;;  %520 = vst.msk [vmem:[#allocation2 + $0x21] sm:$0xff] %vm440_vm0, %v8525_v18  ;;  %521 = vst.msk [vmem:[#allocation2 + $0x31] sm:$0xff] %vm440_vm0, %v8528_v20 }
  0x3a   : > { %v11137_v7 = vpack.c.bf16 %v697_v5, %v696_v4  ;;  %522 = vst.msk [vmem:[#allocation2 + $0x39] sm:$0xff] %vm440_vm0, %v8529_v21  ;;  %523 = vst.msk [vmem:[#allocation2 + $0x49] sm:$0xff] %vm440_vm0, %v8532_v23 }
  0x3b   : > { %524 = vst.msk [vmem:[#allocation2 + $0x51] sm:$0xff] %vm440_vm0, %v8533_v24  ;;  %525 = vst.msk [vmem:[#allocation2 + $0x61] sm:$0xff] %vm440_vm0, %v8536_v26 }
  0x3c   : > { %9062 = vmatprep.mubr.msk.bf16.mxu1 %vm440_vm0, %v11137_v7  ;;  %v2219_v11 = vrot.slane %v11137_v7, 1  ;;  %526 = vst.msk [vmem:[#allocation2 + $0x69] sm:$0xff] %vm440_vm0, %v8537_v27  ;;  %527 = vst.msk [vmem:[#allocation2 + $0x79] sm:$0xff] %vm440_vm0, %v8540_v29 }
  0x3d   : > { %v698_v6 = vld [vmem:[#allocation3 + $0x10] sm:$0x3]  ;;  %528 = vst.msk [vmem:[#allocation2 + $0x81] sm:$0xff] %vm440_vm0, %v8541_v30  ;;  %529 = vst.msk [vmem:[#allocation2 + $0x91] sm:$0xff] %vm440_vm0, %v8544_v32 }
  0x3e   : > { %v11139_v8 = vpack.c.bf16 %v698_v6, %v698_v6  ;;  %530 = vst.msk [vmem:[#allocation2 + $0x99] sm:$0xff] %vm440_vm0, %v8545_v33  ;;  %531 = vst.msk [vmem:[#allocation2 + $0xa9] sm:$0xff] %vm440_vm0, %v8548_v35 }
  0x3f   : > { %532 = vst.msk [vmem:[#allocation2 + $0xb1] sm:$0xff] %vm440_vm0, %v8549_v36  ;;  %533 = vst.msk [vmem:[#allocation2 + $0xc1] sm:$0xff] %vm440_vm0, %v8552_v38 }
  0x40   : > { %v2220_v12 = vrot.slane %v11139_v8, 1  ;;  %534 = vst.msk [vmem:[#allocation2 + $0xc9] sm:$0xff] %vm440_vm0, %v8553_v39  ;;  %535 = vst.msk [vmem:[#allocation2 + $0xd9] sm:$0xff] %vm440_vm0, %v8556_v41 }
  0x41   : > { %536 = vst.msk [vmem:[#allocation2 + $0xe1] sm:$0xff] %vm440_vm0, %v8557_v42  ;;  %537 = vst.msk [vmem:[#allocation2 + $0xf1] sm:$0xff] %vm440_vm0, %v8560_v44 }
  0x42   : > { %v2221_v13 = vsel %vm2218_vm4, %v2219_v11, %v2220_v12  ;;  %538 = vst.msk [vmem:[#allocation2 + $0xf9] sm:$0xff] %vm440_vm0, %v8561_v45  ;;  %539 = vst.msk [vmem:[#allocation2 + $0x109] sm:$0xff] %vm440_vm0, %v8564_v47  ;;  %v1146_v12 = vsel %vm931_vm3, %v1096_v62, 0 }
  0x43   : > { %9198 = vmatprep.mubr.msk.bf16.mxu0 %vm440_vm0, %v2221_v13  ;;  %540 = vst.msk [vmem:[#allocation2 + $0x111] sm:$0xff] %vm440_vm0, %v8565_v48  ;;  %541 = vst.msk [vmem:[#allocation2 + $0x121] sm:$0xff] %vm440_vm0, %v8568_v50 }
  0x44   : > { %542 = vst.msk [vmem:[#allocation2 + $0x129] sm:$0xff] %vm440_vm0, %v8569_v51  ;;  %543 = vst.msk [vmem:[#allocation2 + $0x139] sm:$0xff] %vm440_vm0, %v8572_v53 }
  0x45   : > { %544 = vst.msk [vmem:[#allocation2 + $0x141] sm:$0xff] %vm440_vm0, %v8573_v54  ;;  %545 = vst.msk [vmem:[#allocation2 + $0x151] sm:$0xff] %vm440_vm0, %v8576_v56 }
  0x46   : > { %546 = vst.msk [vmem:[#allocation2 + $0x159] sm:$0xff] %vm440_vm0, %v8577_v57  ;;  %547 = vst.msk [vmem:[#allocation2 + $0x169] sm:$0xff] %vm440_vm0, %v8580_v59 }
  0x47   : > { %548 = vst.msk [vmem:[#allocation2 + $0x171] sm:$0xff] %vm440_vm0, %v8581_v60 }
  0x50   : > { %587 = vxpose.xlu0.b32.start.end [1/1] (short) %v553_v15, 128 }
  0x93   : > { %v571_v61 = vpop.trf.xlu0 }
  0x94   : > { %663 = vst.msk [vmem:[#allocation3 + $0x19] sm:$0xff] %vm440_vm0, %v571_v61 }
  0x97   : > { %v572_v63 = vpop.trf.xlu0 }
  0x98   : > { %664 = vst.msk [vmem:[#allocation3 + $0x21] sm:$0xff] %vm440_vm0, %v572_v63 }
  0x9b   : > { %v573_v0 = vpop.trf.xlu0  ;;  %v699_v3 = vld [vmem:[#allocation3 + $0x18] sm:$0xff] }
  0x9c   : > { %665 = vst.msk [vmem:[#allocation3 + $0x31] sm:$0xff] %vm440_vm0, %v573_v0 }
  0x9f   : > { %v574_v2 = vpop.trf.xlu0  ;;  %v700_v4 = vld [vmem:[#allocation3 + $0x20] sm:$0xff]  ;;  %v701_v5 = vld [vmem:[#allocation3 + $0x28] sm:$0x3] }
  0xa0   : > { %666 = vst.msk [vmem:[#allocation3 + $0x39] sm:$0xff] %vm440_vm0, %v574_v2  ;;  %v11227_v6 = vpack.c.bf16 %v700_v4, %v699_v3  ;;  %v11229_v11 = vpack.c.bf16 %v701_v5, %v701_v5  ;;  %v786_v2 = vld [vmem:[#allocation2] sm:$0xff]  ;;  %v787_v3 = vld [vmem:[#allocation2 + $0x8] sm:$0xff]  ;;  %v788_v4 = vld [vmem:[#allocation2 + $0x10] sm:$0x3] }
  0xa2   : > { %9063 = vmatmul.mubr.msk.bf16.vlgmr.msra.gmra.mrb[0].mxu1 %vm440_vm0, %v11227_v6  ;;  %v2222_v13 = vrot.slane %v11227_v6, 1  ;;  %v2223_v15 = vrot.slane %v11229_v11, 1 }
  0xa3   : > { %v575_v16 = vpop.trf.xlu0  ;;  %9095 = vmatpush3.bf16.msra.mxu1 %v1146_v12  ;;  %v702_v21 = vld [vmem:[#allocation3 + $0x30] sm:$0xff] }
  0xa4   : > { %667 = vst.msk [vmem:[#allocation3 + $0x49] sm:$0xff] %vm440_vm0, %v575_v16  ;;  %v11240_v18 = vsel %vm2218_vm4, %v2222_v13, %v2223_v15  ;;  %v11320_v15 = vpack.c.bf16 %v787_v3, %v786_v2  ;;  %v11322_v16 = vpack.c.bf16 %v788_v4, %v788_v4  ;;  %v797_v2 = vld [vmem:[#allocation2 + $0x58] sm:$0x3]  ;;  %v798_v4 = vld [vmem:[#allocation2 + $0x60] sm:$0xff] }
  0xa5   : > { %13598 = vst [vmem:[#allocation6_spill] sm:$0xff] %v11240_v18  ;;  %9199 = vmatmul.mubr.msk.bf16.vlgmr.msra.gmra.mrb[0].mxu0 %vm440_vm0, %v11240_v18 }
  0xa6   : > { %9231 = vmatpush3.bf16.msra.mxu0 %v2644_v17 }
  0xa7   : > { %v576_v20 = vpop.trf.xlu0  ;;  %v703_v22 = vld [vmem:[#allocation3 + $0x38] sm:$0xff]  ;;  %v704_v23 = vld [vmem:[#allocation3 + $0x40] sm:$0x3]  ;;  %10851 = vmatprep.subr.msk.bf16.mxu0 %vm931_vm3, %v11245_v19 }
  0xa8   : > { %668 = vst.msk [vmem:[#allocation3 + $0x51] sm:$0xff] %vm440_vm0, %v576_v20  ;;  %v11252_v14 = vpack.c.bf16 %v703_v22, %v702_v21  ;;  %v11254_v24 = vpack.c.bf16 %v704_v23, %v704_v23  ;;  %v789_v20 = vld [vmem:[#allocation2 + $0x18] sm:$0xff]  ;;  %v790_v21 = vld [vmem:[#allocation2 + $0x20] sm:$0xff]  ;;  %v791_v22 = vld [vmem:[#allocation2 + $0x28] sm:$0x3] }
  0xaa   : > { %13599 = vst [vmem:[#allocation7_spill] sm:$0xff] %v11252_v14  ;;  %9066 = vmatprep.mubr.msk.bf16.mxu1 %vm440_vm0, %v11252_v14  ;;  %v2225_v25 = vrot.slane %v11252_v14, 1  ;;  %v2226_v26 = vrot.slane %v11254_v24, 1 }
  0xab   : > { %v577_v27 = vpop.trf.xlu0  ;;  %v705_v30 = vld [vmem:[#allocation3 + $0x48] sm:$0xff] }
  0xac   : > { %669 = vst.msk [vmem:[#allocation3 + $0x61] sm:$0xff] %vm440_vm0, %v577_v27  ;;  %v11262_v28 = vsel %vm2218_vm4, %v2225_v25, %v2226_v26 }
  0xad   : > { %13600 = vst [vmem:[#allocation8_spill] sm:$0xff] %v11262_v28  ;;  %9202 = vmatprep.mubr.msk.bf16.mxu0 %vm440_vm0, %v11262_v28 }
  0xaf   : > { %v578_v29 = vpop.trf.xlu0  ;;  %v706_v31 = vld [vmem:[#allocation3 + $0x50] sm:$0xff]  ;;  %v707_v32 = vld [vmem:[#allocation3 + $0x58] sm:$0x3] }
  0xb0   : > { %670 = vst.msk [vmem:[#allocation3 + $0x69] sm:$0xff] %vm440_vm0, %v578_v29  ;;  %v11267_v33 = vpack.c.bf16 %v706_v31, %v705_v30  ;;  %v11269_v34 = vpack.c.bf16 %v707_v32, %v707_v32  ;;  %v2545_v29 = vrot.slane %v11320_v15, 1  ;;  %v2546_v30 = vrot.slane %v11322_v16, 1 }
  0xb2   : > { %13601 = vst [vmem:[#allocation9_spill] sm:$0xff] %v11267_v33  ;;  %9067 = vmatmul.mubr.msk.bf16.gmra.mrb[4].mxu1 %vm440_vm0, %v11267_v33  ;;  %v2228_v35 = vrot.slane %v11267_v33, 1  ;;  %v2229_v36 = vrot.slane %v11269_v34, 1 }
  0xb3   : > { %v579_v37 = vpop.trf.xlu0  ;;  %v708_v40 = vld [vmem:[#allocation3 + $0x60] sm:$0xff] }
  0xb4   : > { %671 = vst.msk [vmem:[#allocation3 + $0x79] sm:$0xff] %vm440_vm0, %v579_v37  ;;  %v11277_v38 = vsel %vm2218_vm4, %v2228_v35, %v2229_v36  ;;  %v792_v35 = vld [vmem:[#allocation2 + $0x30] sm:$0xff]  ;;  %v793_v36 = vld [vmem:[#allocation2 + $0x38] sm:$0xff]  ;;  %v794_v37 = vld [vmem:[#allocation2 + $0x40] sm:$0x3] }
  0xb5   : > { %13602 = vst [vmem:[#allocation10_spill] sm:$0xff] %v11277_v38  ;;  %9203 = vmatmul.mubr.msk.bf16.gmra.mrb[4].mxu0 %vm440_vm0, %v11277_v38 }
  0xb7   : > { %v580_v39 = vpop.trf.xlu0  ;;  %v709_v41 = vld [vmem:[#allocation3 + $0x68] sm:$0xff]  ;;  %v710_v42 = vld [vmem:[#allocation3 + $0x70] sm:$0x3] }
  0xb8   : > { %672 = vst.msk [vmem:[#allocation3 + $0x81] sm:$0xff] %vm440_vm0, %v580_v39  ;;  %v11282_v43 = vpack.c.bf16 %v709_v41, %v708_v40  ;;  %v11284_v44 = vpack.c.bf16 %v710_v42, %v710_v42  ;;  %v11341_v41 = vpack.c.bf16 %v790_v21, %v789_v20  ;;  %v11343_v42 = vpack.c.bf16 %v791_v22, %v791_v22 }
  0xb9   : > { %v11376_v22 = vpack.c.bf16 %v797_v2, %v797_v2 }
  0xba   : > { %13603 = vst [vmem:[#allocation11_spill] sm:$0xff] %v11282_v43  ;;  %9070 = vmatprep.mubr.msk.bf16.mxu1 %vm440_vm0, %v11282_v43  ;;  %v2231_v45 = vrot.slane %v11282_v43, 1  ;;  %v2232_v46 = vrot.slane %v11284_v44, 1 }
  0xbb   : > { %v581_v47 = vpop.trf.xlu0  ;;  %v711_v50 = vld [vmem:[#allocation3 + $0x78] sm:$0xff] }
  0xbc   : > { %673 = vst.msk [vmem:[#allocation3 + $0x91] sm:$0xff] %vm440_vm0, %v581_v47  ;;  %v11292_v48 = vsel %vm2218_vm4, %v2231_v45, %v2232_v46  ;;  %v2547_v46 = vsel %vm2218_vm4, %v2545_v29, %v2546_v30  ;;  %v11346_v47 = vpack.c.bf16 %v793_v36, %v792_v35  ;;  %v11393_v30 = vld [vmem:[%s13501_s3 + $0x6] sm:$0x3]  ;;  %v2555_v36 = vrot.slane %v11376_v22, 1 }
  0xbd   : > { %13604 = vst [vmem:[#allocation12_spill] sm:$0xff] %v11292_v48  ;;  %9206 = vmatprep.mubr.msk.bf16.mxu0 %vm440_vm0, %v11292_v48 }
  0xbf   : > { %v582_v49 = vpop.trf.xlu0  ;;  %v712_v51 = vld [vmem:[#allocation3 + $0x80] sm:$0xff]  ;;  %v713_v52 = vld [vmem:[#allocation3 + $0x88] sm:$0x3] }
  0xc0   : > { %674 = vst.msk [vmem:[#allocation3 + $0x99] sm:$0xff] %vm440_vm0, %v582_v49  ;;  %v11297_v53 = vpack.c.bf16 %v712_v51, %v711_v50  ;;  %v11299_v54 = vpack.c.bf16 %v713_v52, %v713_v52  ;;  %v11348_v49 = vpack.c.bf16 %v794_v37, %v794_v37  ;;  %v11359_v52 = vld [vmem:[%s13500_s2 + $0x2] sm:$0x3]  ;;  %v801_v37 = vld [vmem:[#allocation2 + $0x78] sm:$0xff] }
  0xc1   : > { %10846 = vmatprep.subr.msk.bf16.mxu1 %vm931_vm3, %v11359_v52 }
  0xc2   : > { %13605 = vst [vmem:[#allocation13_spill] sm:$0xff] %v11297_v53  ;;  %9071 = vmatmul.mubr.msk.bf16.gmra.mrb[8].mxu1 %vm440_vm0, %v11297_v53  ;;  %v2234_v55 = vrot.slane %v11297_v53, 1  ;;  %v2235_v56 = vrot.slane %v11299_v54, 1 }
  0xc3   : > { %v583_v57 = vpop.trf.xlu0  ;;  %v714_v60 = vld [vmem:[#allocation3 + $0x90] sm:$0xff] }
  0xc4   : > { %675 = vst.msk [vmem:[#allocation3 + $0xa9] sm:$0xff] %vm440_vm0, %v583_v57  ;;  %v11307_v58 = vsel %vm2218_vm4, %v2234_v55, %v2235_v56  ;;  %v2548_v55 = vrot.slane %v11341_v41, 1  ;;  %v2549_v56 = vrot.slane %v11343_v42, 1  ;;  %v795_v57 = vld [vmem:[#allocation2 + $0x48] sm:$0xff] }
  0xc5   : > { %13606 = vst [vmem:[#allocation14_spill] sm:$0xff] %v11307_v58  ;;  %9207 = vmatmul.mubr.msk.bf16.gmra.mrb[8].mxu0 %vm440_vm0, %v11307_v58 }
  0xc6   : > { %v11372_v20 = vsel %vm2218_vm4, %v2548_v55, %v2549_v56  ;;  %v804_v56 = vld [vmem:[#allocation2 + $0x90] sm:$0xff] }
  0xc7   : > { %v584_v59 = vpop.trf.xlu0  ;;  %v715_v61 = vld [vmem:[#allocation3 + $0x98] sm:$0xff]  ;;  %v716_v62 = vld [vmem:[#allocation3 + $0xa0] sm:$0x3]  ;;  %13611 = vst [vmem:[#allocation19_spill] sm:$0xff] %v11372_v20 }
  0xc8   : > { %676 = vst.msk [vmem:[#allocation3 + $0xb1] sm:$0xff] %vm440_vm0, %v584_v59  ;;  %v11312_v63 = vpack.c.bf16 %v715_v61, %v714_v60  ;;  %v11314_v0 = vpack.c.bf16 %v716_v62, %v716_v62  ;;  %v2551_v60 = vrot.slane %v11346_v47, 1  ;;  %v2552_v61 = vrot.slane %v11348_v49, 1  ;;  %v796_v62 = vld [vmem:[#allocation2 + $0x50] sm:$0xff] }
  0xc9   : > { %v11374_v21 = vpack.c.bf16 %v796_v62, %v795_v57  ;;  %v805_v57 = vld [vmem:[#allocation2 + $0x98] sm:$0xff] }
  0xca   : > { %13607 = vst [vmem:[#allocation15_spill] sm:$0xff] %v11312_v63  ;;  %9074 = vmatprep.mubr.msk.bf16.mxu1 %vm440_vm0, %v11312_v63  ;;  %v2237_v5 = vrot.slane %v11312_v63, 1  ;;  %v2238_v12 = vrot.slane %v11314_v0, 1 }
  0xcb   : > { %v585_v13 = vpop.trf.xlu0  ;;  %v717_v25 = vld [vmem:[#allocation3 + $0xa8] sm:$0xff] }
  0xcc   : > { %677 = vst.msk [vmem:[#allocation3 + $0xc1] sm:$0xff] %vm440_vm0, %v585_v13  ;;  %v11326_v17 = vsel %vm2218_vm4, %v2237_v5, %v2238_v12  ;;  %v799_v5 = vld [vmem:[#allocation2 + $0x68] sm:$0xff]  ;;  %v800_v12 = vld [vmem:[#allocation2 + $0x70] sm:$0x3] }
  0xcd   : > { %13608 = vst [vmem:[#allocation16_spill] sm:$0xff] %v11326_v17  ;;  %9210 = vmatprep.mubr.msk.bf16.mxu0 %vm440_vm0, %v11326_v17  ;;  %v11387_v29 = vpack.c.bf16 %v800_v12, %v800_v12 }
  0xcf   : > { %v586_v23 = vpop.trf.xlu0  ;;  %v718_v26 = vld [vmem:[#allocation3 + $0xb0] sm:$0xff]  ;;  %v719_v27 = vld [vmem:[#allocation3 + $0xb8] sm:$0x3] }
  0xd0   : > { %678 = vst.msk [vmem:[#allocation3 + $0xc9] sm:$0xff] %vm440_vm0, %v586_v23  ;;  %v11333_v31 = vpack.c.bf16 %v718_v26, %v717_v25  ;;  %v11335_v32 = vpack.c.bf16 %v719_v27, %v719_v27  ;;  %v2845_v25 = vsel %vm931_vm3, %v11245_v19, 0  ;;  %v11383_v26 = vsel %vm2218_vm4, %v2551_v60, %v2552_v61 }
  0xd1   : > { %13612 = vst [vmem:[#allocation20_spill] sm:$0xff] %v11383_v26  ;;  %v11385_v27 = vpack.c.bf16 %v799_v5, %v798_v4  ;;  %v2554_v19 = vrot.slane %v11374_v21, 1  ;;  %v11420_v5 = vpack.c.bf16 %v805_v57, %v804_v56  ;;  %v812_v56 = vld [vmem:[#allocation2 + $0xd0] sm:$0x3] }
  0xd2   : > { %13609 = vst [vmem:[#allocation17_spill] sm:$0xff] %v11333_v31  ;;  %9075 = vmatmul.mubr.msk.bf16.gmra.mrb[12].mxu1 %vm440_vm0, %v11333_v31  ;;  %v2240_v39 = vrot.slane %v11333_v31, 1  ;;  %v2241_v40 = vrot.slane %v11335_v32, 1 }
  0xd3   : > { %v603_v45 = vpop.trf.xlu0  ;;  %v720_v51 = vld [vmem:[#allocation3 + $0xc0] sm:$0xff]  ;;  %v11409_v61 = vsel %vm2218_vm4, %v2554_v19, %v2555_v36  ;;  %v807_v19 = vld [vmem:[#allocation2 + $0xa8] sm:$0xff] }
  0xd4   : > { %679 = vst.msk [vmem:[#allocation3 + $0xd9] sm:$0xff] %vm440_vm0, %v603_v45  ;;  %v11352_v50 = vsel %vm2218_vm4, %v2240_v39, %v2241_v40  ;;  %v2557_v40 = vrot.slane %v11385_v27, 1  ;;  %v2558_v45 = vrot.slane %v11387_v29, 1  ;;  %13613 = vst [vmem:[#allocation21_spill] sm:$0xff] %v11409_v61 }
  0xd5   : > { %13610 = vst [vmem:[#allocation18_spill] sm:$0xff] %v11352_v50  ;;  %9211 = vmatmul.mubr.msk.bf16.gmra.mrb[12].mxu0 %vm440_vm0, %v11352_v50 }
  0xd6   : > { %9232 = vmatprep.mubr.msk.bf16.mxu0 %vm440_vm0, %v2547_v46  ;;  %v802_v46 = vld [vmem:[#allocation2 + $0x80] sm:$0xff]  ;;  %v11418_v4 = vsel %vm2218_vm4, %v2557_v40, %v2558_v45  ;;  %v808_v40 = vld [vmem:[#allocation2 + $0xb0] sm:$0xff]  ;;  %v809_v45 = vld [vmem:[#allocation2 + $0xb8] sm:$0x3] }
  0xd7   : > { %v604_v59 = vpop.trf.xlu0  ;;  %v721_v3 = vld [vmem:[#allocation3 + $0xc8] sm:$0xff]  ;;  %v11411_v62 = vpack.c.bf16 %v802_v46, %v801_v37  ;;  %13615 = vst [vmem:[#allocation23_spill] sm:$0xff] %v11418_v4  ;;  %v2563_v37 = vrot.slane %v11420_v5, 1  ;;  %v11441_v1 = vpack.c.bf16 %v809_v45, %v809_v45  ;;  %v814_v45 = vld [vmem:[#allocation2 + $0xe0] sm:$0xff] }
  0xd8   : > { %680 = vst.msk [vmem:[#allocation3 + $0xe1] sm:$0xff] %vm440_vm0, %v604_v59  ;;  %v11369_v13 = vpack.c.bf16 %v721_v3, %v720_v51  ;;  %v803_v51 = vld [vmem:[#allocation2 + $0x88] sm:$0x3]  ;;  %v806_v59 = vld [vmem:[#allocation2 + $0xa0] sm:$0x3] }
  0xd9   : > { %v11413_v2 = vpack.c.bf16 %v803_v51, %v803_v51  ;;  %v11422_v12 = vpack.c.bf16 %v806_v59, %v806_v59  ;;  %v810_v51 = vld [vmem:[#allocation2 + $0xc0] sm:$0xff]  ;;  %13618 = vst [vmem:[#allocation26_spill] sm:$0xff] %v11441_v1 }
  0xda   : > { %9078 = vmatprep.mubr.msk.bf16.mxu1 %vm440_vm0, %v11369_v13 }
  0xdb   : > { %v605_v23 = vpop.trf.xlu0  ;;  %v723_v35 = vld [vmem:[#allocation3 + $0xd8] sm:$0xff]  ;;  %13614 = vst [vmem:[#allocation22_spill] sm:$0xff] %v11413_v2  ;;  %13616 = vst [vmem:[#allocation24_spill] sm:$0xff] %v11422_v12 }
  0xdc   : > { %681 = vst.msk [vmem:[#allocation3 + $0xf1] sm:$0xff] %vm440_vm0, %v605_v23 }
  0xdd   : > { %9233 = vmatmul.mubr.msk.bf16.vlgmr.msra.gmra.mrb[0].mxu0 %vm440_vm0, %v11372_v20 }
  0xde   : > { %9265 = vmatpush3.bf16.msra.mxu0 %v2845_v25  ;;  %9236 = vmatprep.mubr.msk.bf16.mxu0 %vm440_vm0, %v11383_v26  ;;  %v2560_v25 = vrot.slane %v11411_v62, 1  ;;  %v11450_v26 = vpack.c.bf16 %v812_v56, %v812_v56  ;;  %v817_v56 = vld [vmem:[#allocation2 + $0xf8] sm:$0xff] }
  0xdf   : > { %v606_v39 = vpop.trf.xlu0  ;;  %v724_v55 = vld [vmem:[#allocation3 + $0xe0] sm:$0xff]  ;;  %10852 = vmatprep.subr.msk.bf16.mxu0 %vm931_vm3, %v11393_v30 }
  0xe0   : > { %682 = vst.msk [vmem:[#allocation3 + $0xf9] sm:$0xff] %vm440_vm0, %v606_v39  ;;  %v11406_v60 = vpack.c.bf16 %v724_v55, %v723_v35  ;;  %v2561_v35 = vrot.slane %v11413_v2, 1  ;;  %v2564_v39 = vrot.slane %v11422_v12, 1  ;;  %v811_v55 = vld [vmem:[#allocation2 + $0xc8] sm:$0xff]  ;;  %13620 = vst [vmem:[#allocation28_spill] sm:$0xff] %v11450_v26 }
  0xe2   : > { %9079 = vmatmul.mubr.msk.bf16.gmra.mrb[16].mxu1 %vm440_vm0, %v11406_v60  ;;  %v11437_v59 = vsel %vm2218_vm4, %v2560_v25, %v2561_v35  ;;  %v2567_v35 = vrot.slane %v11441_v1, 1 }
  0xe3   : > { %v607_v3 = vpop.trf.xlu0  ;;  %v726_v23 = vld [vmem:[#allocation3 + $0xf0] sm:$0xff]  ;;  %13617 = vst [vmem:[#allocation25_spill] sm:$0xff] %v11437_v59 }
  0xe4   : > { %683 = vst.msk [vmem:[#allocation3 + $0x109] sm:$0xff] %vm440_vm0, %v607_v3  ;;  %v11439_v3 = vpack.c.bf16 %v808_v40, %v807_v19  ;;  %v813_v19 = vld [vmem:[#allocation2 + $0xd8] sm:$0xff]  ;;  %v2570_v40 = vrot.slane %v11450_v26, 1 }
  0xe5   : > { %9237 = vmatmul.mubr.msk.bf16.gmra.mrb[4].mxu0 %vm440_vm0, %v11409_v61  ;;  %v11446_v61 = vsel %vm2218_vm4, %v2563_v37, %v2564_v39  ;;  %v11467_v20 = vpack.c.bf16 %v814_v45, %v813_v19  ;;  %v819_v45 = vld [vmem:[#allocation2 + $0x108] sm:$0xff] }
  0xe6   : > { %9240 = vmatprep.mubr.msk.bf16.mxu0 %vm440_vm0, %v11418_v4  ;;  %13619 = vst [vmem:[#allocation27_spill] sm:$0xff] %v11446_v61  ;;  %v2566_v25 = vrot.slane %v11439_v3, 1 }
  0xe7   : > { %v608_v36 = vpop.trf.xlu0  ;;  %v727_v46 = vld [vmem:[#allocation3 + $0xf8] sm:$0xff] }
  0xe8   : > { %684 = vst.msk [vmem:[#allocation3 + $0x111] sm:$0xff] %vm440_vm0, %v608_v36  ;;  %v11434_v57 = vpack.c.bf16 %v727_v46, %v726_v23  ;;  %v11448_v36 = vpack.c.bf16 %v811_v55, %v810_v51  ;;  %v815_v46 = vld [vmem:[#allocation2 + $0xe8] sm:$0x3]  ;;  %v816_v55 = vld [vmem:[#allocation2 + $0xf0] sm:$0xff] }
  0xe9   : > { %v11469_v50 = vpack.c.bf16 %v815_v46, %v815_v46  ;;  %v820_v46 = vld [vmem:[#allocation2 + $0x110] sm:$0xff] }
  0xea   : > { %9082 = vmatprep.mubr.msk.bf16.mxu1 %vm440_vm0, %v11434_v57  ;;  %v2569_v39 = vrot.slane %v11448_v36, 1  ;;  %v11495_v38 = vpack.c.bf16 %v820_v46, %v819_v45  ;;  %v825_v46 = vld [vmem:[#allocation2 + $0x138] sm:$0xff] }
  0xeb   : > { %v609_v4 = vpop.trf.xlu0  ;;  %v729_v23 = vld [vmem:[#allocation3 + $0x108] sm:$0xff]  ;;  %13622 = vst [vmem:[#allocation30_spill] sm:$0xff] %v11469_v50  ;;  %v2573_v19 = vrot.slane %v11469_v50, 1 }
  0xec   : > { %685 = vst.msk [vmem:[#allocation3 + $0x121] sm:$0xff] %vm440_vm0, %v609_v4  ;;  %v11474_v58 = vsel %vm2218_vm4, %v2569_v39, %v2570_v40 }
  0xed   : > { %9241 = vmatmul.mubr.msk.bf16.gmra.mrb[8].mxu0 %vm440_vm0, %v11437_v59  ;;  %v11465_v59 = vsel %vm2218_vm4, %v2566_v25, %v2567_v35  ;;  %13623 = vst [vmem:[#allocation31_spill] sm:$0xff] %v11474_v58  ;;  %v2572_v35 = vrot.slane %v11467_v20, 1 }
  0xee   : > { %9244 = vmatprep.mubr.msk.bf16.mxu0 %vm440_vm0, %v11446_v61  ;;  %v818_v61 = vld [vmem:[#allocation2 + $0x100] sm:$0x3]  ;;  %13621 = vst [vmem:[#allocation29_spill] sm:$0xff] %v11465_v59 }
  0xef   : > { %v610_v37 = vpop.trf.xlu0  ;;  %v730_v4 = vld [vmem:[#allocation3 + $0x110] sm:$0xff]  ;;  %v11493_v48 = vsel %vm2218_vm4, %v2572_v35, %v2573_v19  ;;  %v2578_v19 = vrot.slane %v11495_v38, 1 }
  0xf0   : > { %686 = vst.msk [vmem:[#allocation3 + $0x129] sm:$0xff] %vm440_vm0, %v610_v37  ;;  %v11462_v51 = vpack.c.bf16 %v730_v4, %v729_v23  ;;  %v11476_v37 = vpack.c.bf16 %v817_v56, %v816_v55  ;;  %v11478_v23 = vpack.c.bf16 %v818_v61, %v818_v61  ;;  %v821_v4 = vld [vmem:[#allocation2 + $0x118] sm:$0x3]  ;;  %v822_v56 = vld [vmem:[#allocation2 + $0x120] sm:$0xff]  ;;  %13625 = vst [vmem:[#allocation33_spill] sm:$0xff] %v11493_v48 }
  0xf1   : > { %v11497_v28 = vpack.c.bf16 %v821_v4, %v821_v4  ;;  %v826_v4 = vld [vmem:[#allocation2 + $0x140] sm:$0xff] }
  0xf2   : > { %9083 = vmatmul.mubr.msk.bf16.gmra.mrb[20].mxu1 %vm440_vm0, %v11462_v51  ;;  %13624 = vst [vmem:[#allocation32_spill] sm:$0xff] %v11478_v23  ;;  %v2575_v40 = vrot.slane %v11476_v37, 1  ;;  %v2576_v61 = vrot.slane %v11478_v23, 1 }
  0xf3   : > { %v611_v17 = vpop.trf.xlu0  ;;  %v732_v25 = vld [vmem:[#allocation3 + $0x120] sm:$0xff]  ;;  %13626 = vst [vmem:[#allocation34_spill] sm:$0xff] %v11497_v28  ;;  %v2579_v45 = vrot.slane %v11497_v28, 1  ;;  %v11525_v28 = vpack.c.bf16 %v826_v4, %v825_v46 }
  0xf4   : > { %687 = vst.msk [vmem:[#allocation3 + $0x139] sm:$0xff] %vm440_vm0, %v611_v17  ;;  %v11502_v23 = vsel %vm2218_vm4, %v2575_v40, %v2576_v61  ;;  %v832_v4 = vld [vmem:[#allocation2 + $0x170] sm:$0xff] }
  0xf5   : > { %9245 = vmatmul.mubr.msk.bf16.gmra.mrb[12].mxu0 %vm440_vm0, %v11465_v59  ;;  %v823_v59 = vld [vmem:[#allocation2 + $0x128] sm:$0xff]  ;;  %13627 = vst [vmem:[#allocation35_spill] sm:$0xff] %v11502_v23  ;;  %v11521_v50 = vsel %vm2218_vm4, %v2578_v19, %v2579_v45  ;;  %v2584_v45 = vrot.slane %v11525_v28, 1 }
  0xf6   : > { %9248 = vmatprep.mubr.msk.bf16.mxu0 %vm440_vm0, %v11474_v58  ;;  %v824_v58 = vld [vmem:[#allocation2 + $0x130] sm:$0x3]  ;;  %13630 = vst [vmem:[#allocation38_spill] sm:$0xff] %v11521_v50 }
  0xf7   : > { %v612_v39 = vpop.trf.xlu0  ;;  %v733_v17 = vld [vmem:[#allocation3 + $0x128] sm:$0xff] }
  0xf8   : > { %688 = vst.msk [vmem:[#allocation3 + $0x141] sm:$0xff] %vm440_vm0, %v612_v39  ;;  %v11490_v55 = vpack.c.bf16 %v733_v17, %v732_v25  ;;  %v11504_v39 = vpack.c.bf16 %v823_v59, %v822_v56  ;;  %v11506_v25 = vpack.c.bf16 %v824_v58, %v824_v58  ;;  %v828_v56 = vld [vmem:[#allocation2 + $0x150] sm:$0xff] }
  0xfa   : > { %9086 = vmatprep.mubr.msk.bf16.mxu1 %vm440_vm0, %v11490_v55  ;;  %13628 = vst [vmem:[#allocation36_spill] sm:$0xff] %v11506_v25  ;;  %v2581_v59 = vrot.slane %v11504_v39, 1  ;;  %v2582_v58 = vrot.slane %v11506_v25, 1 }
  0xfb   : > { %v613_v18 = vpop.trf.xlu0  ;;  %v735_v35 = vld [vmem:[#allocation3 + $0x138] sm:$0xff] }
  0xfc   : > { %689 = vst.msk [vmem:[#allocation3 + $0x151] sm:$0xff] %vm440_vm0, %v613_v18  ;;  %v827_v18 = vld [vmem:[#allocation2 + $0x148] sm:$0x3]  ;;  %v11530_v1 = vsel %vm2218_vm4, %v2581_v59, %v2582_v58 }
  0xfd   : > { %9249 = vmatmul.mubr.msk.bf16.gmra.mrb[16].mxu0 %vm440_vm0, %v11493_v48  ;;  %v829_v48 = vld [vmem:[#allocation2 + $0x158] sm:$0xff]  ;;  %v11527_v26 = vpack.c.bf16 %v827_v18, %v827_v18  ;;  %13632 = vst [vmem:[#allocation40_spill] sm:$0xff] %v11530_v1 }
  0xfe   : > { %9252 = vmatprep.mubr.msk.bf16.mxu0 %vm440_vm0, %v11502_v23  ;;  %v830_v23 = vld [vmem:[#allocation2 + $0x160] sm:$0x3] }
  0xff   : > { %v614_v40 = vpop.trf.xlu0  ;;  %v736_v61 = vld [vmem:[#allocation3 + $0x140] sm:$0xff]  ;;  %13631 = vst [vmem:[#allocation39_spill] sm:$0xff] %v11527_v26  ;;  %v2585_v46 = vrot.slane %v11527_v26, 1 }
 0x100   : > { %690 = vst.msk [vmem:[#allocation3 + $0x159] sm:$0xff] %vm440_vm0, %v614_v40  ;;  %v11518_v17 = vpack.c.bf16 %v736_v61, %v735_v35  ;;  %v11532_v40 = vpack.c.bf16 %v829_v48, %v828_v56  ;;  %v11534_v35 = vpack.c.bf16 %v830_v23, %v830_v23  ;;  %v831_v61 = vld [vmem:[#allocation2 + $0x168] sm:$0xff]  ;;  %v8600_v56 = vld [vmem:[%s11170_s13 + $0x78] sm:$0xff]  }
 0x101   : > { %v8584_v12 = vunpack.c.l.bf16 %v8600_v56  ;;  %v8585_v10 = vunpack.c.h.bf16 %v8600_v56 }
 0x102   : > { %13629 = vst [vmem:[#allocation37_spill] sm:$0xff] %v11518_v17  ;;  %9087 = vmatmul.mubr.msk.bf16.gmra.mrb[24].mxu1 %vm440_vm0, %v11518_v17  ;;  %13633 = vst [vmem:[#allocation41_spill] sm:$0xff] %v11534_v35  ;;  %v2587_v23 = vrot.slane %v11532_v40, 1  ;;  %v2588_v58 = vrot.slane %v11534_v35, 1 }
 0x103   : > { %v615_v25 = vpop.trf.xlu0  ;;  %v738_v19 = vld [vmem:[#allocation3 + $0x150] sm:$0xff]  ;;  %549 = vst.msk [vmem:[#allocation2 + $0x181] sm:$0xff] %vm440_vm0, %v8584_v12  ;;  %550 = vst.msk [vmem:[#allocation2 + $0x189] sm:$0xff] %vm440_vm0, %v8585_v10  ;;  %v1569_v10 = vsel %vm931_vm3, %v11359_v52, 0  ;;  %v1344_v52 = vshll.u32 %v11137_v7, 16 }
 0x104   : > { %691 = vst.msk [vmem:[#allocation3 + $0x169] sm:$0xff] %vm440_vm0, %v615_v25  ;;  %v833_v25 = vld [vmem:[#allocation2 + $0x178] sm:$0x3]  ;;  %v11559_v35 = vsel %vm2218_vm4, %v2587_v23, %v2588_v58  ;;  %v11589_v12 = vld [vmem:[%s13501_s3 + $0x2] sm:$0x3]  ;;  %v3046_v23 = vsel %vm931_vm3, %v11393_v30, 0 }
 0x105   : > { %9253 = vmatmul.mubr.msk.bf16.gmra.mrb[20].mxu0 %vm440_vm0, %v11521_v50  ;;  %v11554_v50 = vpack.c.bf16 %v832_v4, %v831_v61  ;;  %v11556_v26 = vpack.c.bf16 %v833_v25, %v833_v25  ;;  %13636 = vst [vmem:[#allocation44_spill] sm:$0xff] %v11559_v35  ;;  %v11600_v58 = vld [vmem:[%s13500_s2 + $0x8] sm:$0x3]  ;;  %v1342_v30 = vshrl.u32 %v11137_v7, 16  ;;  %v1346_v4 = vrot.slane %v1344_v52, 1 }
 0x106   : > { %9256 = vmatprep.mubr.msk.bf16.mxu0 %vm440_vm0, %v11530_v1  ;;  %v11550_v1 = vsel %vm2218_vm4, %v2584_v45, %v2585_v46  ;;  %v1349_v25 = vshll.u32 %v11139_v8, 16  ;;  %v1366_v7 = vshll.u32 %v11252_v14, 16 }
 0x107   : > { %v616_v59 = vpop.trf.xlu0  ;;  %v739_v48 = vld [vmem:[#allocation3 + $0x158] sm:$0xff]  ;;  %13635 = vst [vmem:[#allocation43_spill] sm:$0xff] %v11550_v1  ;;  %v2590_v45 = vrot.slane %v11554_v50, 1  ;;  %v2591_v46 = vrot.slane %v11556_v26, 1  ;;  %v1347_v56 = vor.u32 %v1346_v4, %v1342_v30  ;;  %v1353_v30 = vshrl.u32 %v11227_v6, 16 }
 0x108   : > { %692 = vst.msk [vmem:[#allocation3 + $0x171] sm:$0xff] %vm440_vm0, %v616_v59  ;;  %v11546_v18 = vpack.c.bf16 %v739_v48, %v738_v19  ;;  %v1364_v4 = vshrl.u32 %v11252_v14, 16 }
 0x10a   : > { %13634 = vst [vmem:[#allocation42_spill] sm:$0xff] %v11546_v18  ;;  %9090 = vmatprep.mubr.msk.bf16.mxu1 %vm440_vm0, %v11546_v18 }
 0x10b   : > { %v617_v2 = vpop.trf.xlu0  ;;  %v741_v19 = vld [vmem:[#allocation3 + $0x168] sm:$0xff] }
 0x10c   : > { %693 = vst.msk [vmem:[#allocation3 + $0x181] sm:$0xff] %vm440_vm0, %v617_v2  ;;  %v11576_v2 = vsel %vm2218_vm4, %v2590_v45, %v2591_v46  ;;  %v1355_v45 = vshll.u32 %v11227_v6, 16 }
 0x10d   : > { %9257 = vmatmul.mubr.msk.bf16.gmra.mrb[24].mxu0 %vm440_vm0, %v11550_v1  ;;  %13637 = vst [vmem:[#allocation45_spill] sm:$0xff] %v11576_v2 }
 0x10e   : > { %9260 = vmatprep.mubr.msk.bf16.mxu0 %vm440_vm0, %v11559_v35  ;;  %v1498_v35 = vshll.u32 %v11546_v18, 16 }
 0x10f   : > { %v742_v61 = vld [vmem:[#allocation3 + $0x170] sm:$0xff]  ;;  %v618_v59 = vpop.trf.xlu0 }
 0x110   : > { %v11570_v48 = vpack.c.bf16 %v742_v61, %v741_v19  ;;  %694 = vst.msk [vmem:[#allocation3 + $0x189] sm:$0xff] %vm440_vm0, %v618_v59  ;;  %v1351_v19 = vrot.slane %v1349_v25, 1  ;;  %v1357_v59 = vrot.slane %v1355_v45, 1  ;;  %v1371_v25 = vshll.u32 %v11254_v24, 16 }
 0x112   : > { %9091 = vmatmul.mubr.msk.bf16.gmra.mrb[28].mxu1 %vm440_vm0, %v11570_v48  ;;  %v1352_v61 = vsel %vm1341_vm5, %v1347_v56, %v1351_v19  ;;  %v1358_v56 = vor.u32 %v1357_v59, %v1353_v30  ;;  %v1377_v19 = vshll.u32 %v11267_v33, 16  ;;  %v1386_v30 = vshrl.u32 %v11282_v43, 16 }
 0x113   : > { %9096 = vmatprep.mubr.msk.bf16.mxu1 %vm440_vm0, %v11320_v15  ;;  %v744_v8 = vld [vmem:[#allocation3 + $0x180] sm:$0xff] }
 0x114   : > { %v1379_v24 = vrot.slane %v1377_v19, 1 }
 0x115   : > { %9261 = vmatmul.mubr.msk.bf16.gmra.mrb[28].mxu0 %vm440_vm0, %v11576_v2 }
 0x116   : > { %9266 = vmatprep.mubr.msk.bf16.mxu0 %vm440_vm0, %v11227_v6  ;;  %v1991_v6 = vsel %vm931_vm3, %v11589_v12, 0 }
 0x117   : > { %v745_v46 = vld [vmem:[#allocation3 + $0x188] sm:$0xff] }
 0x118   : > { %v11667_v52 = vpack.c.bf16 %v745_v46, %v744_v8  ;;  %v1373_v8 = vrot.slane %v1371_v25, 1  ;;  %v11700_v25 = vld [vmem:[%s13501_s3 + $0x8] sm:$0x3] }
 0x11a   : > { %9097 = vmatmul.mubr.msk.bf16.vlgmr.msra.gmra.mrb[0].mxu1 %vm440_vm0, %v11341_v41 }
 0x11b   : > { %9100 = vmatprep.mubr.msk.bf16.mxu1 %vm440_vm0, %v11346_v47  ;;  %9129 = vmatpush3.bf16.msra.mxu1 %v1569_v10  ;;  %v1368_v10 = vrot.slane %v1366_v7, 1 }
 0x11c   : > { %10847 = vmatprep.subr.msk.bf16.mxu1 %vm931_vm3, %v11589_v12  ;;  %v1382_v12 = vshll.u32 %v11269_v34, 16 }
 0x11d   : > { %9267 = vmatmul.mubr.msk.bf16.vlgmr.msra.gmra.mrb[0].mxu0 %vm440_vm0, %v11252_v14  ;;  %v1369_v45 = vor.u32 %v1368_v10, %v1364_v4  ;;  %v3258_v10 = vsel %vm931_vm3, %v11600_v58, 0  ;;  %v1393_v4 = vshll.u32 %v11284_v44, 16  ;;  %v1410_v44 = vshll.u32 %v11312_v63, 16 }
 0x11e   : > { %9299 = vmatpush3.bf16.msra.mxu0 %v3046_v23  ;;  %9270 = vmatprep.mubr.msk.bf16.mxu0 %vm440_vm0, %v11267_v33  ;;  %v1360_v23 = vshll.u32 %v11229_v11, 16  ;;  %v1388_v11 = vshll.u32 %v11282_v43, 16  ;;  %v1384_v19 = vrot.slane %v1382_v12, 1  ;;  %v1463_v14 = vshrl.u32 %v11462_v51, 16 }
 0x11f   : > { %10853 = vmatprep.subr.msk.bf16.mxu0 %vm931_vm3, %v11600_v58 }
 0x120   : > { %v1362_v7 = vrot.slane %v1360_v23, 1  ;;  %v1390_v59 = vrot.slane %v1388_v11, 1  ;;  %v1375_v23 = vshrl.u32 %v11267_v33, 16 }
 0x122   : > { %9101 = vmatmul.mubr.msk.bf16.gmra.mrb[4].mxu1 %vm440_vm0, %v11374_v21  ;;  %v11682_v46 = vsel %vm1341_vm5, %v1358_v56, %v1362_v7  ;;  %v1380_v58 = vor.u32 %v1379_v24, %v1375_v23  ;;  %v1399_v56 = vshll.u32 %v11297_v53, 16  ;;  %v1391_v34 = vor.u32 %v1390_v59, %v1386_v30  ;;  %v722_v59 = vld [vmem:[#allocation3 + $0xd0] sm:$0x3] }
 0x123   : > { %9104 = vmatprep.mubr.msk.bf16.mxu1 %vm440_vm0, %v11385_v27  ;;  %v1404_v24 = vshll.u32 %v11299_v54, 16  ;;  %v1415_v23 = vshll.u32 %v11314_v0, 16  ;;  %v1421_v30 = vshll.u32 %v11333_v31, 16 }
 0x124   : > { %v1401_v11 = vrot.slane %v1399_v56, 1  ;;  %v1432_v56 = vshll.u32 %v11369_v13, 16 }
 0x125   : > { %9271 = vmatmul.mubr.msk.bf16.gmra.mrb[4].mxu0 %vm440_vm0, %v11282_v43  ;;  %v1406_v54 = vrot.slane %v1404_v24, 1  ;;  %v1423_v0 = vrot.slane %v1421_v30, 1  ;;  %v1419_v24 = vshrl.u32 %v11333_v31, 16  ;;  %v1443_v30 = vshll.u32 %v11406_v60, 16 }
 0x126   : > { %9274 = vmatprep.mubr.msk.bf16.mxu0 %vm440_vm0, %v11297_v53  ;;  %v1476_v43 = vshll.u32 %v11490_v55, 16 }
 0x12a   : > { %9105 = vmatmul.mubr.msk.bf16.gmra.mrb[8].mxu1 %vm440_vm0, %v11411_v62 }
 0x12b   : > { %9108 = vmatprep.mubr.msk.bf16.mxu1 %vm440_vm0, %v11420_v5 }
 0x12d   : > { %9275 = vmatmul.mubr.msk.bf16.gmra.mrb[8].mxu0 %vm440_vm0, %v11312_v63 }
 0x12e   : > { %9278 = vmatprep.mubr.msk.bf16.mxu0 %vm440_vm0, %v11333_v31 }
 0x132   : > { %9109 = vmatmul.mubr.msk.bf16.gmra.mrb[12].mxu1 %vm440_vm0, %v11439_v3 }
 0x133   : > { %9112 = vmatprep.mubr.msk.bf16.mxu1 %vm440_vm0, %v11448_v36 }
 0x135   : > { %9279 = vmatmul.mubr.msk.bf16.gmra.mrb[12].mxu0 %vm440_vm0, %v11369_v13 }
 0x136   : > { %9282 = vmatprep.mubr.msk.bf16.mxu0 %vm440_vm0, %v11406_v60 }
 0x13a   : > { %9113 = vmatmul.mubr.msk.bf16.gmra.mrb[16].mxu1 %vm440_vm0, %v11467_v20 }
 0x13b   : > { %9116 = vmatprep.mubr.msk.bf16.mxu1 %vm440_vm0, %v11476_v37 }
 0x13d   : > { %9283 = vmatmul.mubr.msk.bf16.gmra.mrb[16].mxu0 %vm440_vm0, %v11434_v57 }
 0x13e   : > { %9286 = vmatprep.mubr.msk.bf16.mxu0 %vm440_vm0, %v11462_v51 }
 0x142   : > { %9117 = vmatmul.mubr.msk.bf16.gmra.mrb[20].mxu1 %vm440_vm0, %v11495_v38 }
 0x143   : > { %9120 = vmatprep.mubr.msk.bf16.mxu1 %vm440_vm0, %v11504_v39 }
 0x145   : > { %9287 = vmatmul.mubr.msk.bf16.gmra.mrb[20].mxu0 %vm440_vm0, %v11490_v55 }
 0x146   : > { %9290 = vmatprep.mubr.msk.bf16.mxu0 %vm440_vm0, %v11518_v17 }
 0x14a   : > { %9121 = vmatmul.mubr.msk.bf16.gmra.mrb[24].mxu1 %vm440_vm0, %v11525_v28 }
 0x14b   : > { %9124 = vmatprep.mubr.msk.bf16.mxu1 %vm440_vm0, %v11532_v40 }
 0x14d   : > { %9291 = vmatmul.mubr.msk.bf16.gmra.mrb[24].mxu0 %vm440_vm0, %v11546_v18 }
 0x14e   : > { %9294 = vmatprep.mubr.msk.bf16.mxu0 %vm440_vm0, %v11570_v48 }
 0x152   : > { %9125 = vmatmul.mubr.msk.bf16.gmra.mrb[28].mxu1 %vm440_vm0, %v11554_v50 }
 0x153   : > { %9130 = vmatprep.mubr.msk.bf16.mxu1 %vm440_vm0, %v1352_v61  ;;  %v11687_v61 = vsel %vm1341_vm5, %v1369_v45, %v1373_v8  ;;  %v1395_v45 = vrot.slane %v1393_v4, 1  ;;  %v1412_v8 = vrot.slane %v1410_v44, 1 }
 0x155   : > { %9295 = vmatmul.mubr.msk.bf16.gmra.mrb[28].mxu0 %vm440_vm0, %v11667_v52  ;;  %v11718_v7 = vsel %vm1341_vm5, %v1391_v34, %v1395_v45  ;;  %v1417_v34 = vrot.slane %v1415_v23, 1  ;;  %v1430_v45 = vshrl.u32 %v11369_v13, 16  ;;  %v1424_v23 = vor.u32 %v1423_v0, %v1419_v24 }
 0x156   : > { %9300 = vmatprep.mubr.msk.bf16.mxu0 %vm440_vm0, %v11341_v41  ;;  %v1445_v0 = vrot.slane %v1443_v30, 1 }
 0x15a   : > { %9131 = vmatmul.mubr.msk.bf16.vlgmr.msra.gmra.mrb[0].mxu1 %vm440_vm0, %v11682_v46 }
 0x15b   : > { %9134 = vmatprep.mubr.msk.bf16.mxu1 %vm440_vm0, %v11687_v61  ;;  %9163 = vmatpush3.bf16.msra.mxu1 %v1991_v6  ;;  %v1397_v6 = vshrl.u32 %v11297_v53, 16 }
 0x15c   : > { %10849 = vmatprep.subr.msk.bf16.mxu1 %vm931_vm3, %v11144_v9  ;;  %v11713_v9 = vsel %vm1341_vm5, %v1380_v58, %v1384_v19  ;;  %v11731_v58 = vpack.c.bf16 %v722_v59, %v722_v59  ;;  %v1426_v59 = vshll.u32 %v11335_v32, 16 }
 0x15d   : > { %9301 = vmatmul.mubr.msk.bf16.vlgmr.msra.gmra.mrb[0].mxu0 %vm440_vm0, %v11346_v47  ;;  %v1402_v12 = vor.u32 %v1401_v11, %v1397_v6  ;;  %v1434_v11 = vrot.slane %v1432_v56, 1  ;;  %v725_v6 = vld [vmem:[#allocation3 + $0xe8] sm:$0x3] }
 0x15e   : > { %9333 = vmatpush3.bf16.msra.mxu0 %v3258_v10  ;;  %9304 = vmatprep.mubr.msk.bf16.mxu0 %vm440_vm0, %v11374_v21  ;;  %v1408_v10 = vshrl.u32 %v11312_v63, 16  ;;  %v1428_v31 = vrot.slane %v1426_v59, 1  ;;  %v1441_v63 = vshrl.u32 %v11406_v60, 16  ;;  %v731_v59 = vld [vmem:[#allocation3 + $0x118] sm:$0x3] }
 0x15f   : > { %10854 = vmatprep.subr.msk.bf16.mxu0 %vm931_vm3, %v11700_v25  ;;  %v11735_v44 = vsel %vm1341_vm5, %v1402_v12, %v1406_v54  ;;  %v11750_v12 = vpack.c.bf16 %v725_v6, %v725_v6  ;;  %v11774_v30 = vpack.c.bf16 %v731_v59, %v731_v59  ;;  %v737_v59 = vld [vmem:[#allocation3 + $0x148] sm:$0x3] }
 0x160   : > { %v1413_v4 = vor.u32 %v1412_v8, %v1408_v10  ;;  %v1437_v8 = vshll.u32 %v11731_v58, 16  ;;  %v728_v10 = vld [vmem:[#allocation3 + $0x100] sm:$0x3]  ;;  %v11759_v32 = vsel %vm1341_vm5, %v1424_v23, %v1428_v31  ;;  %v734_v31 = vld [vmem:[#allocation3 + $0x130] sm:$0x3] }
 0x161   : > { %v11755_v54 = vpack.c.bf16 %v728_v10, %v728_v10  ;;  %13639 = vst [vmem:[#allocation47_spill] sm:$0xff] %v11759_v32  ;;  %v1448_v6 = vshll.u32 %v11750_v12, 16  ;;  %v1446_v10 = vor.u32 %v1445_v0, %v1441_v63  ;;  %v1470_v0 = vshll.u32 %v11774_v30, 16 }
 0x162   : > { %9135 = vmatmul.mubr.msk.bf16.gmra.mrb[4].mxu1 %vm440_vm0, %v11713_v9  ;;  %v11740_v19 = vsel %vm1341_vm5, %v1413_v4, %v1417_v34  ;;  %v1435_v4 = vor.u32 %v1434_v11, %v1430_v45  ;;  %v1439_v56 = vrot.slane %v1437_v8, 1  ;;  %v1454_v34 = vshll.u32 %v11434_v57, 16 }
 0x163   : > { %9138 = vmatprep.mubr.msk.bf16.mxu1 %vm440_vm0, %v11718_v7  ;;  %13638 = vst [vmem:[#allocation46_spill] sm:$0xff] %v11740_v19  ;;  %v1452_v11 = vshrl.u32 %v11434_v57, 16  ;;  %v1459_v24 = vshll.u32 %v11755_v54, 16  ;;  %v1450_v23 = vrot.slane %v1448_v6, 1 }
 0x164   : > { %v11766_v45 = vsel %vm1341_vm5, %v1435_v4, %v1439_v56  ;;  %v1456_v8 = vrot.slane %v1454_v34, 1  ;;  %v1465_v4 = vshll.u32 %v11462_v51, 16  ;;  %v11779_v34 = vpack.c.bf16 %v734_v31, %v734_v31  ;;  %v740_v31 = vld [vmem:[#allocation3 + $0x160] sm:$0x3] }
 0x165   : > { %9305 = vmatmul.mubr.msk.bf16.gmra.mrb[4].mxu0 %vm440_vm0, %v11385_v27  ;;  %13640 = vst [vmem:[#allocation48_spill] sm:$0xff] %v11766_v45  ;;  %v1461_v53 = vrot.slane %v1459_v24, 1  ;;  %v11783_v33 = vsel %vm1341_vm5, %v1446_v10, %v1450_v23  ;;  %v1472_v23 = vrot.slane %v1470_v0, 1 }
 0x166   : > { %9308 = vmatprep.mubr.msk.bf16.mxu0 %vm440_vm0, %v11411_v62  ;;  %v1457_v56 = vor.u32 %v1456_v8, %v1452_v11  ;;  %13641 = vst [vmem:[#allocation49_spill] sm:$0xff] %v11779_v34  ;;  %13642 = vst [vmem:[#allocation50_spill] sm:$0xff] %v11783_v33  ;;  %v1467_v63 = vrot.slane %v1465_v4, 1  ;;  %v1474_v11 = vshrl.u32 %v11490_v55, 16  ;;  %v1478_v8 = vrot.slane %v1476_v43, 1 }
 0x167   : > { %v1481_v24 = vshll.u32 %v11779_v34, 16  ;;  %v11798_v4 = vpack.c.bf16 %v737_v59, %v737_v59  ;;  %v11803_v43 = vpack.c.bf16 %v740_v31, %v740_v31  ;;  %v1485_v34 = vshrl.u32 %v11518_v17, 16  ;;  %v743_v59 = vld [vmem:[#allocation3 + $0x178] sm:$0x3] }
 0x168   : > { %v11790_v6 = vsel %vm1341_vm5, %v1457_v56, %v1461_v53  ;;  %v1468_v10 = vor.u32 %v1467_v63, %v1463_v14  ;;  %v1487_v53 = vshll.u32 %v11518_v17, 16  ;;  %v1479_v56 = vor.u32 %v1478_v8, %v1474_v11 }
 0x169   : > { %13643 = vst [vmem:[#allocation51_spill] sm:$0xff] %v11798_v4  ;;  %v1483_v2 = vrot.slane %v1481_v24, 1  ;;  %13644 = vst [vmem:[#allocation52_spill] sm:$0xff] %v11803_v43  ;;  %v1492_v63 = vshll.u32 %v11798_v4, 16  ;;  %v1496_v11 = vshrl.u32 %v11546_v18, 16  ;;  %v1500_v8 = vrot.slane %v1498_v35, 1 }
 0x16a   : > { %9139 = vmatmul.mubr.msk.bf16.gmra.mrb[8].mxu1 %vm440_vm0, %v11735_v44  ;;  %v11807_v1 = vsel %vm1341_vm5, %v1468_v10, %v1472_v23  ;;  %v1489_v14 = vrot.slane %v1487_v53, 1  ;;  %v1503_v24 = vshll.u32 %v11803_v43, 16  ;;  %v1766_v31 = vshll.u32 %v11320_v15, 16 }
 0x16b   : > { %9142 = vmatprep.mubr.msk.bf16.mxu1 %vm440_vm0, %v11740_v19  ;;  %13645 = vst [vmem:[#allocation53_spill] sm:$0xff] %v11807_v1  ;;  %v11814_v0 = vsel %vm1341_vm5, %v1479_v56, %v1483_v2  ;;  %v1494_v23 = vrot.slane %v1492_v63, 1  ;;  %v11823_v53 = vpack.c.bf16 %v743_v59, %v743_v59  ;;  %v1509_v2 = vshll.u32 %v11570_v48, 16 }
 0x16c   : > { %v1490_v10 = vor.u32 %v1489_v14, %v1485_v34  ;;  %v1501_v56 = vor.u32 %v1500_v8, %v1496_v11  ;;  %v1505_v18 = vrot.slane %v1503_v24, 1  ;;  %v1764_v35 = vshrl.u32 %v11320_v15, 16 }
 0x16d   : > { %9309 = vmatmul.mubr.msk.bf16.gmra.mrb[8].mxu0 %vm440_vm0, %v11420_v5  ;;  %13646 = vst [vmem:[#allocation54_spill] sm:$0xff] %v11823_v53  ;;  %v1768_v43 = vrot.slane %v1766_v31, 1  ;;  %v1771_v4 = vshll.u32 %v11322_v16, 16  ;;  %v1507_v34 = vshrl.u32 %v11570_v48, 16  ;;  %v1511_v14 = vrot.slane %v1509_v2, 1 }
 0x16e   : > { %9312 = vmatprep.mubr.msk.bf16.mxu0 %vm440_vm0, %v11439_v3  ;;  %v11831_v17 = vsel %vm1341_vm5, %v1490_v10, %v1494_v23  ;;  %v1514_v63 = vshll.u32 %v11823_v53, 16  ;;  %v11838_v11 = vsel %vm1341_vm5, %v1501_v56, %v1505_v18  ;;  %v1777_v15 = vshll.u32 %v11341_v41, 16  ;;  %v834_v10 = vld [vmem:[#allocation2 + $0x180] sm:$0xff]  ;;  %v835_v18 = vld [vmem:[#allocation2 + $0x188] sm:$0xff] }
 0x16f   : > { %v1769_v16 = vor.u32 %v1768_v43, %v1764_v35  ;;  %v1773_v8 = vrot.slane %v1771_v4, 1  ;;  %v1788_v24 = vshll.u32 %v11346_v47, 16  ;;  %v1512_v59 = vor.u32 %v1511_v14, %v1507_v34 }
 0x170   : > { %v1516_v31 = vrot.slane %v1514_v63, 1  ;;  %v1775_v23 = vshrl.u32 %v11341_v41, 16  ;;  %v1779_v2 = vrot.slane %v1777_v15, 1  ;;  %v1782_v56 = vshll.u32 %v11343_v42, 16 }
 0x171   : > { %v1774_v43 = vsel %vm1341_vm5, %v1769_v16, %v1773_v8  ;;  %v1786_v4 = vshrl.u32 %v11346_v47, 16  ;;  %v1790_v35 = vrot.slane %v1788_v24, 1  ;;  %v1793_v53 = vshll.u32 %v11348_v49, 16 }
 0x172   : > { %9143 = vmatmul.mubr.msk.bf16.gmra.mrb[12].mxu1 %vm440_vm0, %v11759_v32  ;;  %v11854_v34 = vsel %vm1341_vm5, %v1512_v59, %v1516_v31  ;;  %v11856_v14 = vpack.c.bf16 %v835_v18, %v834_v10  ;;  %v1780_v41 = vor.u32 %v1779_v2, %v1775_v23  ;;  %v1784_v63 = vrot.slane %v1782_v56, 1 }
 0x173   : > { %9146 = vmatprep.mubr.msk.bf16.mxu1 %vm440_vm0, %v11766_v45  ;;  %v1799_v42 = vshll.u32 %v11374_v21, 16  ;;  %v1791_v15 = vor.u32 %v1790_v35, %v1786_v4  ;;  %v1795_v16 = vrot.slane %v1793_v53, 1  ;;  %v1810_v8 = vshll.u32 %v11385_v27, 16 }
 0x174   : > { %v11868_v49 = vsel %vm1341_vm5, %v1780_v41, %v1784_v63  ;;  %v1797_v24 = vshrl.u32 %v11374_v21, 16  ;;  %v1804_v31 = vshll.u32 %v11376_v22, 16  ;;  %v1808_v53 = vshrl.u32 %v11385_v27, 16 }
 0x175   : > { %9313 = vmatmul.mubr.msk.bf16.gmra.mrb[12].mxu0 %vm440_vm0, %v11448_v36  ;;  %v1801_v59 = vrot.slane %v1799_v42, 1  ;;  %v11873_v10 = vsel %vm1341_vm5, %v1791_v15, %v1795_v16  ;;  %v1812_v18 = vrot.slane %v1810_v8, 1  ;;  %v1815_v23 = vshll.u32 %v11387_v29, 16  ;;  %v11889_v29 = vld [vmem:[%s13500_s2 + $0xa] sm:$0x3]  ;;  %v13648_v15 = vld [vmem:[#allocation22_spill] sm:$0xff] }
 0x176   : > { %9316 = vmatprep.mubr.msk.bf16.mxu0 %vm440_vm0, %v11467_v20  ;;  %v1806_v56 = vrot.slane %v1804_v31, 1  ;;  %v1821_v22 = vshll.u32 %v11411_v62, 16  ;;  %v1832_v41 = vshll.u32 %v11420_v5, 16  ;;  %v1819_v63 = vshrl.u32 %v11411_v62, 16  ;;  %v13649_v31 = vld [vmem:[#allocation24_spill] sm:$0xff] }
 0x177   : > { %v1802_v2 = vor.u32 %v1801_v59, %v1797_v24  ;;  %v1813_v4 = vor.u32 %v1812_v18, %v1808_v53  ;;  %v1817_v35 = vrot.slane %v1815_v23, 1  ;;  %v1826_v16 = vshll.u32 %v13648_v15, 16 }
 0x178   : > { %v1823_v42 = vrot.slane %v1821_v22, 1  ;;  %v1830_v24 = vshrl.u32 %v11420_v5, 16  ;;  %v1834_v59 = vrot.slane %v1832_v41, 1  ;;  %v1837_v53 = vshll.u32 %v13649_v31, 16  ;;  %v13650_v41 = vld [vmem:[#allocation26_spill] sm:$0xff] }
 0x179   : > { %v11903_v8 = vsel %vm1341_vm5, %v1813_v4, %v1817_v35  ;;  %v1828_v23 = vrot.slane %v1826_v16, 1  ;;  %v1854_v22 = vshll.u32 %v11448_v36, 16  ;;  %v1841_v4 = vshrl.u32 %v11439_v3, 16 }
 0x17a   : > { %9147 = vmatmul.mubr.msk.bf16.gmra.mrb[16].mxu1 %vm440_vm0, %v11783_v33  ;;  %v1824_v18 = vor.u32 %v1823_v42, %v1819_v63  ;;  %v1848_v63 = vshll.u32 %v13650_v41, 16  ;;  %v1852_v15 = vshrl.u32 %v11448_v36, 16 }
 0x17b   : > { %9150 = vmatprep.mubr.msk.bf16.mxu1 %vm440_vm0, %v11790_v6  ;;  %v1856_v16 = vrot.slane %v1854_v22, 1  ;;  %v1863_v22 = vshrl.u32 %v11467_v20, 16 }
 0x17d   : > { %9317 = vmatmul.mubr.msk.bf16.gmra.mrb[16].mxu0 %vm440_vm0, %v11476_v37 }
 0x17e   : > { %9320 = vmatprep.mubr.msk.bf16.mxu0 %vm440_vm0, %v11495_v38 }
 0x182   : > { %9151 = vmatmul.mubr.msk.bf16.gmra.mrb[20].mxu1 %vm440_vm0, %v11807_v1 }
 0x183   : > { %9154 = vmatprep.mubr.msk.bf16.mxu1 %vm440_vm0, %v11814_v0 }
 0x185   : > { %9321 = vmatmul.mubr.msk.bf16.gmra.mrb[20].mxu0 %vm440_vm0, %v11504_v39 }
 0x186   : > { %9324 = vmatprep.mubr.msk.bf16.mxu0 %vm440_vm0, %v11525_v28 }
 0x18a   : > { %9155 = vmatmul.mubr.msk.bf16.gmra.mrb[24].mxu1 %vm440_vm0, %v11831_v17 }
 0x18b   : > { %9158 = vmatprep.mubr.msk.bf16.mxu1 %vm440_vm0, %v11838_v11 }
 0x18d   : > { %9325 = vmatmul.mubr.msk.bf16.gmra.mrb[24].mxu0 %vm440_vm0, %v11532_v40 }
 0x18e   : > { %9328 = vmatprep.mubr.msk.bf16.mxu0 %vm440_vm0, %v11554_v50 }
 0x192   : > { %9159 = vmatmul.mubr.msk.bf16.gmra.mrb[28].mxu1 %vm440_vm0, %v11854_v34 }
 0x193   : > { %9164 = vmatprep.mubr.msk.bf16.mxu1 %vm440_vm0, %v1774_v43  ;;  %v13647_v43 = vld [vmem:[#allocation5_spill] sm:$0xff] }
 0x195   : > { %9329 = vmatmul.mubr.msk.bf16.gmra.mrb[28].mxu0 %vm440_vm0, %v11856_v14 }
 0x196   : > { %9334 = vmatprep.mubr.msk.bf16.mxu0 %vm440_vm0, %v11682_v46  ;;  %v3470_v46 = vsel %vm931_vm3, %v11700_v25, 0  ;;  %v11896_v25 = vsel %vm1341_vm5, %v1802_v2, %v1806_v56  ;;  %v1835_v2 = vor.u32 %v1834_v59, %v1830_v24  ;;  %v1839_v56 = vrot.slane %v1837_v53, 1  ;;  %v13651_v24 = vld [vmem:[#allocation28_spill] sm:$0xff] }
 0x197   : > { %v1859_v59 = vshll.u32 %v13651_v24, 16  ;;  %v1850_v53 = vrot.slane %v1848_v63, 1  ;;  %v13653_v24 = vld [vmem:[#allocation32_spill] sm:$0xff] }
 0x198   : > { %v11923_v42 = vsel %vm1341_vm5, %v1835_v2, %v1839_v56  ;;  %v1876_v2 = vshll.u32 %v11476_v37, 16 }
 0x19a   : > { %9165 = vmatmul.mubr.msk.bf16.vlgmr.msra.gmra.mrb[0].mxu1 %vm440_vm0, %v11868_v49 }
 0x19b   : > { %9168 = vmatprep.mubr.msk.bf16.mxu1 %vm440_vm0, %v11873_v10  ;;  %9979 = vmatpush3.bf16.msra.mxu1 %v13647_v43  ;;  %v11918_v43 = vsel %vm1341_vm5, %v1824_v18, %v1828_v23  ;;  %v1865_v18 = vshll.u32 %v11467_v20, 16  ;;  %v1857_v23 = vor.u32 %v1856_v16, %v1852_v15  ;;  %v1874_v15 = vshrl.u32 %v11476_v37, 16 }
 0x19c   : > { %v1878_v16 = vrot.slane %v1876_v2, 1  ;;  %v1885_v2 = vshrl.u32 %v11495_v38, 16 }
 0x19d   : > { %9335 = vmatmul.mubr.msk.bf16.vlgmr.msra.gmra.mrb[0].mxu0 %vm440_vm0, %v11687_v61  ;;  %v1867_v41 = vrot.slane %v1865_v18, 1  ;;  %v1887_v18 = vshll.u32 %v11495_v38, 16 }
 0x19e   : > { %9367 = vmatpush3.bf16.msra.mxu0 %v3470_v46  ;;  %9338 = vmatprep.mubr.msk.bf16.mxu0 %vm440_vm0, %v11713_v9  ;;  %v1843_v46 = vshll.u32 %v11439_v3, 16 }
 0x19f   : > { %10855 = vmatprep.subr.msk.bf16.mxu0 %vm931_vm3, %v11889_v29 }
 0x1a0   : > { %v1845_v35 = vrot.slane %v1843_v46, 1  ;;  %v1861_v46 = vrot.slane %v1859_v59, 1  ;;  %v1881_v59 = vshll.u32 %v13653_v24, 16  ;;  %v1889_v24 = vrot.slane %v1887_v18, 1 }
 0x1a1   : > { %v1909_v18 = vshll.u32 %v11525_v28, 16 }
 0x1a2   : > { %9169 = vmatmul.mubr.msk.bf16.gmra.mrb[4].mxu1 %vm440_vm0, %v11896_v25  ;;  %v1846_v31 = vor.u32 %v1845_v35, %v1841_v4  ;;  %v13652_v4 = vld [vmem:[#allocation30_spill] sm:$0xff]  ;;  %v11943_v63 = vsel %vm1341_vm5, %v1857_v23, %v1861_v46  ;;  %v1898_v23 = vshll.u32 %v11504_v39, 16 }
 0x1a3   : > { %9172 = vmatprep.mubr.msk.bf16.mxu1 %vm440_vm0, %v11903_v8  ;;  %v1870_v35 = vshll.u32 %v13652_v4, 16  ;;  %v1883_v4 = vrot.slane %v1881_v59, 1  ;;  %v13656_v59 = vld [vmem:[#allocation36_spill] sm:$0xff] }
 0x1a4   : > { %v11938_v56 = vsel %vm1341_vm5, %v1846_v31, %v1850_v53  ;;  %v1868_v31 = vor.u32 %v1867_v41, %v1863_v22  ;;  %v13654_v22 = vld [vmem:[#allocation34_spill] sm:$0xff] }
 0x1a5   : > { %9339 = vmatmul.mubr.msk.bf16.gmra.mrb[4].mxu0 %vm440_vm0, %v11718_v7  ;;  %v1872_v53 = vrot.slane %v1870_v35, 1  ;;  %v1892_v41 = vshll.u32 %v13654_v22, 16 }
 0x1a6   : > { %9342 = vmatprep.mubr.msk.bf16.mxu0 %vm440_vm0, %v11735_v44 }
 0x1a7   : > { %v11958_v46 = vsel %vm1341_vm5, %v1868_v31, %v1872_v53  ;;  %v1890_v31 = vor.u32 %v1889_v24, %v1885_v2  ;;  %v1894_v53 = vrot.slane %v1892_v41, 1  ;;  %v13658_v2 = vld [vmem:[#allocation39_spill] sm:$0xff] }
 0x1a8   : > { %v1914_v24 = vshll.u32 %v13658_v2, 16 }
 0x1aa   : > { %9173 = vmatmul.mubr.msk.bf16.gmra.mrb[8].mxu1 %vm440_vm0, %v11918_v43 }
 0x1ab   : > { %9176 = vmatprep.mubr.msk.bf16.mxu1 %vm440_vm0, %v11923_v42 }
 0x1ad   : > { %9343 = vmatmul.mubr.msk.bf16.gmra.mrb[8].mxu0 %vm440_vm0, %v11740_v19  ;;  %v1903_v19 = vshll.u32 %v13656_v59, 16  ;;  %v1911_v59 = vrot.slane %v1909_v18, 1  ;;  %v1931_v18 = vshll.u32 %v11554_v50, 16 }
 0x1ae   : > { %9346 = vmatprep.mubr.msk.bf16.mxu0 %vm440_vm0, %v11759_v32  ;;  %v1879_v32 = vor.u32 %v1878_v16, %v1874_v15  ;;  %v1896_v15 = vshrl.u32 %v11504_v39, 16  ;;  %v1900_v16 = vrot.slane %v1898_v23, 1  ;;  %v1907_v23 = vshrl.u32 %v11525_v28, 16 }
 0x1af   : > { %v1905_v22 = vrot.slane %v1903_v19, 1  ;;  %v1918_v19 = vshrl.u32 %v11532_v40, 16 }
 0x1b0   : > { %v11963_v35 = vsel %vm1341_vm5, %v1879_v32, %v1883_v4  ;;  %v1920_v32 = vshll.u32 %v11532_v40, 16  ;;  %v11978_v4 = vsel %vm1341_vm5, %v1890_v31, %v1894_v53  ;;  %v1912_v31 = vor.u32 %v1911_v59, %v1907_v23 }
 0x1b1   : > { %13655 = vst [vmem:[#allocation5_spill] sm:$0xff] %v11963_v35  ;;  %13657 = vst [vmem:[#allocation22_spill] sm:$0xff] %v11978_v4  ;;  %v1916_v53 = vrot.slane %v1914_v24, 1  ;;  %v1936_v23 = vshll.u32 %v11556_v26, 16 }
 0x1b2   : > { %9177 = vmatmul.mubr.msk.bf16.gmra.mrb[12].mxu1 %vm440_vm0, %v11938_v56 }
 0x1b3   : > { %9180 = vmatprep.mubr.msk.bf16.mxu1 %vm440_vm0, %v11943_v63 }
 0x1b5   : > { %9347 = vmatmul.mubr.msk.bf16.gmra.mrb[12].mxu0 %vm440_vm0, %v11766_v45 }
 0x1b6   : > { %9350 = vmatprep.mubr.msk.bf16.mxu0 %vm440_vm0, %v11783_v33  ;;  %v1901_v33 = vor.u32 %v1900_v16, %v1896_v15  ;;  %v1922_v15 = vrot.slane %v1920_v32, 1  ;;  %v13660_v16 = vld [vmem:[#allocation41_spill] sm:$0xff]  ;;  %v1929_v32 = vshrl.u32 %v11554_v50, 16 }
 0x1b7   : > { %v1925_v45 = vshll.u32 %v13660_v16, 16  ;;  %v1933_v16 = vrot.slane %v1931_v18, 1  ;;  %v2244_v18 = vrot.slane %v11731_v58, 1  ;;  %v2246_v58 = vrot.slane %v11406_v60, 1 }
 0x1b8   : > { %v11983_v41 = vsel %vm1341_vm5, %v1901_v33, %v1905_v22  ;;  %v746_v33 = vld [vmem:[#allocation3 + $0x190] sm:$0x3]  ;;  %v11997_v22 = vsel %vm1341_vm5, %v1912_v31, %v1916_v53  ;;  %v3241_v31 = vshrl.u32 %v11667_v52, 16 }
 0x1b9   : > { %13659 = vst [vmem:[#allocation24_spill] sm:$0xff] %v11983_v41  ;;  %v1927_v2 = vrot.slane %v1925_v45, 1  ;;  %13661 = vst [vmem:[#allocation26_spill] sm:$0xff] %v11997_v22  ;;  %v12004_v24 = vpack.c.bf16 %v746_v33, %v746_v33  ;;  %v3243_v45 = vshll.u32 %v11667_v52, 16 }
 0x1ba   : > { %9181 = vmatmul.mubr.msk.bf16.gmra.mrb[16].mxu1 %vm440_vm0, %v11958_v46 }
 0x1bb   : > { %9184 = vmatprep.mubr.msk.bf16.mxu1 %vm440_vm0, %v11963_v35  ;;  %v3245_v53 = vrot.slane %v3243_v45, 1  ;;  %v3248_v26 = vshll.u32 %v12004_v24, 16  ;;  %v2247_v45 = vrot.slane %v11750_v12, 1 }
 0x1bd   : > { %9351 = vmatmul.mubr.msk.bf16.gmra.mrb[16].mxu0 %vm440_vm0, %v11790_v6  ;;  %v3246_v33 = vor.u32 %v3245_v53, %v3241_v31  ;;  %v12041_v31 = vsel %vm2218_vm4, %v2246_v58, %v2247_v45  ;;  %v3676_v53 = vsel %vm931_vm3, %v11889_v29, 0  ;;  %v13668_v58 = vld [vmem:[#allocation51_spill] sm:$0xff] }
 0x1be   : > { %9354 = vmatprep.mubr.msk.bf16.mxu0 %vm440_vm0, %v11807_v1  ;;  %v1923_v1 = vor.u32 %v1922_v15, %v1918_v19  ;;  %v1934_v19 = vor.u32 %v1933_v16, %v1929_v32  ;;  %v1938_v15 = vrot.slane %v1936_v23, 1  ;;  %v3250_v32 = vrot.slane %v3248_v26, 1 }
 0x1bf   : > { %v2253_v26 = vrot.slane %v11774_v30, 1  ;;  %v13667_v30 = vld [vmem:[#allocation37_spill] sm:$0xff] }
 0x1c0   : > { %v12002_v59 = vsel %vm1341_vm5, %v1923_v1, %v1927_v2  ;;  %v2243_v1 = vrot.slane %v11369_v13, 1  ;;  %v12020_v2 = vsel %vm1341_vm5, %v1934_v19, %v1938_v15  ;;  %v12030_v23 = vsel %vm1341_vm5, %v3246_v33, %v3250_v32 }
 0x1c1   : > { %13662 = vst [vmem:[#allocation28_spill] sm:$0xff] %v12002_v59  ;;  %v2249_v19 = vrot.slane %v11434_v57, 1  ;;  %v2250_v15 = vrot.slane %v11755_v54, 1  ;;  %v8241_v54 = vld [vmem:[%s13501_s3 + $0xa] sm:$0x3]  ;;  %v2258_v45 = vrot.slane %v13667_v30, 1 }
 0x1c2   : > { %9185 = vmatmul.mubr.msk.bf16.gmra.mrb[20].mxu1 %vm440_vm0, %v11978_v4  ;;  %v12025_v16 = vsel %vm2218_vm4, %v2243_v1, %v2244_v18  ;;  %v2255_v1 = vrot.slane %v11490_v55, 1  ;;  %v13664_v18 = vld [vmem:[#allocation49_spill] sm:$0xff] }
 0x1c3   : > { %9188 = vmatprep.mubr.msk.bf16.mxu1 %vm440_vm0, %v11983_v41  ;;  %v12046_v12 = vsel %vm2218_vm4, %v2249_v19, %v2250_v15  ;;  %v2256_v33 = vrot.slane %v13664_v18, 1  ;;  %v2259_v19 = vrot.slane %v13668_v58, 1  ;;  %v13669_v15 = vld [vmem:[#allocation42_spill] sm:$0xff] }
 0x1c4   : > { %13663 = vst [vmem:[#allocation30_spill] sm:$0xff] %v12046_v12  ;;  %v13673_v58 = vld [vmem:[#allocation54_spill] sm:$0xff] }
 0x1c5   : > { %9355 = vmatmul.mubr.msk.bf16.gmra.mrb[20].mxu0 %vm440_vm0, %v11814_v0  ;;  %v12070_v32 = vsel %vm2218_vm4, %v2255_v1, %v2256_v33  ;;  %v12083_v1 = vsel %vm2218_vm4, %v2258_v45, %v2259_v19  ;;  %v2264_v33 = vrot.slane %v11570_v48, 1  ;;  %v836_v19 = vld [vmem:[#allocation2 + $0x190] sm:$0x3] }
 0x1c6   : > { %9358 = vmatprep.mubr.msk.bf16.mxu0 %vm440_vm0, %v11831_v17  ;;  %13666 = vst [vmem:[#allocation34_spill] sm:$0xff] %v12070_v32  ;;  %13671 = vst [vmem:[#allocation36_spill] sm:$0xff] %v12083_v1 }
 0x1ca   : > { %9189 = vmatmul.mubr.msk.bf16.gmra.mrb[24].mxu1 %vm440_vm0, %v11997_v22 }
 0x1cb   : > { %9192 = vmatprep.mubr.msk.bf16.mxu1 %vm440_vm0, %v12002_v59 }
 0x1cd   : > { %9359 = vmatmul.mubr.msk.bf16.gmra.mrb[24].mxu0 %vm440_vm0, %v11838_v11 }
 0x1ce   : > { %9362 = vmatprep.mubr.msk.bf16.mxu0 %vm440_vm0, %v11854_v34 }
 0x1d2   : > { %9193 = vmatmul.mubr.msk.bf16.gmra.mrb[28].mxu1 %vm440_vm0, %v12020_v2 }
 0x1d3   : > { %9214 = vmatprep.mubr.msk.bf16.mxu1 %vm440_vm0, %v12025_v16 }
 0x1d5   : > { %9363 = vmatmul.mubr.msk.bf16.gmra.mrb[28].mxu0 %vm440_vm0, %v12030_v23 }
 0x1d6   : > { %9368 = vmatprep.mubr.msk.bf16.mxu0 %vm440_vm0, %v11868_v49  ;;  %v2252_v49 = vrot.slane %v11462_v51, 1 }
 0x1d8   : > { %v12065_v29 = vsel %vm2218_vm4, %v2252_v49, %v2253_v26  ;;  %v13670_v49 = vld [vmem:[#allocation52_spill] sm:$0xff] }
 0x1d9   : > { %13665 = vst [vmem:[#allocation32_spill] sm:$0xff] %v12065_v29  ;;  %v2262_v26 = vrot.slane %v13670_v49, 1  ;;  %v2265_v49 = vrot.slane %v13673_v58, 1 }
 0x1da   : > { %9215 = vmatmul.mubr.msk.bf16.vlgmr.msra.gmra.mrb[16].mxu1 %vm440_vm0, %v12041_v31 }
 0x1db   : > { %9218 = vmatprep.mubr.msk.bf16.mxu1 %vm440_vm0, %v12046_v12  ;;  %v12099_v45 = vsel %vm2218_vm4, %v2264_v33, %v2265_v49  ;;  %v3453_v33 = vshrl.u32 %v11856_v14, 16 }
 0x1dc   : > { %13674 = vst [vmem:[#allocation41_spill] sm:$0xff] %v12099_v45 }
 0x1dd   : > { %9369 = vmatmul.mubr.msk.bf16.vlgmr.msra.gmra.mrb[0].mxu0 %vm440_vm0, %v11873_v10 }
 0x1de   : > { %9401 = vmatpush3.bf16.msra.mxu0 %v3676_v53  ;;  %9372 = vmatprep.mubr.msk.bf16.mxu0 %vm440_vm0, %v11896_v25  ;;  %v2261_v53 = vrot.slane %v13669_v15, 1 }
 0x1df   : > { %10856 = vmatprep.subr.msk.bf16.mxu0 %vm931_vm3, %v8241_v54 }
 0x1e0   : > { %v12088_v18 = vsel %vm2218_vm4, %v2261_v53, %v2262_v26  ;;  %v12115_v53 = vpack.c.bf16 %v836_v19, %v836_v19  ;;  %v3455_v26 = vshll.u32 %v11856_v14, 16  ;;  %v13675_v19 = vld [vmem:[#allocation6_spill] sm:$0xff] }
 0x1e1   : > { %13672 = vst [vmem:[#allocation39_spill] sm:$0xff] %v12088_v18 }
 0x1e2   : > { %9219 = vmatmul.mubr.msk.bf16.gmra.mrb[20].mxu1 %vm440_vm0, %v12065_v29  ;;  %v3457_v58 = vrot.slane %v3455_v26, 1  ;;  %v3460_v49 = vshll.u32 %v12115_v53, 16  ;;  %v3882_v26 = vsel %vm931_vm3, %v8241_v54, 0  ;;  %v13680_v54 = vld [vmem:[#allocation16_spill] sm:$0xff] }
 0x1e3   : > { %9222 = vmatprep.mubr.msk.bf16.mxu1 %vm440_vm0, %v12070_v32 }
 0x1e5   : > { %9373 = vmatmul.mubr.msk.bf16.gmra.mrb[4].mxu0 %vm440_vm0, %v11903_v8 }
 0x1e6   : > { %9376 = vmatprep.mubr.msk.bf16.mxu0 %vm440_vm0, %v11918_v43 }
 0x1ea   : > { %9223 = vmatmul.mubr.msk.bf16.gmra.mrb[24].mxu1 %vm440_vm0, %v12083_v1 }
 0x1eb   : > { %9226 = vmatprep.mubr.msk.bf16.mxu1 %vm440_vm0, %v12088_v18 }
 0x1ed   : > { %9377 = vmatmul.mubr.msk.bf16.gmra.mrb[8].mxu0 %vm440_vm0, %v11923_v42 }
 0x1ee   : > { %9380 = vmatprep.mubr.msk.bf16.mxu0 %vm440_vm0, %v11938_v56 }
 0x1f2   : > { %9227 = vmatmul.mubr.msk.bf16.gmra.mrb[28].mxu1 %vm440_vm0, %v12099_v45 }
 0x1f5   : > { %9381 = vmatmul.mubr.msk.bf16.gmra.mrb[12].mxu0 %vm440_vm0, %v11943_v63 }
 0x1f6   : > { %9384 = vmatprep.mubr.msk.bf16.mxu0 %vm440_vm0, %v11958_v46 }
 0x1fd   : > { %9385 = vmatmul.mubr.msk.bf16.gmra.mrb[16].mxu0 %vm440_vm0, %v11963_v35 }
 0x1fe   : > { %9388 = vmatprep.mubr.msk.bf16.mxu0 %vm440_vm0, %v11978_v4  ;;  %v3458_v4 = vor.u32 %v3457_v58, %v3453_v33  ;;  %v13677_v33 = vld [vmem:[#allocation10_spill] sm:$0xff] }
 0x1ff   : > { %v13681_v58 = vld [vmem:[#allocation18_spill] sm:$0xff] }
 0x205   : > { %9389 = vmatmul.mubr.msk.bf16.gmra.mrb[20].mxu0 %vm440_vm0, %v11983_v41  ;;  %v3462_v41 = vrot.slane %v3460_v49, 1  ;;  %v3667_v49 = vrot.slane %v11667_v52, 1 }
 0x206   : > { %9392 = vmatprep.mubr.msk.bf16.mxu0 %vm440_vm0, %v11997_v22  ;;  %v13676_v22 = vld [vmem:[#allocation8_spill] sm:$0xff] }
 0x207   : > { %v12125_v35 = vsel %vm1341_vm5, %v3458_v4, %v3462_v41  ;;  %v13678_v4 = vld [vmem:[#allocation12_spill] sm:$0xff]  ;;  %v13679_v41 = vld [vmem:[#allocation14_spill] sm:$0xff] }
 0x20d   : > { %9393 = vmatmul.mubr.msk.bf16.gmra.mrb[24].mxu0 %vm440_vm0, %v12002_v59  ;;  %v8258_v59 = vld [vmem:[%s13500_s2 + $0xc] sm:$0x3] }
 0x20e   : > { %9396 = vmatprep.mubr.msk.bf16.mxu0 %vm440_vm0, %v12020_v2 }
 0x215   : > { %9397 = vmatmul.mubr.msk.bf16.gmra.mrb[28].mxu0 %vm440_vm0, %v12125_v35 }
 0x216   : > { %9402 = vmatprep.mubr.msk.bf16.mxu0 %vm440_vm0, %v13675_v19  ;;  %v3668_v19 = vrot.slane %v12004_v24, 1  ;;  %v13685_v24 = vld [vmem:[#allocation21_spill] sm:$0xff] }
 0x21d   : > { %9403 = vmatmul.mubr.msk.bf16.vlgmr.msra.gmra.mrb[0].mxu0 %vm440_vm0, %v13676_v22 }
 0x21e   : > { %9435 = vmatpush3.bf16.msra.mxu0 %v3882_v26  ;;  %9406 = vmatprep.mubr.msk.bf16.mxu0 %vm440_vm0, %v13677_v33  ;;  %v12167_v26 = vsel %vm2218_vm4, %v3667_v49, %v3668_v19  ;;  %v13686_v49 = vld [vmem:[#allocation23_spill] sm:$0xff]  ;;  %v13687_v19 = vld [vmem:[#allocation25_spill] sm:$0xff] }
 0x21f   : > { %10857 = vmatprep.subr.msk.bf16.mxu0 %vm931_vm3, %v8258_v59  ;;  %13682 = vst [vmem:[#allocation49_spill] sm:$0xff] %v12167_v26 }
 0x225   : > { %9407 = vmatmul.mubr.msk.bf16.gmra.mrb[4].mxu0 %vm440_vm0, %v13678_v4 }
 0x226   : > { %9410 = vmatprep.mubr.msk.bf16.mxu0 %vm440_vm0, %v13679_v41 }
 0x22d   : > { %9411 = vmatmul.mubr.msk.bf16.gmra.mrb[8].mxu0 %vm440_vm0, %v13680_v54 }
 0x22e   : > { %9414 = vmatprep.mubr.msk.bf16.mxu0 %vm440_vm0, %v13681_v58 }
 0x235   : > { %9415 = vmatmul.mubr.msk.bf16.gmra.mrb[12].mxu0 %vm440_vm0, %v12025_v16 }
 0x236   : > { %9418 = vmatprep.mubr.msk.bf16.mxu0 %vm440_vm0, %v12041_v31 }
 0x23d   : > { %9419 = vmatmul.mubr.msk.bf16.gmra.mrb[16].mxu0 %vm440_vm0, %v12046_v12 }
 0x23e   : > { %9422 = vmatprep.mubr.msk.bf16.mxu0 %vm440_vm0, %v12065_v29 }
 0x245   : > { %9423 = vmatmul.mubr.msk.bf16.gmra.mrb[20].mxu0 %vm440_vm0, %v12070_v32  ;;  %v13683_v32 = vld [vmem:[#allocation19_spill] sm:$0xff] }
 0x246   : > { %9426 = vmatprep.mubr.msk.bf16.mxu0 %vm440_vm0, %v12083_v1  ;;  %v4083_v1 = vsel %vm931_vm3, %v8258_v59, 0 }
 0x24d   : > { %9427 = vmatmul.mubr.msk.bf16.gmra.mrb[24].mxu0 %vm440_vm0, %v12088_v18  ;;  %v8275_v18 = vld [vmem:[%s13501_s3 + $0xc] sm:$0x3] }
 0x24e   : > { %9430 = vmatprep.mubr.msk.bf16.mxu0 %vm440_vm0, %v12099_v45  ;;  %v13684_v45 = vld [vmem:[#allocation20_spill] sm:$0xff] }
 0x255   : > { %9431 = vmatmul.mubr.msk.bf16.gmra.mrb[28].mxu0 %vm440_vm0, %v12167_v26 }
 0x256   : > { %9436 = vmatprep.mubr.msk.bf16.mxu0 %vm440_vm0, %v13683_v32  ;;  %v13689_v32 = vld [vmem:[#allocation27_spill] sm:$0xff] }
 0x25d   : > { %9437 = vmatmul.mubr.msk.bf16.vlgmr.msra.gmra.mrb[0].mxu0 %vm440_vm0, %v13684_v45  ;;  %v13691_v45 = vld [vmem:[#allocation29_spill] sm:$0xff] }
 0x25e   : > { %9469 = vmatpush3.bf16.msra.mxu0 %v4083_v1  ;;  %9440 = vmatprep.mubr.msk.bf16.mxu0 %vm440_vm0, %v13685_v24 }
 0x25f   : > { %10858 = vmatprep.subr.msk.bf16.mxu0 %vm931_vm3, %v8275_v18 }
 0x265   : > { %9441 = vmatmul.mubr.msk.bf16.gmra.mrb[4].mxu0 %vm440_vm0, %v13686_v49  ;;  %v13695_v49 = vld [vmem:[#allocation31_spill] sm:$0xff] }
 0x266   : > { %9444 = vmatprep.mubr.msk.bf16.mxu0 %vm440_vm0, %v13687_v19 }
 0x26d   : > { %v12186_v59 = vpop.f32.mrb[0].mxu1  ;;  %9445 = vmatmul.mubr.msk.bf16.gmra.mrb[8].mxu0 %vm440_vm0, %v13689_v32 }
 0x26e   : > { %13688 = vst [vmem:[#allocation37_spill] sm:$0xff] %v12186_v59  ;;  %v12190_v26 = vpop.f32.mrb[1].mxu1  ;;  %9448 = vmatprep.mubr.msk.bf16.mxu0 %vm440_vm0, %v13691_v45  ;;  %v13697_v59 = vld [vmem:[#allocation33_spill] sm:$0xff]  ;;  %v13701_v45 = vld [vmem:[#allocation35_spill] sm:$0xff] }
 0x26f   : > { %13690 = vst [vmem:[#allocation51_spill] sm:$0xff] %v12190_v26  ;;  %v12194_v1 = vpop.f32.mrb[2].mxu1 }
 0x270   : > { %13692 = vst [vmem:[#allocation42_spill] sm:$0xff] %v12194_v1  ;;  %v12196_v24 = vpop.f32.mrb[3].mxu1 }
 0x271   : > { %13693 = vst [vmem:[#allocation52_spill] sm:$0xff] %v12196_v24 }
 0x275   : > { %v12198_v29 = vpop.f32.mrb[4].mxu1  ;;  %9449 = vmatmul.mubr.msk.bf16.gmra.mrb[12].mxu0 %vm440_vm0, %v13695_v49 }
 0x276   : > { %13694 = vst [vmem:[#allocation54_spill] sm:$0xff] %v12198_v29  ;;  %v12202_v19 = vpop.f32.mrb[5].mxu1  ;;  %9452 = vmatprep.mubr.msk.bf16.mxu0 %vm440_vm0, %v13697_v59  ;;  %v13703_v29 = vld [vmem:[#allocation38_spill] sm:$0xff]  ;;  %v13707_v59 = vld [vmem:[#allocation40_spill] sm:$0xff] }
 0x277   : > { %13696 = vst [vmem:[#allocation6_spill] sm:$0xff] %v12202_v19  ;;  %v12206_v32 = vpop.f32.mrb[6].mxu1 }
 0x278   : > { %13698 = vst [vmem:[#allocation8_spill] sm:$0xff] %v12206_v32  ;;  %v12208_v26 = vpop.f32.mrb[7].mxu1 }
 0x279   : > { %13699 = vst [vmem:[#allocation10_spill] sm:$0xff] %v12208_v26 }
 0x27d   : > { %v12210_v12 = vpop.f32.mrb[8].mxu1  ;;  %9453 = vmatmul.mubr.msk.bf16.gmra.mrb[16].mxu0 %vm440_vm0, %v13701_v45  ;;  %v13712_v45 = vld [vmem:[#allocation44_spill] sm:$0xff] }
 0x27e   : > { %13700 = vst [vmem:[#allocation12_spill] sm:$0xff] %v12210_v12  ;;  %v12214_v24 = vpop.f32.mrb[9].mxu1  ;;  %9456 = vmatprep.mubr.msk.bf16.mxu0 %vm440_vm0, %v13703_v29  ;;  %v13709_v12 = vld [vmem:[#allocation43_spill] sm:$0xff] }
 0x27f   : > { %13702 = vst [vmem:[#allocation14_spill] sm:$0xff] %v12214_v24  ;;  %v12218_v1 = vpop.f32.mrb[10].mxu1 }
 0x280   : > { %13704 = vst [vmem:[#allocation16_spill] sm:$0xff] %v12218_v1  ;;  %v12220_v19 = vpop.f32.mrb[11].mxu1  ;;  %v13713_v1 = vld [vmem:[#allocation45_spill] sm:$0xff] }
 0x281   : > { %13705 = vst [vmem:[#allocation18_spill] sm:$0xff] %v12220_v19  ;;  %v3874_v19 = vrot.slane %v12115_v53, 1  ;;  %v13717_v53 = vld [vmem:[#allocation11_spill] sm:$0xff] }
 0x285   : > { %v12222_v49 = vpop.f32.mrb[12].mxu1  ;;  %9457 = vmatmul.mubr.msk.bf16.gmra.mrb[20].mxu0 %vm440_vm0, %v13707_v59 }
 0x286   : > { %13706 = vst [vmem:[#allocation19_spill] sm:$0xff] %v12222_v49  ;;  %v12226_v26 = vpop.f32.mrb[13].mxu1  ;;  %9460 = vmatprep.mubr.msk.bf16.mxu0 %vm440_vm0, %v13709_v12  ;;  %v3873_v49 = vrot.slane %v11856_v14, 1 }
 0x287   : > { %13708 = vst [vmem:[#allocation38_spill] sm:$0xff] %v12226_v26  ;;  %v12230_v32 = vpop.f32.mrb[14].mxu1  ;;  %v13715_v26 = vld [vmem:[#allocation7_spill] sm:$0xff] }
 0x288   : > { %13710 = vst [vmem:[#allocation43_spill] sm:$0xff] %v12230_v32  ;;  %v12232_v24 = vpop.f32.mrb[15].mxu1  ;;  %v12241_v59 = vsel %vm2218_vm4, %v3873_v49, %v3874_v19  ;;  %v8292_v32 = vld [vmem:[%s13500_s2 + $0xe] sm:$0x3]  ;;  %v13718_v49 = vld [vmem:[#allocation13_spill] sm:$0xff]  ;;  %v13719_v19 = vld [vmem:[#allocation15_spill] sm:$0xff] }
 0x289   : > { %13711 = vst [vmem:[#allocation55_spill] sm:$0xff] %v12232_v24  ;;  %13714 = vst [vmem:[#allocation44_spill] sm:$0xff] %v12241_v59  ;;  %v4284_v24 = vsel %vm931_vm3, %v8275_v18, 0 }
 0x28d   : > { %9461 = vmatmul.mubr.msk.bf16.gmra.mrb[24].mxu0 %vm440_vm0, %v13712_v45 }
 0x28e   : > { %9464 = vmatprep.mubr.msk.bf16.mxu0 %vm440_vm0, %v13713_v1  ;;  %v13716_v1 = vld [vmem:[#allocation9_spill] sm:$0xff] }
 0x295   : > { %9465 = vmatmul.mubr.msk.bf16.gmra.mrb[28].mxu0 %vm440_vm0, %v12241_v59 }
 0x296   : > { %9470 = vmatprep.mubr.msk.bf16.mxu0 %vm440_vm0, %v13715_v26  ;;  %v13720_v26 = vld [vmem:[#allocation17_spill] sm:$0xff] }
 0x29d   : > { %9471 = vmatmul.mubr.msk.bf16.vlgmr.msra.gmra.mrb[0].mxu0 %vm440_vm0, %v13716_v1 }
 0x29e   : > { %9503 = vmatpush3.bf16.msra.mxu0 %v4284_v24  ;;  %9474 = vmatprep.mubr.msk.bf16.mxu0 %vm440_vm0, %v13717_v53 }
 0x29f   : > { %10859 = vmatprep.subr.msk.bf16.mxu0 %vm931_vm3, %v8292_v32 }
 0x2a5   : > { %9475 = vmatmul.mubr.msk.bf16.gmra.mrb[4].mxu0 %vm440_vm0, %v13718_v49 }
 0x2a6   : > { %9478 = vmatprep.mubr.msk.bf16.mxu0 %vm440_vm0, %v13719_v19 }
 0x2ad   : > { %v12260_v18 = vpop.f32.mrb[16].mxu1  ;;  %9479 = vmatmul.mubr.msk.bf16.gmra.mrb[8].mxu0 %vm440_vm0, %v13720_v26 }
 0x2ae   : > { %v12264_v59 = vpop.f32.mrb[17].mxu1  ;;  %9482 = vmatprep.mubr.msk.bf16.mxu0 %vm440_vm0, %v11369_v13 }
 0x2af   : > { %13721 = vst [vmem:[#allocation7_spill] sm:$0xff] %v12264_v59  ;;  %v12268_v24 = vpop.f32.mrb[18].mxu1 }
 0x2b0   : > { %v12270_v1 = vpop.f32.mrb[19].mxu1 }
 0x2b5   : > { %v12272_v53 = vpop.f32.mrb[20].mxu1  ;;  %9483 = vmatmul.mubr.msk.bf16.gmra.mrb[12].mxu0 %vm440_vm0, %v11406_v60 }
 0x2b6   : > { %13722 = vst [vmem:[#allocation9_spill] sm:$0xff] %v12272_v53  ;;  %v12276_v49 = vpop.f32.mrb[21].mxu1  ;;  %9486 = vmatprep.mubr.msk.bf16.mxu0 %vm440_vm0, %v11434_v57 }
 0x2b7   : > { %13723 = vst [vmem:[#allocation11_spill] sm:$0xff] %v12276_v49  ;;  %v12280_v19 = vpop.f32.mrb[22].mxu1 }
 0x2b8   : > { %v12282_v26 = vpop.f32.mrb[23].mxu1 }
 0x2bd   : > { %v12284_v59 = vpop.f32.mrb[24].mxu1  ;;  %9487 = vmatmul.mubr.msk.bf16.gmra.mrb[16].mxu0 %vm440_vm0, %v11462_v51 }
 0x2be   : > { %v12288_v13 = vpop.f32.mrb[25].mxu1  ;;  %9490 = vmatprep.mubr.msk.bf16.mxu0 %vm440_vm0, %v11490_v55  ;;  %v747_v55 = vld [vmem:[#allocation3 + $0x198] sm:$0xff] }
 0x2bf   : > { %13724 = vst [vmem:[#allocation13_spill] sm:$0xff] %v12288_v13  ;;  %v12292_v60 = vpop.f32.mrb[26].mxu1 }
 0x2c0   : > { %v12294_v49 = vpop.f32.mrb[27].mxu1 }
 0x2c1   : > { %13725 = vst [vmem:[#allocation15_spill] sm:$0xff] %v12294_v49 }
 0x2c5   : > { %v12296_v53 = vpop.f32.mrb[28].mxu1  ;;  %9491 = vmatmul.mubr.msk.bf16.gmra.mrb[20].mxu0 %vm440_vm0, %v13667_v30  ;;  %v4496_v30 = vsel %vm931_vm3, %v8292_v32, 0  ;;  %v5595_v32 = vld [vmem:[%s13505_s7] sm:$0xf] }
 0x2c6   : > { %13726 = vst [vmem:[#allocation17_spill] sm:$0xff] %v12296_v53  ;;  %v12300_v57 = vpop.f32.mrb[29].mxu1  ;;  %9494 = vmatprep.mubr.msk.bf16.mxu0 %vm440_vm0, %v13669_v15  ;;  %v748_v53 = vld [vmem:[#allocation3 + $0x1a0] sm:$0xff]  ;;  %v8309_v15 = vld [vmem:[%s13501_s3 + $0xe] sm:$0x3]  ;;  %10863 = vmatprep.subr.msk.bf16.mxu1 %vm5650_vm6, %v5595_v32 }
 0x2c7   : > { %v12304_v51 = vpop.f32.mrb[30].mxu1  ;;  %v12312_v49 = vpack.c.bf16 %v748_v53, %v747_v55 }
 0x2c8   : > { %v12306_v13 = vpop.f32.mrb[31].mxu1 }
 0x2cd   : > { %9495 = vmatmul.mubr.msk.bf16.gmra.mrb[24].mxu0 %vm440_vm0, %v11570_v48 }
 0x2ce   : > { %9498 = vmatprep.mubr.msk.bf16.mxu0 %vm440_vm0, %v11667_v52 }
 0x2d5   : > { %9499 = vmatmul.mubr.msk.bf16.gmra.mrb[28].mxu0 %vm440_vm0, %v12312_v49 }
 0x2d6   : > { %9504 = vmatprep.mubr.msk.bf16.mxu0 %vm440_vm0, %v11346_v47  ;;  %v837_v47 = vld [vmem:[#allocation2 + $0x198] sm:$0xff] }
 0x2dd   : > { %9505 = vmatmul.mubr.msk.bf16.vlgmr.msra.gmra.mrb[0].mxu0 %vm440_vm0, %v11374_v21 }
 0x2de   : > { %9537 = vmatpush3.bf16.msra.mxu0 %v4496_v30  ;;  %9508 = vmatprep.mubr.msk.bf16.mxu0 %vm440_vm0, %v11385_v27  ;;  %v13728_v27 = vld [vmem:[#allocation47_spill] sm:$0xff]  ;;  %v13744_v30 = vld [vmem:[#allocation20_spill] sm:$0xff] }
 0x2df   : > { %10860 = vmatprep.subr.msk.bf16.mxu0 %vm931_vm3, %v8309_v15 }
 0x2e5   : > { %9509 = vmatmul.mubr.msk.bf16.gmra.mrb[4].mxu0 %vm440_vm0, %v11411_v62  ;;  %v13729_v62 = vld [vmem:[#allocation48_spill] sm:$0xff] }
 0x2e6   : > { %9512 = vmatprep.mubr.msk.bf16.mxu0 %vm440_vm0, %v11420_v5  ;;  %v13730_v5 = vld [vmem:[#allocation50_spill] sm:$0xff] }
 0x2ed   : > { %9513 = vmatmul.mubr.msk.bf16.gmra.mrb[8].mxu0 %vm440_vm0, %v11439_v3  ;;  %v13731_v3 = vld [vmem:[#allocation53_spill] sm:$0xff] }
 0x2ee   : > { %9516 = vmatprep.mubr.msk.bf16.mxu0 %vm440_vm0, %v11448_v36  ;;  %v749_v36 = vld [vmem:[#allocation3 + $0x1a8] sm:$0x3] }
 0x2f5   : > { %9517 = vmatmul.mubr.msk.bf16.gmra.mrb[12].mxu0 %vm440_vm0, %v11467_v20  ;;  %v838_v20 = vld [vmem:[#allocation2 + $0x1a0] sm:$0xff] }
 0x2f6   : > { %9520 = vmatprep.mubr.msk.bf16.mxu0 %vm440_vm0, %v11476_v37  ;;  %v12351_v21 = vpack.c.bf16 %v838_v20, %v837_v47  ;;  %v12386_v37 = vpack.c.bf16 %v749_v36, %v749_v36  ;;  %v13746_v47 = vld [vmem:[#allocation23_spill] sm:$0xff]  ;;  %v13747_v20 = vld [vmem:[#allocation25_spill] sm:$0xff] }
 0x2f8   : > { %v4486_v52 = vshll.u32 %v12386_v37, 16  ;;  %v4906_v53 = vrot.slane %v12386_v37, 1  ;;  %v5111_v36 = vrot.slane %v12351_v21, 1 }
 0x2fd   : > { %9521 = vmatmul.mubr.msk.bf16.gmra.mrb[16].mxu0 %vm440_vm0, %v11495_v38  ;;  %v8326_v38 = vld [vmem:[%s13500_s2 + $0x10] sm:$0x3] }
 0x2fe   : > { %9524 = vmatprep.mubr.msk.bf16.mxu0 %vm440_vm0, %v11504_v39  ;;  %v4481_v39 = vshll.u32 %v12312_v49, 16 }
 0x300   : > { %v4483_v48 = vrot.slane %v4481_v39, 1  ;;  %v13756_v39 = vmov 0.0  }
 0x301   : > { %5426 = vst.msk [vmem:[#allocation4] sm:$0xff] %vm5425_vm7, %v13756_v39  ;;  %5427 = vst.msk [vmem:[#allocation4 + $0x8] sm:$0xff] %vm5425_vm7, %v13756_v39 }
 0x302   : > { %5431 = vst.msk [vmem:[#allocation4 + $0x198] sm:$0xff] %vm5425_vm7, %v13756_v39  ;;  %5432 = vst.msk [vmem:[#allocation4 + $0x1a0] sm:$0xff] %vm5425_vm7, %v13756_v39 }
 0x303   : > { %5435 = vst.msk [vmem:[#allocation4] sm:$0x1] %vm5434_vm8, %v13756_v39  ;;  %5436 = vst.msk [vmem:[#allocation4 + $0x18] sm:$0x1] %vm5434_vm8, %v13756_v39 }
 0x304   : > { %5437 = vst.msk [vmem:[#allocation4 + $0x30] sm:$0x1] %vm5434_vm8, %v13756_v39  ;;  %5438 = vst.msk [vmem:[#allocation4 + $0x48] sm:$0x1] %vm5434_vm8, %v13756_v39 }
 0x305   : > { %9525 = vmatmul.mubr.msk.bf16.gmra.mrb[20].mxu0 %vm440_vm0, %v11525_v28  ;;  %v4708_v28 = vsel %vm931_vm3, %v8309_v15, 0  ;;  %v13745_v15 = vld [vmem:[#allocation21_spill] sm:$0xff]  ;;  %5439 = vst.msk [vmem:[#allocation4 + $0x60] sm:$0x1] %vm5434_vm8, %v13756_v39  ;;  %5440 = vst.msk [vmem:[#allocation4 + $0x78] sm:$0x1] %vm5434_vm8, %v13756_v39 }
 0x306   : > { %9528 = vmatprep.mubr.msk.bf16.mxu0 %vm440_vm0, %v11532_v40  ;;  %v4479_v40 = vshrl.u32 %v12312_v49, 16  ;;  %5441 = vst.msk [vmem:[#allocation4 + $0x90] sm:$0x1] %vm5434_vm8, %v13756_v39  ;;  %5442 = vst.msk [vmem:[#allocation4 + $0xa8] sm:$0x1] %vm5434_vm8, %v13756_v39 }
 0x307   : > { %5443 = vst.msk [vmem:[#allocation4 + $0xc0] sm:$0x1] %vm5434_vm8, %v13756_v39  ;;  %5444 = vst.msk [vmem:[#allocation4 + $0xd8] sm:$0x1] %vm5434_vm8, %v13756_v39 }
 0x308   : > { %5445 = vst.msk [vmem:[#allocation4 + $0xf0] sm:$0x1] %vm5434_vm8, %v13756_v39  ;;  %5446 = vst.msk [vmem:[#allocation4 + $0x108] sm:$0x1] %vm5434_vm8, %v13756_v39 }
 0x309   : > { %5447 = vst.msk [vmem:[#allocation4 + $0x120] sm:$0x1] %vm5434_vm8, %v13756_v39  ;;  %5448 = vst.msk [vmem:[#allocation4 + $0x138] sm:$0x1] %vm5434_vm8, %v13756_v39 }
 0x30a   : > { %5449 = vst.msk [vmem:[#allocation4 + $0x150] sm:$0x1] %vm5434_vm8, %v13756_v39  ;;  %5450 = vst.msk [vmem:[#allocation4 + $0x168] sm:$0x1] %vm5434_vm8, %v13756_v39 }
 0x30b   : > { %5451 = vst.msk [vmem:[#allocation4 + $0x180] sm:$0x1] %vm5434_vm8, %v13756_v39  ;;  %5452 = vst.msk [vmem:[#allocation4 + $0x198] sm:$0x1] %vm5434_vm8, %v13756_v39 }
 0x30c   : > { %5454 = vst.msk [vmem:[#allocation4 + $0x29] sm:$0x1] %vm5434_vm8, %v13756_v39  ;;  %5455 = vst.msk [vmem:[#allocation4 + $0x41] sm:$0x1] %vm5434_vm8, %v13756_v39 }
 0x30d   : > { %9529 = vmatmul.mubr.msk.bf16.gmra.mrb[24].mxu0 %vm440_vm0, %v11554_v50  ;;  %v13727_v50 = vld [vmem:[#allocation46_spill] sm:$0xff]  ;;  %5456 = vst.msk [vmem:[#allocation4 + $0x59] sm:$0x1] %vm5434_vm8, %v13756_v39  ;;  %5457 = vst.msk [vmem:[#allocation4 + $0x71] sm:$0x1] %vm5434_vm8, %v13756_v39 }
 0x30e   : > { %9532 = vmatprep.mubr.msk.bf16.mxu0 %vm440_vm0, %v11856_v14  ;;  %v13735_v14 = vld [vmem:[#allocation26_spill] sm:$0xff]  ;;  %5458 = vst.msk [vmem:[#allocation4 + $0x89] sm:$0x1] %vm5434_vm8, %v13756_v39  ;;  %5459 = vst.msk [vmem:[#allocation4 + $0xa1] sm:$0x1] %vm5434_vm8, %v13756_v39 }
 0x30f   : > { %5460 = vst.msk [vmem:[#allocation4 + $0xb9] sm:$0x1] %vm5434_vm8, %v13756_v39  ;;  %5461 = vst.msk [vmem:[#allocation4 + $0xd1] sm:$0x1] %vm5434_vm8, %v13756_v39 }
 0x310   : > { %5462 = vst.msk [vmem:[#allocation4 + $0xe9] sm:$0x1] %vm5434_vm8, %v13756_v39  ;;  %5463 = vst.msk [vmem:[#allocation4 + $0x101] sm:$0x1] %vm5434_vm8, %v13756_v39 }
 0x311   : > { %5464 = vst.msk [vmem:[#allocation4 + $0x119] sm:$0x1] %vm5434_vm8, %v13756_v39  ;;  %5465 = vst.msk [vmem:[#allocation4 + $0x131] sm:$0x1] %vm5434_vm8, %v13756_v39 }
 0x312   : > { %5466 = vst.msk [vmem:[#allocation4 + $0x149] sm:$0x1] %vm5434_vm8, %v13756_v39  ;;  %5467 = vst.msk [vmem:[#allocation4 + $0x161] sm:$0x1] %vm5434_vm8, %v13756_v39 }
 0x313   : > { %5468 = vst.msk [vmem:[#allocation4 + $0x179] sm:$0x1] %vm5434_vm8, %v13756_v39  ;;  %5469 = vst.msk [vmem:[#allocation4 + $0x191] sm:$0x1] %vm5434_vm8, %v13756_v39 }
 0x314   : > { %5429 = vst.msk [vmem:[#allocation4 + $0x10] sm:$0x3] %vm5428_vm9, %v13756_v39  ;;  %5433 = vst.msk [vmem:[#allocation4 + $0x1a8] sm:$0x3] %vm5428_vm9, %v13756_v39 }
 0x315   : > { %9533 = vmatmul.mubr.msk.bf16.gmra.mrb[28].mxu0 %vm440_vm0, %v12351_v21  ;;  %5453 = vst.msk [vmem:[#allocation4 + $0x11] sm:$0x1] %vm5434_vm8, %v13756_v39  ;;  %5470 = vst.msk [vmem:[#allocation4 + $0x1a9] sm:$0x1] %vm5434_vm8, %v13756_v39 }
 0x316   : > { %9538 = vmatprep.mubr.msk.bf16.mxu0 %vm440_vm0, %v11687_v61  ;;  %v4484_v61 = vor.u32 %v4483_v48, %v4479_v40  ;;  %v12592_v40 = vld [vmem:[%s13505_s7 + $0x4] sm:$0xf]  ;;  %v12605_v48 = vld [vmem:[%s13502_s4] ss:$0 sm:$0xff] }
 0x31d   : > { %9539 = vmatmul.mubr.msk.bf16.vlgmr.msra.gmra.mrb[0].mxu0 %vm440_vm0, %v11713_v9 }
 0x31e   : > { %9571 = vmatpush3.bf16.msra.mxu0 %v4708_v28  ;;  %9542 = vmatprep.mubr.msk.bf16.mxu0 %vm440_vm0, %v11718_v7  ;;  %v4914_v7 = vsel %vm931_vm3, %v8326_v38, 0  ;;  %v13748_v28 = vld [vmem:[#allocation27_spill] sm:$0xff] }
 0x31f   : > { %10861 = vmatprep.subr.msk.bf16.mxu0 %vm931_vm3, %v8326_v38  ;;  %v13750_v38 = vld [vmem:[#allocation31_spill] sm:$0xff] }
 0x325   : > { %9543 = vmatmul.mubr.msk.bf16.gmra.mrb[4].mxu0 %vm440_vm0, %v11735_v44  ;;  %v8343_v44 = vld [vmem:[%s13501_s3 + $0x10] sm:$0x3] }
 0x326   : > { %9546 = vmatprep.mubr.msk.bf16.mxu0 %vm440_vm0, %v13727_v50  ;;  %v13751_v50 = vld [vmem:[#allocation33_spill] sm:$0xff] }
 0x32d   : > { %9547 = vmatmul.mubr.msk.bf16.gmra.mrb[8].mxu0 %vm440_vm0, %v13728_v27  ;;  %v13752_v27 = vld [vmem:[#allocation35_spill] sm:$0xff] }
 0x32e   : > { %9550 = vmatprep.mubr.msk.bf16.mxu0 %vm440_vm0, %v13729_v62  ;;  %v13753_v62 = vld [vmem:[#allocation40_spill] sm:$0xff] }
 0x335   : > { %9551 = vmatmul.mubr.msk.bf16.gmra.mrb[12].mxu0 %vm440_vm0, %v13730_v5  ;;  %v13754_v5 = vld [vmem:[#allocation45_spill] sm:$0xff] }
 0x336   : > { %9554 = vmatprep.mubr.msk.bf16.mxu0 %vm440_vm0, %v11790_v6  ;;  %v13732_v6 = vld [vmem:[#allocation5_spill] sm:$0xff] }
 0x33d   : > { %9555 = vmatmul.mubr.msk.bf16.gmra.mrb[16].mxu0 %vm440_vm0, %v13731_v3  ;;  %v13755_v3 = vld [vmem:[#allocation44_spill] sm:$0xff] }
 0x33e   : > { %9558 = vmatprep.mubr.msk.bf16.mxu0 %vm440_vm0, %v11814_v0  ;;  %v13733_v0 = vld [vmem:[#allocation22_spill] sm:$0xff] }
 0x345   : > { %9559 = vmatmul.mubr.msk.bf16.gmra.mrb[20].mxu0 %vm440_vm0, %v11831_v17  ;;  %v4488_v17 = vrot.slane %v4486_v52, 1  ;;  %v13757_v52 = vld [vmem:[#allocation37_spill] sm:$0xff] }
 0x346   : > { %9562 = vmatprep.mubr.msk.bf16.mxu0 %vm440_vm0, %v11838_v11  ;;  %v13734_v11 = vld [vmem:[#allocation24_spill] sm:$0xff] }
 0x347   : > { %v4489_v9 = vsel %vm1341_vm5, %v4484_v61, %v4488_v17  ;;  %v9980_v61 = vadd.f32 %v13757_v52, %v12605_v48  ;;  %v13758_v17 = vld [vmem:[#allocation51_spill] sm:$0xff] }
 0x34d   : > { %9563 = vmatmul.mubr.msk.bf16.gmra.mrb[24].mxu0 %vm440_vm0, %v11854_v34  ;;  %v839_v34 = vld [vmem:[#allocation2 + $0x1a8] sm:$0x3] }
 0x34e   : > { %9566 = vmatprep.mubr.msk.bf16.mxu0 %vm440_vm0, %v12030_v23 }
 0x355   : > { %9567 = vmatmul.mubr.msk.bf16.gmra.mrb[28].mxu0 %vm440_vm0, %v4489_v9  ;;  %v9982_v9 = vadd.f32 %v12605_v48, %v13758_v17 }
 0x356   : > { %9572 = vmatprep.mubr.msk.bf16.mxu0 %vm440_vm0, %v11873_v10  ;;  %v13736_v10 = vld [vmem:[#allocation28_spill] sm:$0xff] }
 0x35d   : > { %9573 = vmatmul.mubr.msk.bf16.vlgmr.msra.gmra.mrb[0].mxu0 %vm440_vm0, %v11896_v25  ;;  %v875_v25 = vpack.c.bf16 %v839_v34, %v839_v34  ;;  %v13760_v34 = vld [vmem:[#allocation52_spill] sm:$0xff] }
 0x35e   : > { %9605 = vmatpush3.bf16.msra.mxu0 %v4914_v7  ;;  %9576 = vmatprep.mubr.msk.bf16.mxu0 %vm440_vm0, %v11903_v8  ;;  %v4693_v8 = vshll.u32 %v12351_v21, 16 }
 0x35f   : > { %10862 = vmatprep.subr.msk.bf16.mxu0 %vm931_vm3, %v8343_v44  ;;  %v5112_v37 = vrot.slane %v875_v25, 1 }
 0x365   : > { %9577 = vmatmul.mubr.msk.bf16.gmra.mrb[4].mxu0 %vm440_vm0, %v11918_v43  ;;  %v4691_v43 = vshrl.u32 %v12351_v21, 16 }
 0x366   : > { %9580 = vmatprep.mubr.msk.bf16.mxu0 %vm440_vm0, %v11923_v42  ;;  %v4695_v42 = vrot.slane %v4693_v8, 1 }
 0x36d   : > { %9581 = vmatmul.mubr.msk.bf16.gmra.mrb[8].mxu0 %vm440_vm0, %v11938_v56  ;;  %v4698_v56 = vshll.u32 %v875_v25, 16 }
 0x36e   : > { %9584 = vmatprep.mubr.msk.bf16.mxu0 %vm440_vm0, %v11943_v63  ;;  %v4696_v63 = vor.u32 %v4695_v42, %v4691_v43 }
 0x375   : > { %9585 = vmatmul.mubr.msk.bf16.gmra.mrb[12].mxu0 %vm440_vm0, %v11958_v46  ;;  %v4700_v46 = vrot.slane %v4698_v56, 1 }
 0x376   : > { %9588 = vmatprep.mubr.msk.bf16.mxu0 %vm440_vm0, %v13732_v6 }
 0x377   : > { %v4701_v23 = vsel %vm1341_vm5, %v4696_v63, %v4700_v46  ;;  %v12623_v63 = vld [vmem:[%s13504_s6] ss:$0 sm:$0xff] }
 0x37d   : > { %9589 = vmatmul.mubr.msk.bf16.gmra.mrb[16].mxu0 %vm440_vm0, %v13733_v0 }
 0x37e   : > { %9592 = vmatprep.mubr.msk.bf16.mxu0 %vm440_vm0, %v13734_v11 }
 0x385   : > { %9593 = vmatmul.mubr.msk.bf16.gmra.mrb[20].mxu0 %vm440_vm0, %v13735_v14  ;;  %v9986_v14 = vadd.f32 %v12605_v48, %v13760_v34 }
 0x386   : > { %9596 = vmatprep.mubr.msk.bf16.mxu0 %vm440_vm0, %v13736_v10  ;;  %v12618_v10 = vld [vmem:[%s13503_s5] ss:$0 sm:$0xff] }
 0x38d   : > { %9597 = vmatmul.mubr.msk.bf16.gmra.mrb[24].mxu0 %vm440_vm0, %v12020_v2  ;;  %v5652_v2 = vsel %vm5650_vm6, %v5595_v32, 0 }
 0x38e   : > { %9600 = vmatprep.mubr.msk.bf16.mxu0 %vm440_vm0, %v12125_v35  ;;  %9673 = vmatpush3.bf16.msra.mxu1 %v5652_v2  ;;  %v5120_v35 = vsel %vm931_vm3, %v8343_v44, 0  ;;  %v13759_v44 = vld [vmem:[#allocation42_spill] sm:$0xff] }
 0x38f   : > { %10864 = vmatprep.subr.msk.bf16.mxu1 %vm5650_vm6, %v12592_v40  ;;  %v9984_v6 = vadd.f32 %v13759_v44, %v12605_v48  ;;  %v13766_v44 = vld [vmem:[#allocation14_spill] sm:$0xff] }
 0x395   : > { %9601 = vmatmul.mubr.msk.bf16.gmra.mrb[28].mxu0 %vm440_vm0, %v4701_v23 }
 0x396   : > { %9606 = vmatprep.mubr.msk.bf16.mxu0 %vm440_vm0, %v13676_v22  ;;  %v13737_v22 = vld [vmem:[#allocation30_spill] sm:$0xff] }
 0x39d   : > { %9607 = vmatmul.mubr.msk.bf16.vlgmr.msra.gmra.mrb[0].mxu0 %vm440_vm0, %v13677_v33  ;;  %v13738_v33 = vld [vmem:[#allocation32_spill] sm:$0xff] }
 0x39e   : > { %9639 = vmatpush3.bf16.msra.mxu0 %v5120_v35  ;;  %9610 = vmatprep.mubr.msk.bf16.mxu0 %vm440_vm0, %v13678_v4  ;;  %v13739_v4 = vld [vmem:[#allocation34_spill] sm:$0xff] }
 0x3a5   : > { %9611 = vmatmul.mubr.msk.bf16.gmra.mrb[4].mxu0 %vm440_vm0, %v13679_v41  ;;  %v13740_v41 = vld [vmem:[#allocation36_spill] sm:$0xff] }
 0x3a6   : > { %9614 = vmatprep.mubr.msk.bf16.mxu0 %vm440_vm0, %v13680_v54  ;;  %v13741_v54 = vld [vmem:[#allocation39_spill] sm:$0xff] }
 0x3ad   : > { %9615 = vmatmul.mubr.msk.bf16.gmra.mrb[8].mxu0 %vm440_vm0, %v13681_v58  ;;  %v13742_v58 = vld [vmem:[#allocation41_spill] sm:$0xff] }
 0x3ae   : > { %9618 = vmatprep.mubr.msk.bf16.mxu0 %vm440_vm0, %v12025_v16  ;;  %v13743_v16 = vld [vmem:[#allocation49_spill] sm:$0xff] }
 0x3b5   : > { %9619 = vmatmul.mubr.msk.bf16.gmra.mrb[12].mxu0 %vm440_vm0, %v12041_v31  ;;  %v4905_v31 = vrot.slane %v12312_v49, 1  ;;  %v13749_v49 = vld [vmem:[#allocation29_spill] sm:$0xff] }
 0x3b6   : > { %9622 = vmatprep.mubr.msk.bf16.mxu0 %vm440_vm0, %v13737_v22 }
 0x3b7   : > { %v4907_v55 = vsel %vm2218_vm4, %v4905_v31, %v4906_v53 }
 0x3bd   : > { %9623 = vmatmul.mubr.msk.bf16.gmra.mrb[16].mxu0 %vm440_vm0, %v13738_v33  ;;  %v13761_v33 = vld [vmem:[#allocation54_spill] sm:$0xff] }
 0x3be   : > { %9626 = vmatprep.mubr.msk.bf16.mxu0 %vm440_vm0, %v13739_v4  ;;  %v9988_v4 = vadd.f32 %v13761_v33, %v12605_v48 }
 0x3c5   : > { %9627 = vmatmul.mubr.msk.bf16.gmra.mrb[20].mxu0 %vm440_vm0, %v13740_v41 }
 0x3c6   : > { %9630 = vmatprep.mubr.msk.bf16.mxu0 %vm440_vm0, %v13741_v54 }
 0x3cd   : > { %9631 = vmatmul.mubr.msk.bf16.gmra.mrb[24].mxu0 %vm440_vm0, %v13742_v58  ;;  %v13762_v58 = vld [vmem:[#allocation6_spill] sm:$0xff] }
 0x3ce   : > { %9634 = vmatprep.mubr.msk.bf16.mxu0 %vm440_vm0, %v13743_v16  ;;  %v9990_v16 = vadd.f32 %v12605_v48, %v13762_v58 }
 0x3d5   : > { %9635 = vmatmul.mubr.msk.bf16.gmra.mrb[28].mxu0 %vm440_vm0, %v4907_v55 }
 0x3d6   : > { %9640 = vmatprep.mubr.msk.bf16.mxu0 %vm440_vm0, %v13744_v30  ;;  %v13763_v30 = vld [vmem:[#allocation8_spill] sm:$0xff] }
 0x3dd   : > { %9641 = vmatmul.mubr.msk.bf16.vlgmr.msra.gmra.mrb[0].mxu0 %vm440_vm0, %v13745_v15  ;;  %v9992_v15 = vadd.f32 %v13763_v30, %v12605_v48 }
 0x3de   : > { %9644 = vmatprep.mubr.msk.bf16.mxu0 %vm440_vm0, %v13746_v47 }
 0x3e5   : > { %9645 = vmatmul.mubr.msk.bf16.gmra.mrb[4].mxu0 %vm440_vm0, %v13747_v20 }
 0x3e6   : > { %9648 = vmatprep.mubr.msk.bf16.mxu0 %vm440_vm0, %v13748_v28 }
 0x3ed   : > { %9649 = vmatmul.mubr.msk.bf16.gmra.mrb[8].mxu0 %vm440_vm0, %v13749_v49  ;;  %v13764_v49 = vld [vmem:[#allocation10_spill] sm:$0xff] }
 0x3ee   : > { %9652 = vmatprep.mubr.msk.bf16.mxu0 %vm440_vm0, %v13750_v38  ;;  %v9994_v38 = vadd.f32 %v12605_v48, %v13764_v49 }
 0x3f5   : > { %9653 = vmatmul.mubr.msk.bf16.gmra.mrb[12].mxu0 %vm440_vm0, %v13751_v50 }
 0x3f6   : > { %9656 = vmatprep.mubr.msk.bf16.mxu0 %vm440_vm0, %v13752_v27 }
 0x3fd   : > { %9657 = vmatmul.mubr.msk.bf16.gmra.mrb[16].mxu0 %vm440_vm0, %v13703_v29  ;;  %v5113_v29 = vsel %vm2218_vm4, %v5111_v36, %v5112_v37 }
 0x3fe   : > { %9660 = vmatprep.mubr.msk.bf16.mxu0 %vm440_vm0, %v13753_v62 }
 0x405   : > { %9661 = vmatmul.mubr.msk.bf16.gmra.mrb[20].mxu0 %vm440_vm0, %v13709_v12  ;;  %v5505_v12 = vld [vmem:[#allocation4] sm:$0xff] }
 0x406   : > { %9664 = vmatprep.mubr.msk.bf16.mxu0 %vm440_vm0, %v13712_v45  ;;  %v5506_v45 = vld [vmem:[#allocation4 + $0x8] sm:$0xff] }
 0x407   : > { %v12585_v21 = vpack.c.bf16 %v5506_v45, %v5505_v12 }
 0x409   : > { %9674 = vmatprep.mubr.msk.bf16.mxu1 %vm5425_vm7, %v12585_v21 }
 0x40d   : > { %9665 = vmatmul.mubr.msk.bf16.gmra.mrb[24].mxu0 %vm440_vm0, %v13754_v5 }
 0x40e   : > { %9668 = vmatprep.mubr.msk.bf16.mxu0 %vm440_vm0, %v13755_v3 }
 0x415   : > { %9669 = vmatmul.mubr.msk.bf16.gmra.mrb[28].mxu0 %vm440_vm0, %v5113_v29 }
 0x4b0   : > { %v9642_v7 = vpop.f32.mrb[0].mxu0 }
 0x4b1   : > { %v9981_v0 = vadd.f32 %v9980_v61, %v9642_v7  ;;  %v5156_v11 = vpop.f32.mrb[1].mxu0  ;;  %v13765_v61 = vld [vmem:[#allocation12_spill] sm:$0xff] }
 0x4b2   : > { %v9983_v25 = vadd.f32 %v9982_v9, %v5156_v11  ;;  %v9643_v8 = vpop.f32.mrb[2].mxu0  ;;  %v9996_v17 = vadd.f32 %v13765_v61, %v12605_v48  ;;  %v13772_v61 = vld [vmem:[#allocation55_spill] sm:$0xff] }
 0x4b3   : > { %v5317_v43 = vmax.f32 %v9981_v0, 0.0  ;;  %v9985_v42 = vadd.f32 %v9984_v6, %v9643_v8  ;;  %v5159_v56 = vpop.f32.mrb[3].mxu0  ;;  %v9998_v6 = vadd.f32 %v12605_v48, %v13766_v44 }
 0x4b4   : > { %v5315_v46 = vmax.f32 %v9983_v25, 0.0  ;;  %v9987_v23 = vadd.f32 %v9986_v14, %v5159_v56  ;;  %v13767_v14 = vld [vmem:[#allocation16_spill] sm:$0xff]  ;;  %v13768_v56 = vld [vmem:[#allocation18_spill] sm:$0xff] }
 0x4b5   : > { %v5356_v32 = vmul.f32 %v12618_v10, %v5317_v43  ;;  %v5318_v2 = vmax.f32 %v9985_v42, 0.0  ;;  %v10000_v25 = vadd.f32 %v13767_v14, %v12605_v48 }
 0x4b6   : > { %v5354_v35 = vmul.f32 %v12618_v10, %v5315_v46  ;;  %v5316_v22 = vmax.f32 %v9987_v23, 0.0  ;;  %v10002_v46 = vadd.f32 %v12605_v48, %v13768_v56 }
 0x4b7   : > { %v5395_v41 = vadd.f32 %v12623_v63, %v5356_v32  ;;  %v5357_v54 = vmul.f32 %v12618_v10, %v5318_v2 }
 0x4b8   : > { %v5393_v31 = vadd.f32 %v12623_v63, %v5354_v35  ;;  %v5355_v53 = vmul.f32 %v12618_v10, %v5316_v22  ;;  %v9646_v55 = vpop.f32.mrb[4].mxu0 }
 0x4b9   : > { %5474 = vst.msk [vmem:[#allocation4 + $0x31] sm:$0xff] %vm5425_vm7, %v5395_v41  ;;  %v5396_v47 = vadd.f32 %v12623_v63, %v5357_v54  ;;  %v9989_v20 = vadd.f32 %v9988_v4, %v9646_v55  ;;  %v5172_v28 = vpop.f32.mrb[5].mxu0 }
 0x4ba   : > { %5472 = vst.msk [vmem:[#allocation4 + $0x19] sm:$0xff] %vm5425_vm7, %v5393_v31  ;;  %v5394_v50 = vadd.f32 %v12623_v63, %v5355_v53  ;;  %v9991_v27 = vadd.f32 %v9990_v16, %v5172_v28  ;;  %v9647_v62 = vpop.f32.mrb[6].mxu0  ;;  %v6042_v53 = vsel %vm5650_vm6, %v12592_v40, 0 }
 0x4bb   : > { %5475 = vst.msk [vmem:[#allocation4 + $0x39] sm:$0xff] %vm5425_vm7, %v5396_v47  ;;  %v5321_v5 = vmax.f32 %v9989_v20, 0.0  ;;  %v9993_v3 = vadd.f32 %v9992_v15, %v9647_v62  ;;  %v5175_v36 = vpop.f32.mrb[7].mxu0  ;;  %v12675_v20 = vld [vmem:[%s13505_s7 + $0x8] sm:$0xf]  ;;  %v13770_v62 = vld [vmem:[#allocation38_spill] sm:$0xff] }
 0x4bc   : > { %5473 = vst.msk [vmem:[#allocation4 + $0x21] sm:$0xff] %vm5425_vm7, %v5394_v50  ;;  %v5319_v37 = vmax.f32 %v9991_v27, 0.0  ;;  %v9995_v29 = vadd.f32 %v9994_v38, %v5175_v36  ;;  %v13769_v38 = vld [vmem:[#allocation19_spill] sm:$0xff] }
 0x4bd   : > { %v5360_v39 = vmul.f32 %v12618_v10, %v5321_v5  ;;  %v5322_v12 = vmax.f32 %v9993_v3, 0.0  ;;  %v10004_v40 = vadd.f32 %v13769_v38, %v12605_v48  ;;  %v10006_v5 = vadd.f32 %v12605_v48, %v13770_v62 }
 0x4be   : > { %v5358_v45 = vmul.f32 %v12618_v10, %v5319_v37  ;;  %v5320_v52 = vmax.f32 %v9995_v29, 0.0  ;;  %v13771_v29 = vld [vmem:[#allocation43_spill] sm:$0xff] }
 0x4bf   : > { %v5399_v9 = vadd.f32 %v12623_v63, %v5360_v39  ;;  %v5361_v7 = vmul.f32 %v12618_v10, %v5322_v12  ;;  %v10008_v39 = vadd.f32 %v13771_v29, %v12605_v48 }
 0x4c0   : > { %v5397_v0 = vadd.f32 %v12623_v63, %v5358_v45  ;;  %v5359_v11 = vmul.f32 %v12618_v10, %v5320_v52  ;;  %v9650_v34 = vpop.f32.mrb[8].mxu0  ;;  %v5511_v55 = vld [vmem:[#allocation4 + $0x30] sm:$0xff] }
 0x4c1   : > { %5478 = vst.msk [vmem:[#allocation4 + $0x61] sm:$0xff] %vm5425_vm7, %v5399_v9  ;;  %v5400_v8 = vadd.f32 %v12623_v63, %v5361_v7  ;;  %v9997_v43 = vadd.f32 %v9996_v17, %v9650_v34  ;;  %v5188_v42 = vpop.f32.mrb[9].mxu0  ;;  %v5508_v41 = vld [vmem:[#allocation4 + $0x18] sm:$0xff]  ;;  %v10010_v17 = vadd.f32 %v12605_v48, %v13772_v61 }
 0x4c2   : > { %5476 = vst.msk [vmem:[#allocation4 + $0x49] sm:$0xff] %vm5425_vm7, %v5397_v0  ;;  %v5398_v23 = vadd.f32 %v12623_v63, %v5359_v11  ;;  %v9999_v32 = vadd.f32 %v9998_v6, %v5188_v42  ;;  %v9651_v2 = vpop.f32.mrb[10].mxu0  ;;  %v5512_v35 = vld [vmem:[#allocation4 + $0x38] sm:$0xff] }
 0x4c3   : > { %5479 = vst.msk [vmem:[#allocation4 + $0x69] sm:$0xff] %vm5425_vm7, %v5400_v8  ;;  %v5325_v22 = vmax.f32 %v9997_v43, 0.0  ;;  %v10001_v33 = vadd.f32 %v10000_v25, %v9651_v2  ;;  %v5191_v4 = vpop.f32.mrb[11].mxu0  ;;  %v5509_v54 = vld [vmem:[#allocation4 + $0x20] sm:$0xff]  ;;  %v12670_v47 = vpack.c.bf16 %v5512_v35, %v5511_v55  ;;  %v10016_v55 = vadd.f32 %v12268_v24, %v12605_v48 }
 0x4c4   : > { %5477 = vst.msk [vmem:[#allocation4 + $0x51] sm:$0xff] %vm5425_vm7, %v5398_v23  ;;  %v5323_v58 = vmax.f32 %v9999_v32, 0.0  ;;  %v10003_v16 = vadd.f32 %v10002_v46, %v5191_v4  ;;  %v12665_v31 = vpack.c.bf16 %v5509_v54, %v5508_v41  ;;  %v13773_v41 = vld [vmem:[#allocation7_spill] sm:$0xff] }
 0x4c5   : > { %v5364_v30 = vmul.f32 %v12618_v10, %v5325_v22  ;;  %v5326_v15 = vmax.f32 %v10001_v33, 0.0  ;;  %v10012_v22 = vadd.f32 %v12260_v18, %v12605_v48  ;;  %v10014_v54 = vadd.f32 %v12605_v48, %v13773_v41 }
 0x4c6   : > { %v5362_v28 = vmul.f32 %v12618_v10, %v5323_v58  ;;  %v5324_v49 = vmax.f32 %v10003_v16, 0.0  ;;  %9675 = vmatmul.mubr.msk.bf16.vlgmr.msra.gmra.mrb[32].mxu1 %vm5425_vm7, %v12665_v31 }
 0x4c7   : > { %v5403_v50 = vadd.f32 %v12623_v63, %v5364_v30  ;;  %v5365_v27 = vmul.f32 %v12618_v10, %v5326_v15  ;;  %9707 = vmatpush3.bf16.msra.mxu1 %v6042_v53  ;;  %9678 = vmatprep.mubr.msk.bf16.mxu1 %vm5425_vm7, %v12670_v47 }
 0x4c8   : > { %v5401_v3 = vadd.f32 %v12623_v63, %v5362_v28  ;;  %v5363_v36 = vmul.f32 %v12618_v10, %v5324_v49  ;;  %v9654_v37 = vpop.f32.mrb[12].mxu0  ;;  %10865 = vmatprep.subr.msk.bf16.mxu1 %vm5650_vm6, %v12675_v20  ;;  %v5517_v56 = vld [vmem:[#allocation4 + $0x60] sm:$0xff]  ;;  %v10018_v28 = vadd.f32 %v12605_v48, %v12270_v1 }
 0x4c9   : > { %5482 = vst.msk [vmem:[#allocation4 + $0x91] sm:$0xff] %vm5425_vm7, %v5403_v50  ;;  %v5404_v12 = vadd.f32 %v12623_v63, %v5365_v27  ;;  %v10005_v45 = vadd.f32 %v10004_v40, %v9654_v37  ;;  %v5204_v52 = vpop.f32.mrb[13].mxu0  ;;  %v5514_v14 = vld [vmem:[#allocation4 + $0x48] sm:$0xff] }
 0x4ca   : > { %5480 = vst.msk [vmem:[#allocation4 + $0x79] sm:$0xff] %vm5425_vm7, %v5401_v3  ;;  %v5402_v9 = vadd.f32 %v12623_v63, %v5363_v36  ;;  %v10007_v7 = vadd.f32 %v10006_v5, %v5204_v52  ;;  %v9655_v44 = vpop.f32.mrb[14].mxu0  ;;  %v5518_v6 = vld [vmem:[#allocation4 + $0x68] sm:$0xff] }
 0x4cb   : > { %5483 = vst.msk [vmem:[#allocation4 + $0x99] sm:$0xff] %vm5425_vm7, %v5404_v12  ;;  %v5329_v0 = vmax.f32 %v10005_v45, 0.0  ;;  %v10009_v11 = vadd.f32 %v10008_v39, %v9655_v44  ;;  %v5207_v34 = vpop.f32.mrb[15].mxu0  ;;  %v5515_v25 = vld [vmem:[#allocation4 + $0x50] sm:$0xff]  ;;  %v12705_v32 = vpack.c.bf16 %v5518_v6, %v5517_v56  ;;  %v13775_v6 = vld [vmem:[#allocation11_spill] sm:$0xff] }
 0x4cc   : > { %5481 = vst.msk [vmem:[#allocation4 + $0x81] sm:$0xff] %vm5425_vm7, %v5402_v9  ;;  %v5327_v8 = vmax.f32 %v10007_v7, 0.0  ;;  %v10011_v43 = vadd.f32 %v10010_v17, %v5207_v34  ;;  %v12702_v42 = vpack.c.bf16 %v5515_v25, %v5514_v14  ;;  %v13774_v17 = vld [vmem:[#allocation9_spill] sm:$0xff]  ;;  %v10024_v25 = vadd.f32 %v12280_v19, %v12605_v48 }
 0x4cd   : > { %v5368_v46 = vmul.f32 %v12618_v10, %v5329_v0  ;;  %v5330_v23 = vmax.f32 %v10009_v11, 0.0  ;;  %v10020_v9 = vadd.f32 %v13774_v17, %v12605_v48  ;;  %v10022_v0 = vadd.f32 %v12605_v48, %v13775_v6 }
 0x4ce   : > { %v5366_v2 = vmul.f32 %v12618_v10, %v5327_v8  ;;  %v5328_v35 = vmax.f32 %v10011_v43, 0.0  ;;  %9679 = vmatmul.mubr.msk.bf16.gmra.mrb[36].mxu1 %vm5425_vm7, %v12702_v42 }
 0x4cf   : > { %v5407_v33 = vadd.f32 %v12623_v63, %v5368_v46  ;;  %v5369_v4 = vmul.f32 %v12618_v10, %v5330_v23  ;;  %9682 = vmatprep.mubr.msk.bf16.mxu1 %vm5425_vm7, %v12705_v32  ;;  %v10026_v46 = vadd.f32 %v12605_v48, %v12282_v26 }
 0x4d0   : > { %v5405_v58 = vadd.f32 %v12623_v63, %v5366_v2  ;;  %v5367_v16 = vmul.f32 %v12618_v10, %v5328_v35  ;;  %v9658_v53 = vpop.f32.mrb[16].mxu0  ;;  %v5523_v1 = vld [vmem:[#allocation4 + $0x90] sm:$0xff] }
 0x4d1   : > { %5486 = vst.msk [vmem:[#allocation4 + $0xc1] sm:$0xff] %vm5425_vm7, %v5407_v33  ;;  %v5408_v18 = vadd.f32 %v12623_v63, %v5369_v4  ;;  %v10013_v30 = vadd.f32 %v10012_v22, %v9658_v53  ;;  %v5220_v15 = vpop.f32.mrb[17].mxu0  ;;  %v5520_v5 = vld [vmem:[#allocation4 + $0x78] sm:$0xff] }
 0x4d2   : > { %5484 = vst.msk [vmem:[#allocation4 + $0xa9] sm:$0xff] %vm5425_vm7, %v5405_v58  ;;  %v5406_v49 = vadd.f32 %v12623_v63, %v5367_v16  ;;  %v10015_v38 = vadd.f32 %v10014_v54, %v5220_v15  ;;  %v9659_v40 = vpop.f32.mrb[18].mxu0  ;;  %v5524_v50 = vld [vmem:[#allocation4 + $0x98] sm:$0xff] }
 0x4d3   : > { %5487 = vst.msk [vmem:[#allocation4 + $0xc9] sm:$0xff] %vm5425_vm7, %v5408_v18  ;;  %v5333_v27 = vmax.f32 %v10013_v30, 0.0  ;;  %v10017_v24 = vadd.f32 %v10016_v55, %v9659_v40  ;;  %v5223_v62 = vpop.f32.mrb[19].mxu0  ;;  %v5521_v3 = vld [vmem:[#allocation4 + $0x80] sm:$0xff]  ;;  %v12733_v45 = vpack.c.bf16 %v5524_v50, %v5523_v1  ;;  %v13776_v50 = vld [vmem:[#allocation13_spill] sm:$0xff] }
 0x4d4   : > { %5485 = vst.msk [vmem:[#allocation4 + $0xb1] sm:$0xff] %vm5425_vm7, %v5406_v49  ;;  %v5331_v36 = vmax.f32 %v10015_v38, 0.0  ;;  %v10019_v37 = vadd.f32 %v10018_v28, %v5223_v62  ;;  %v12730_v29 = vpack.c.bf16 %v5521_v3, %v5520_v5  ;;  %v10028_v49 = vadd.f32 %v12284_v59, %v12605_v48  ;;  %v13777_v1 = vld [vmem:[#allocation15_spill] sm:$0xff] }
 0x4d5   : > { %v5372_v39 = vmul.f32 %v12618_v10, %v5333_v27  ;;  %v5334_v12 = vmax.f32 %v10017_v24, 0.0  ;;  %v10030_v27 = vadd.f32 %v12605_v48, %v13776_v50  ;;  %v10032_v3 = vadd.f32 %v12292_v60, %v12605_v48 }
 0x4d6   : > { %v5370_v52 = vmul.f32 %v12618_v10, %v5331_v36  ;;  %v5332_v61 = vmax.f32 %v10019_v37, 0.0  ;;  %9683 = vmatmul.mubr.msk.bf16.gmra.mrb[40].mxu1 %vm5425_vm7, %v12730_v29 }
 0x4d7   : > { %v5411_v7 = vadd.f32 %v12623_v63, %v5372_v39  ;;  %v5373_v44 = vmul.f32 %v12618_v10, %v5334_v12  ;;  %9686 = vmatprep.mubr.msk.bf16.mxu1 %vm5425_vm7, %v12733_v45  ;;  %v10034_v39 = vadd.f32 %v12605_v48, %v13777_v1 }
 0x4d8   : > { %v5409_v11 = vadd.f32 %v12623_v63, %v5370_v52  ;;  %v5371_v34 = vmul.f32 %v12618_v10, %v5332_v61  ;;  %v9662_v14 = vpop.f32.mrb[20].mxu0  ;;  %v5529_v26 = vld [vmem:[#allocation4 + $0xc0] sm:$0xff] }
 0x4d9   : > { %5490 = vst.msk [vmem:[#allocation4 + $0xf1] sm:$0xff] %vm5425_vm7, %v5411_v7  ;;  %v5412_v8 = vadd.f32 %v12623_v63, %v5373_v44  ;;  %v10021_v43 = vadd.f32 %v10020_v9, %v9662_v14  ;;  %v5236_v56 = vpop.f32.mrb[21].mxu0  ;;  %v5526_v41 = vld [vmem:[#allocation4 + $0xa8] sm:$0xff] }
 0x4da   : > { %5488 = vst.msk [vmem:[#allocation4 + $0xd9] sm:$0xff] %vm5425_vm7, %v5409_v11  ;;  %v5410_v23 = vadd.f32 %v12623_v63, %v5371_v34  ;;  %v10023_v2 = vadd.f32 %v10022_v0, %v5236_v56  ;;  %v9663_v35 = vpop.f32.mrb[22].mxu0  ;;  %v5530_v22 = vld [vmem:[#allocation4 + $0xc8] sm:$0xff] }
 0x4db   : > { %5491 = vst.msk [vmem:[#allocation4 + $0xf9] sm:$0xff] %vm5425_vm7, %v5412_v8  ;;  %v5337_v33 = vmax.f32 %v10021_v43, 0.0  ;;  %v10025_v19 = vadd.f32 %v10024_v25, %v9663_v35  ;;  %v5239_v4 = vpop.f32.mrb[23].mxu0  ;;  %v5527_v54 = vld [vmem:[#allocation4 + $0xb0] sm:$0xff]  ;;  %v12761_v30 = vpack.c.bf16 %v5530_v22, %v5529_v26 }
 0x4dc   : > { %5489 = vst.msk [vmem:[#allocation4 + $0xe1] sm:$0xff] %vm5425_vm7, %v5410_v23  ;;  %v5335_v58 = vmax.f32 %v10023_v2, 0.0  ;;  %v10027_v16 = vadd.f32 %v10026_v46, %v5239_v4  ;;  %v12758_v53 = vpack.c.bf16 %v5527_v54, %v5526_v41  ;;  %v13778_v23 = vld [vmem:[#allocation17_spill] sm:$0xff]  ;;  %v10040_v54 = vadd.f32 %v12304_v51, %v12605_v48 }
 0x4dd   : > { %v5376_v55 = vmul.f32 %v12618_v10, %v5337_v33  ;;  %v5338_v18 = vmax.f32 %v10025_v19, 0.0  ;;  %v10036_v2 = vadd.f32 %v13778_v23, %v12605_v48  ;;  %v10038_v33 = vadd.f32 %v12605_v48, %v12300_v57 }
 0x4de   : > { %v5374_v15 = vmul.f32 %v12618_v10, %v5335_v58  ;;  %v5336_v28 = vmax.f32 %v10027_v16, 0.0  ;;  %9687 = vmatmul.mubr.msk.bf16.gmra.mrb[44].mxu1 %vm5425_vm7, %v12758_v53  ;;  %v5828_v23 = vshll.u32 %v12665_v31, 16 }
 0x4df   : > { %v5415_v38 = vadd.f32 %v12623_v63, %v5376_v55  ;;  %v5377_v40 = vmul.f32 %v12618_v10, %v5338_v18  ;;  %9690 = vmatprep.mubr.msk.bf16.mxu1 %vm5425_vm7, %v12761_v30  ;;  %v10042_v55 = vadd.f32 %v12605_v48, %v12306_v13 }
 0x4e0   : > { %v5413_v24 = vadd.f32 %v12623_v63, %v5374_v15  ;;  %v5375_v62 = vmul.f32 %v12618_v10, %v5336_v28  ;;  %v9666_v5 = vpop.f32.mrb[24].mxu0  ;;  %v5535_v14 = vld [vmem:[#allocation4 + $0xf0] sm:$0xff] }
 0x4e1   : > { %5494 = vst.msk [vmem:[#allocation4 + $0x121] sm:$0xff] %vm5425_vm7, %v5415_v38  ;;  %v5416_v59 = vadd.f32 %v12623_v63, %v5377_v40  ;;  %v10029_v36 = vadd.f32 %v10028_v49, %v9666_v5  ;;  %v5252_v37 = vpop.f32.mrb[25].mxu0  ;;  %v5532_v44 = vld [vmem:[#allocation4 + $0xd8] sm:$0xff] }
 0x4e2   : > { %5492 = vst.msk [vmem:[#allocation4 + $0x109] sm:$0xff] %vm5425_vm7, %v5413_v24  ;;  %v5414_v12 = vadd.f32 %v12623_v63, %v5375_v62  ;;  %v10031_v52 = vadd.f32 %v10030_v27, %v5252_v37  ;;  %v9667_v61 = vpop.f32.mrb[26].mxu0  ;;  %v5536_v17 = vld [vmem:[#allocation4 + $0xf8] sm:$0xff] }
 0x4e3   : > { %5495 = vst.msk [vmem:[#allocation4 + $0x129] sm:$0xff] %vm5425_vm7, %v5416_v59  ;;  %v5341_v9 = vmax.f32 %v10029_v36, 0.0  ;;  %v10033_v60 = vadd.f32 %v10032_v3, %v9667_v61  ;;  %v5255_v7 = vpop.f32.mrb[27].mxu0  ;;  %v5533_v6 = vld [vmem:[#allocation4 + $0xe0] sm:$0xff]  ;;  %v12789_v43 = vpack.c.bf16 %v5536_v17, %v5535_v14  ;;  %v5507_v59 = vld [vmem:[#allocation4 + $0x10] sm:$0x3] }
 0x4e4   : > { %5493 = vst.msk [vmem:[#allocation4 + $0x111] sm:$0xff] %vm5425_vm7, %v5414_v12  ;;  %v5339_v0 = vmax.f32 %v10031_v52, 0.0  ;;  %v10035_v11 = vadd.f32 %v10034_v39, %v5255_v7  ;;  %v12786_v34 = vpack.c.bf16 %v5533_v6, %v5532_v44  ;;  %v12828_v61 = vpack.c.bf16 %v5507_v59, %v5507_v59 }
 0x4e5   : > { %v5380_v25 = vmul.f32 %v12618_v10, %v5341_v9  ;;  %v5342_v8 = vmax.f32 %v10033_v60, 0.0  ;;  %v5817_v17 = vshll.u32 %v12585_v21, 16 }
 0x4e6   : > { %v5378_v56 = vmul.f32 %v12618_v10, %v5339_v0  ;;  %v5340_v46 = vmax.f32 %v10035_v11, 0.0  ;;  %9691 = vmatmul.mubr.msk.bf16.gmra.mrb[48].mxu1 %vm5425_vm7, %v12786_v34  ;;  %v5815_v11 = vshrl.u32 %v12585_v21, 16 }
 0x4e7   : > { %v5419_v35 = vadd.f32 %v12623_v63, %v5380_v25  ;;  %v5381_v22 = vmul.f32 %v12618_v10, %v5342_v8  ;;  %9694 = vmatprep.mubr.msk.bf16.mxu1 %vm5425_vm7, %v12789_v43  ;;  %v5819_v14 = vrot.slane %v5817_v17, 1  ;;  %v5822_v25 = vshll.u32 %v12828_v61, 16  ;;  %v5522_v17 = vld [vmem:[#allocation4 + $0x88] sm:$0x3] }
 0x4e8   : > { %v5417_v19 = vadd.f32 %v12623_v63, %v5378_v56  ;;  %v5379_v4 = vmul.f32 %v12618_v10, %v5340_v46  ;;  %v9670_v41 = vpop.f32.mrb[28].mxu0  ;;  %v5541_v13 = vld [vmem:[#allocation4 + $0x120] sm:$0xff]  ;;  %v5510_v46 = vld [vmem:[#allocation4 + $0x28] sm:$0x3] }
 0x4e9   : > { %5498 = vst.msk [vmem:[#allocation4 + $0x151] sm:$0xff] %vm5425_vm7, %v5419_v35  ;;  %v5420_v58 = vadd.f32 %v12623_v63, %v5381_v22  ;;  %v10037_v16 = vadd.f32 %v10036_v2, %v9670_v41  ;;  %v5268_v26 = vpop.f32.mrb[29].mxu0  ;;  %v5538_v40 = vld [vmem:[#allocation4 + $0x108] sm:$0xff]  ;;  %v5824_v56 = vrot.slane %v5822_v25, 1  ;;  %v5513_v2 = vld [vmem:[#allocation4 + $0x40] sm:$0x3] }
 0x4ea   : > { %5496 = vst.msk [vmem:[#allocation4 + $0x139] sm:$0xff] %vm5425_vm7, %v5417_v19  ;;  %v5418_v57 = vadd.f32 %v12623_v63, %v5379_v4  ;;  %v10039_v18 = vadd.f32 %v10038_v33, %v5268_v26  ;;  %v9671_v15 = vpop.f32.mrb[30].mxu0  ;;  %v5542_v28 = vld [vmem:[#allocation4 + $0x128] sm:$0xff]  ;;  %v5839_v35 = vshll.u32 %v12670_v47, 16  ;;  %v12849_v19 = vpack.c.bf16 %v5510_v46, %v5510_v46 }
 0x4eb   : > { %5499 = vst.msk [vmem:[#allocation4 + $0x159] sm:$0xff] %vm5425_vm7, %v5420_v58  ;;  %v5345_v49 = vmax.f32 %v10037_v16, 0.0  ;;  %v10041_v51 = vadd.f32 %v10040_v54, %v9671_v15  ;;  %v5271_v38 = vpop.f32.mrb[31].mxu0  ;;  %v5539_v50 = vld [vmem:[#allocation4 + $0x110] sm:$0xff]  ;;  %v12817_v3 = vpack.c.bf16 %v5542_v28, %v5541_v13  ;;  %v12854_v54 = vpack.c.bf16 %v5513_v2, %v5513_v2  ;;  %v5516_v15 = vld [vmem:[#allocation4 + $0x58] sm:$0x3] }
 0x4ec   : > { %5497 = vst.msk [vmem:[#allocation4 + $0x141] sm:$0xff] %vm5425_vm7, %v5418_v57  ;;  %v5343_v27 = vmax.f32 %v10039_v18, 0.0  ;;  %v10043_v24 = vadd.f32 %v10042_v55, %v5271_v38  ;;  %v12814_v62 = vpack.c.bf16 %v5539_v50, %v5538_v40  ;;  %v5830_v58 = vrot.slane %v5828_v23, 1 }
 0x4ed   : > { %v5384_v48 = vmul.f32 %v12618_v10, %v5345_v49  ;;  %v5346_v5 = vmax.f32 %v10041_v51, 0.0  ;;  %v5841_v16 = vrot.slane %v5839_v35, 1  ;;  %v5826_v26 = vshrl.u32 %v12665_v31, 16  ;;  %v5519_v51 = vld [vmem:[#allocation4 + $0x70] sm:$0x3] }
 0x4ee   : > { %v5382_v36 = vmul.f32 %v12618_v10, %v5343_v27  ;;  %v5344_v37 = vmax.f32 %v10043_v24, 0.0  ;;  %9695 = vmatmul.mubr.msk.bf16.gmra.mrb[52].mxu1 %vm5425_vm7, %v12814_v62  ;;  %v5833_v55 = vshll.u32 %v12849_v19, 16  ;;  %v5837_v57 = vshrl.u32 %v12670_v47, 16 }
 0x4ef   : > { %v5423_v1 = vadd.f32 %v12623_v63, %v5384_v48  ;;  %v5385_v39 = vmul.f32 %v12618_v10, %v5346_v5  ;;  %9698 = vmatprep.mubr.msk.bf16.mxu1 %vm5425_vm7, %v12817_v3  ;;  %v5844_v18 = vshll.u32 %v12854_v54, 16  ;;  %v5831_v28 = vor.u32 %v5830_v58, %v5826_v26  ;;  %v5531_v26 = vld [vmem:[#allocation4 + $0xd0] sm:$0x3] }
 0x4f0   : > { %v5421_v12 = vadd.f32 %v12623_v63, %v5382_v36  ;;  %v5383_v52 = vmul.f32 %v12618_v10, %v5344_v37  ;;  %v5547_v0 = vld [vmem:[#allocation4 + $0x150] sm:$0xff]  ;;  %v5850_v49 = vshll.u32 %v12702_v42, 16  ;;  %v5842_v38 = vor.u32 %v5841_v16, %v5837_v57  ;;  %v12877_v36 = vld [vmem:[%s13505_s7 + $0xc] sm:$0xf] }
 0x4f1   : > { %5502 = vst.msk [vmem:[#allocation4 + $0x181] sm:$0xff] %vm5425_vm7, %v5423_v1  ;;  %v5424_v9 = vadd.f32 %v12623_v63, %v5385_v39  ;;  %v5544_v44 = vld [vmem:[#allocation4 + $0x138] sm:$0xff]  ;;  %v5861_v40 = vshll.u32 %v12705_v32, 16  ;;  %v5835_v50 = vrot.slane %v5833_v55, 1  ;;  %v12865_v27 = vpack.c.bf16 %v5516_v15, %v5516_v15 }
 0x4f2   : > { %5500 = vst.msk [vmem:[#allocation4 + $0x169] sm:$0xff] %vm5425_vm7, %v5421_v12  ;;  %v5422_v60 = vadd.f32 %v12623_v63, %v5383_v52  ;;  %v5548_v7 = vld [vmem:[#allocation4 + $0x158] sm:$0xff]  ;;  %v5820_v63 = vor.u32 %v5819_v14, %v5815_v11  ;;  %v6368_v24 = vsel %vm5650_vm6, %v12675_v20, 0  ;;  %v5846_v13 = vrot.slane %v5844_v18, 1 }
 0x4f3   : > { %5503 = vst.msk [vmem:[#allocation4 + $0x189] sm:$0xff] %vm5425_vm7, %v5424_v9  ;;  %v5545_v6 = vld [vmem:[#allocation4 + $0x140] sm:$0xff]  ;;  %v12841_v8 = vpack.c.bf16 %v5548_v7, %v5547_v0  ;;  %v12869_v48 = vpack.c.bf16 %v5519_v51, %v5519_v51  ;;  %v12872_v5 = vsel %vm1341_vm5, %v5831_v28, %v5835_v50  ;;  %v5852_v59 = vrot.slane %v5850_v49, 1 }
 0x4f4   : > { %5501 = vst.msk [vmem:[#allocation4 + $0x171] sm:$0xff] %vm5425_vm7, %v5422_v60  ;;  %v12837_v10 = vpack.c.bf16 %v5545_v6, %v5544_v44  ;;  %v5825_v41 = vsel %vm1341_vm5, %v5820_v63, %v5824_v56  ;;  %v12882_v37 = vsel %vm1341_vm5, %v5842_v38, %v5846_v13  ;;  %v5863_v1 = vrot.slane %v5861_v40, 1  ;;  %v5525_v7 = vld [vmem:[#allocation4 + $0xa0] sm:$0x3] }
 0x4f5   : > { %v5848_v20 = vshrl.u32 %v12702_v42, 16  ;;  %v5855_v39 = vshll.u32 %v12865_v27, 16  ;;  %v5859_v12 = vshrl.u32 %v12705_v32, 16  ;;  %v5866_v52 = vshll.u32 %v12869_v48, 16 }
 0x4f6   : > { %9699 = vmatmul.mubr.msk.bf16.gmra.mrb[56].mxu1 %vm5425_vm7, %v12837_v10  ;;  %v5872_v60 = vshll.u32 %v12730_v29, 16  ;;  %v5883_v6 = vshll.u32 %v12733_v45, 16  ;;  %v12894_v11 = vpack.c.bf16 %v5522_v17, %v5522_v17  ;;  %v12896_v25 = vpack.c.bf16 %v5525_v7, %v5525_v7 }
 0x4f7   : > { %9702 = vmatprep.mubr.msk.bf16.mxu1 %vm5425_vm7, %v12841_v8  ;;  %v5853_v9 = vor.u32 %v5852_v59, %v5848_v20  ;;  %v5864_v44 = vor.u32 %v5863_v1, %v5859_v12  ;;  %v5857_v0 = vrot.slane %v5855_v39, 1  ;;  %v5868_v14 = vrot.slane %v5866_v52, 1  ;;  %v5534_v20 = vld [vmem:[#allocation4 + $0xe8] sm:$0x3]  ;;  %v5537_v52 = vld [vmem:[#allocation4 + $0x100] sm:$0x3] }
 0x4f8   : > { %v5874_v56 = vrot.slane %v5872_v60, 1  ;;  %v5885_v23 = vrot.slane %v5883_v6, 1  ;;  %v5870_v2 = vshrl.u32 %v12730_v29, 16  ;;  %v5877_v35 = vshll.u32 %v12894_v11, 16 }
 0x4f9   : > { %v5550_v22 = vld [vmem:[#allocation4 + $0x168] sm:$0xff]  ;;  %v12899_v63 = vsel %vm1341_vm5, %v5853_v9, %v5857_v0  ;;  %v12904_v46 = vsel %vm1341_vm5, %v5864_v44, %v5868_v14  ;;  %v5894_v16 = vshll.u32 %v12758_v53, 16  ;;  %v5905_v57 = vshll.u32 %v12761_v30, 16 }
 0x4fa   : > { %v5875_v58 = vor.u32 %v5874_v56, %v5870_v2  ;;  %v5879_v18 = vrot.slane %v5877_v35, 1  ;;  %v12916_v49 = vpack.c.bf16 %v5531_v26, %v5531_v26  ;;  %v5903_v59 = vshrl.u32 %v12761_v30, 16  ;;  %v5543_v26 = vld [vmem:[#allocation4 + $0x130] sm:$0x3] }
 0x4fb   : > { %v5551_v33 = vld [vmem:[#allocation4 + $0x170] sm:$0xff]  ;;  %v5896_v38 = vrot.slane %v5894_v16, 1  ;;  %v5907_v50 = vrot.slane %v5905_v57, 1  ;;  %v5916_v12 = vshll.u32 %v12786_v34, 16  ;;  %v5927_v9 = vshll.u32 %v12789_v43, 16 }
 0x4fc   : > { %v12851_v4 = vpack.c.bf16 %v5551_v33, %v5550_v22  ;;  %v5881_v22 = vshrl.u32 %v12733_v45, 16  ;;  %v5888_v33 = vshll.u32 %v12896_v25, 16  ;;  %v12919_v51 = vsel %vm1341_vm5, %v5875_v58, %v5879_v18 }
 0x4fd   : > { %v5910_v1 = vshll.u32 %v12916_v49, 16  ;;  %v5908_v17 = vor.u32 %v5907_v50, %v5903_v59  ;;  %v12934_v7 = vpack.c.bf16 %v5534_v20, %v5534_v20  ;;  %v12936_v6 = vpack.c.bf16 %v5537_v52, %v5537_v52 }
 0x4fe   : > { %9703 = vmatmul.mubr.msk.bf16.gmra.mrb[60].mxu1 %vm5425_vm7, %v12851_v4  ;;  %v5886_v55 = vor.u32 %v5885_v23, %v5881_v22  ;;  %v5890_v28 = vrot.slane %v5888_v33, 1  ;;  %v5918_v14 = vrot.slane %v5916_v12, 1  ;;  %v5929_v23 = vrot.slane %v5927_v9, 1 }
 0x4ff   : > { %9708 = vmatprep.mubr.msk.bf16.mxu1 %vm5425_vm7, %v5825_v41  ;;  %v5528_v41 = vld [vmem:[#allocation4 + $0xb8] sm:$0x3]  ;;  %v5912_v44 = vrot.slane %v5910_v1, 1  ;;  %v5914_v2 = vshrl.u32 %v12786_v34, 16  ;;  %v5921_v35 = vshll.u32 %v12934_v7, 16  ;;  %v5925_v22 = vshrl.u32 %v12789_v43, 16 }
 0x500   : > { %v12914_v15 = vpack.c.bf16 %v5528_v41, %v5528_v41  ;;  %v12924_v40 = vsel %vm1341_vm5, %v5886_v55, %v5890_v28  ;;  %v5932_v33 = vshll.u32 %v12936_v6, 16  ;;  %v5540_v41 = vld [vmem:[#allocation4 + $0x118] sm:$0x3]  ;;  %v5938_v16 = vshll.u32 %v12814_v62, 16 }
 0x501   : > { %v12944_v56 = vsel %vm1341_vm5, %v5908_v17, %v5912_v44  ;;  %v5919_v58 = vor.u32 %v5918_v14, %v5914_v2  ;;  %v5930_v55 = vor.u32 %v5929_v23, %v5925_v22  ;;  %v5949_v57 = vshll.u32 %v12817_v3, 16  ;;  %v5546_v17 = vld [vmem:[#allocation4 + $0x148] sm:$0x3]  ;;  %v5549_v44 = vld [vmem:[#allocation4 + $0x160] sm:$0x3] }
 0x502   : > { %v5899_v13 = vshll.u32 %v12914_v15, 16  ;;  %v5923_v18 = vrot.slane %v5921_v35, 1  ;;  %v12954_v28 = vpack.c.bf16 %v5540_v41, %v5540_v41  ;;  %v12956_v50 = vpack.c.bf16 %v5543_v26, %v5543_v26 }
 0x503   : > { %v5951_v1 = vrot.slane %v5949_v57, 1  ;;  %v5936_v20 = vshrl.u32 %v12814_v62, 16  ;;  %v5947_v12 = vshrl.u32 %v12817_v3, 16  ;;  %v5971_v23 = vshll.u32 %v12841_v8, 16 }
 0x504   : > { %v5901_v60 = vrot.slane %v5899_v13, 1  ;;  %v5940_v13 = vrot.slane %v5938_v16, 1  ;;  %v5954_v52 = vshll.u32 %v12956_v50, 16  ;;  %v12974_v35 = vpack.c.bf16 %v5546_v17, %v5546_v17 }
 0x505   : > { %v5952_v14 = vor.u32 %v5951_v1, %v5947_v12  ;;  %v5973_v26 = vrot.slane %v5971_v23, 1 }
 0x506   : > { %9709 = vmatmul.mubr.msk.bf16.vlgmr.msra.gmra.mrb[32].mxu1 %vm5425_vm7, %v12872_v5  ;;  %v5941_v9 = vor.u32 %v5940_v13, %v5936_v20  ;;  %v5956_v22 = vrot.slane %v5954_v52, 1  ;;  %v5965_v57 = vshll.u32 %v12974_v35, 16  ;;  %v5552_v13 = vld [vmem:[#allocation4 + $0x178] sm:$0x3]  ;;  %v5982_v20 = vshll.u32 %v12851_v4, 16 }
 0x507   : > { %9741 = vmatpush3.bf16.msra.mxu1 %v6368_v24  ;;  %9712 = vmatprep.mubr.msk.bf16.mxu1 %vm5425_vm7, %v12882_v37  ;;  %v5892_v24 = vshrl.u32 %v12758_v53, 16  ;;  %v12993_v52 = vpack.c.bf16 %v5552_v13, %v5552_v13  ;;  %v6569_v13 = vsel %vm5650_vm6, %v12877_v36, 0 }
 0x508   : > { %10866 = vmatprep.subr.msk.bf16.mxu1 %vm5650_vm6, %v12877_v36  ;;  %v12984_v16 = vsel %vm1341_vm5, %v5952_v14, %v5956_v22  ;;  %v5967_v12 = vrot.slane %v5965_v57, 1  ;;  %v5980_v14 = vshrl.u32 %v12851_v4, 16  ;;  %v6270_v22 = vrot.slane %v12828_v61, 1 }
 0x509   : > { %v5897_v39 = vor.u32 %v5896_v38, %v5892_v24  ;;  %v5934_v38 = vrot.slane %v5932_v33, 1  ;;  %v12959_v24 = vsel %vm1341_vm5, %v5919_v58, %v5923_v18  ;;  %v12976_v33 = vpack.c.bf16 %v5549_v44, %v5549_v44 }
 0x50a   : > { %v5969_v18 = vshrl.u32 %v12841_v8, 16  ;;  %v5987_v23 = vshll.u32 %v12993_v52, 16  ;;  %v6276_v61 = vrot.slane %v12854_v54, 1  ;;  %v6279_v54 = vrot.slane %v12865_v27, 1 }
 0x50b   : > { %v12939_v0 = vsel %vm1341_vm5, %v5897_v39, %v5901_v60  ;;  %v12964_v59 = vsel %vm1341_vm5, %v5930_v55, %v5934_v38  ;;  %v5943_v39 = vshll.u32 %v12954_v28, 16  ;;  %v5960_v60 = vshll.u32 %v12837_v10, 16 }
 0x50c   : > { %v5958_v55 = vshrl.u32 %v12837_v10, 16  ;;  %v5976_v38 = vshll.u32 %v12976_v33, 16  ;;  %v6281_v36 = vrot.slane %v12705_v32, 1  ;;  %v6285_v27 = vrot.slane %v12894_v11, 1 }
 0x50d   : > { %v5945_v2 = vrot.slane %v5943_v39, 1  ;;  %v5962_v58 = vrot.slane %v5960_v60, 1  ;;  %v5974_v39 = vor.u32 %v5973_v26, %v5969_v18  ;;  %v5984_v60 = vrot.slane %v5982_v20, 1  ;;  %v8430_v20 = vld [vmem:[%s13505_s7 + $0x10] sm:$0xf] }
 0x50e   : > { %9713 = vmatmul.mubr.msk.bf16.gmra.mrb[36].mxu1 %vm5425_vm7, %v12899_v63  ;;  %v5978_v17 = vrot.slane %v5976_v38, 1  ;;  %v5989_v26 = vrot.slane %v5987_v23, 1  ;;  %v6272_v18 = vrot.slane %v12665_v31, 1  ;;  %v6273_v38 = vrot.slane %v12849_v19, 1 }
 0x50f   : > { %9716 = vmatprep.mubr.msk.bf16.mxu1 %vm5425_vm7, %v12904_v46  ;;  %v12979_v41 = vsel %vm1341_vm5, %v5941_v9, %v5945_v2  ;;  %v5963_v1 = vor.u32 %v5962_v58, %v5958_v55  ;;  %v6269_v2 = vrot.slane %v12585_v21, 1  ;;  %v5985_v58 = vor.u32 %v5984_v60, %v5980_v14 }
 0x510   : > { %v13001_v44 = vsel %vm1341_vm5, %v5974_v39, %v5978_v17  ;;  %v6275_v21 = vrot.slane %v12670_v47, 1  ;;  %v6278_v19 = vrot.slane %v12702_v42, 1  ;;  %v6284_v14 = vrot.slane %v12730_v29, 1 }
 0x511   : > { %v12996_v9 = vsel %vm1341_vm5, %v5963_v1, %v5967_v12  ;;  %v6271_v55 = vsel %vm2218_vm4, %v6269_v2, %v6270_v22  ;;  %v13011_v57 = vsel %vm1341_vm5, %v5985_v58, %v5989_v26  ;;  %v13023_v1 = vsel %vm2218_vm4, %v6272_v18, %v6273_v38 }
 0x512   : > { %v13031_v39 = vsel %vm2218_vm4, %v6275_v21, %v6276_v61  ;;  %v6282_v12 = vrot.slane %v12869_v48, 1  ;;  %v13041_v17 = vsel %vm2218_vm4, %v6278_v19, %v6279_v54  ;;  %v6287_v23 = vrot.slane %v12733_v45, 1 }
 0x513   : > { %v6288_v48 = vrot.slane %v12896_v25, 1  ;;  %v13055_v2 = vsel %vm2218_vm4, %v6284_v14, %v6285_v27  ;;  %v6290_v58 = vrot.slane %v12758_v53, 1  ;;  %v6291_v11 = vrot.slane %v12914_v15, 1 }
 0x514   : > { %v13046_v60 = vsel %vm2218_vm4, %v6281_v36, %v6282_v12  ;;  %v6293_v26 = vrot.slane %v12761_v30, 1  ;;  %v6294_v25 = vrot.slane %v12916_v49, 1  ;;  %v6296_v38 = vrot.slane %v12786_v34, 1 }
 0x515   : > { %v13060_v22 = vsel %vm2218_vm4, %v6287_v23, %v6288_v48  ;;  %v6297_v15 = vrot.slane %v12934_v7, 1  ;;  %v6299_v21 = vrot.slane %v12789_v43, 1  ;;  %v6300_v49 = vrot.slane %v12936_v6, 1 }
 0x516   : > { %9717 = vmatmul.mubr.msk.bf16.gmra.mrb[40].mxu1 %vm5425_vm7, %v12919_v51  ;;  %v13074_v18 = vsel %vm2218_vm4, %v6293_v26, %v6294_v25  ;;  %v6302_v19 = vrot.slane %v12814_v62, 1  ;;  %v6303_v7 = vrot.slane %v12954_v28, 1  ;;  %v6305_v54 = vrot.slane %v12817_v3, 1  ;;  %v8447_v26 = vld [vmem:[%s13505_s7 + $0x14] sm:$0xf] }
 0x517   : > { %9720 = vmatprep.mubr.msk.bf16.mxu1 %vm5425_vm7, %v12924_v40  ;;  %v13083_v61 = vsel %vm2218_vm4, %v6296_v38, %v6297_v15  ;;  %v6306_v6 = vrot.slane %v12956_v50, 1  ;;  %v6308_v14 = vrot.slane %v12837_v10, 1  ;;  %v6309_v28 = vrot.slane %v12974_v35, 1  ;;  %v8464_v38 = vld [vmem:[%s13505_s7 + $0x18] sm:$0xf] }
 0x518   : > { %v13097_v36 = vsel %vm2218_vm4, %v6302_v19, %v6303_v7  ;;  %v6311_v27 = vrot.slane %v12841_v8, 1  ;;  %v6312_v50 = vrot.slane %v12976_v33, 1  ;;  %v6315_v35 = vrot.slane %v12993_v52, 1  ;;  %v5553_v52 = vld [vmem:[#allocation4 + $0x180] sm:$0xff] }
 0x519   : > { %v13102_v12 = vsel %vm2218_vm4, %v6305_v54, %v6306_v6  ;;  %v13111_v23 = vsel %vm2218_vm4, %v6308_v14, %v6309_v28  ;;  %v6781_v33 = vsel %vm5650_vm6, %v8430_v20, 0  ;;  %v6987_v25 = vsel %vm5650_vm6, %v8447_v26, 0 }
 0x51a   : > { %v13116_v48 = vsel %vm2218_vm4, %v6311_v27, %v6312_v50  ;;  %v7188_v28 = vsel %vm5650_vm6, %v8464_v38, 0  ;;  %v8481_v27 = vld [vmem:[%s13505_s7 + $0x1c] sm:$0xf] }
 0x51e   : > { %9721 = vmatmul.mubr.msk.bf16.gmra.mrb[44].mxu1 %vm5425_vm7, %v12939_v0 }
 0x51f   : > { %9724 = vmatprep.mubr.msk.bf16.mxu1 %vm5425_vm7, %v12944_v56 }
 0x526   : > { %9725 = vmatmul.mubr.msk.bf16.gmra.mrb[48].mxu1 %vm5425_vm7, %v12959_v24 }
 0x527   : > { %9728 = vmatprep.mubr.msk.bf16.mxu1 %vm5425_vm7, %v12964_v59 }
 0x52e   : > { %9729 = vmatmul.mubr.msk.bf16.gmra.mrb[52].mxu1 %vm5425_vm7, %v12979_v41 }
 0x52f   : > { %9732 = vmatprep.mubr.msk.bf16.mxu1 %vm5425_vm7, %v12984_v16 }
 0x536   : > { %9733 = vmatmul.mubr.msk.bf16.gmra.mrb[56].mxu1 %vm5425_vm7, %v12996_v9 }
 0x537   : > { %9736 = vmatprep.mubr.msk.bf16.mxu1 %vm5425_vm7, %v13001_v44 }
 0x53e   : > { %9737 = vmatmul.mubr.msk.bf16.gmra.mrb[60].mxu1 %vm5425_vm7, %v13011_v57 }
 0x53f   : > { %9742 = vmatprep.mubr.msk.bf16.mxu1 %vm5425_vm7, %v6271_v55  ;;  %v13069_v55 = vsel %vm2218_vm4, %v6290_v58, %v6291_v11  ;;  %v6314_v58 = vrot.slane %v12851_v4, 1 }
 0x541   : > { %v13123_v11 = vsel %vm2218_vm4, %v6314_v58, %v6315_v35  ;;  %v7400_v35 = vsel %vm5650_vm6, %v8481_v27, 0 }
 0x546   : > { %9743 = vmatmul.mubr.msk.bf16.vlgmr.msra.gmra.mrb[32].mxu1 %vm5425_vm7, %v13023_v1 }
 0x547   : > { %9775 = vmatpush3.bf16.msra.mxu1 %v6569_v13  ;;  %9746 = vmatprep.mubr.msk.bf16.mxu1 %vm5425_vm7, %v13031_v39  ;;  %v13088_v13 = vsel %vm2218_vm4, %v6299_v21, %v6300_v49 }
 0x548   : > { %10867 = vmatprep.subr.msk.bf16.mxu1 %vm5650_vm6, %v8430_v20 }
 0x54e   : > { %9747 = vmatmul.mubr.msk.bf16.gmra.mrb[36].mxu1 %vm5425_vm7, %v13041_v17 }
 0x54f   : > { %9750 = vmatprep.mubr.msk.bf16.mxu1 %vm5425_vm7, %v13046_v60 }
 0x556   : > { %9751 = vmatmul.mubr.msk.bf16.gmra.mrb[40].mxu1 %vm5425_vm7, %v13055_v2 }
 0x557   : > { %9754 = vmatprep.mubr.msk.bf16.mxu1 %vm5425_vm7, %v13060_v22 }
 0x55e   : > { %9755 = vmatmul.mubr.msk.bf16.gmra.mrb[44].mxu1 %vm5425_vm7, %v13069_v55 }
 0x55f   : > { %9758 = vmatprep.mubr.msk.bf16.mxu1 %vm5425_vm7, %v13074_v18 }
 0x566   : > { %9759 = vmatmul.mubr.msk.bf16.gmra.mrb[48].mxu1 %vm5425_vm7, %v13083_v61 }
 0x567   : > { %9762 = vmatprep.mubr.msk.bf16.mxu1 %vm5425_vm7, %v13088_v13 }
 0x56e   : > { %9763 = vmatmul.mubr.msk.bf16.gmra.mrb[52].mxu1 %vm5425_vm7, %v13097_v36 }
 0x56f   : > { %9766 = vmatprep.mubr.msk.bf16.mxu1 %vm5425_vm7, %v13102_v12 }
 0x576   : > { %9767 = vmatmul.mubr.msk.bf16.gmra.mrb[56].mxu1 %vm5425_vm7, %v13111_v23 }
 0x577   : > { %9770 = vmatprep.mubr.msk.bf16.mxu1 %vm5425_vm7, %v13116_v48 }
 0x57e   : > { %9771 = vmatmul.mubr.msk.bf16.gmra.mrb[60].mxu1 %vm5425_vm7, %v13123_v11 }
 0x57f   : > { %9776 = vmatprep.mubr.msk.bf16.mxu1 %vm5425_vm7, %v12665_v31  ;;  %v5554_v31 = vld [vmem:[#allocation4 + $0x188] sm:$0xff] }
 0x580   : > { %v13162_v20 = vpack.c.bf16 %v5554_v31, %v5553_v52 }
 0x582   : > { %v6766_v15 = vshll.u32 %v13162_v20, 16  ;;  %v6764_v19 = vshrl.u32 %v13162_v20, 16 }
 0x584   : > { %v6768_v49 = vrot.slane %v6766_v15, 1 }
 0x586   : > { %9777 = vmatmul.mubr.msk.bf16.vlgmr.msra.gmra.mrb[32].mxu1 %vm5425_vm7, %v12670_v47  ;;  %v6769_v54 = vor.u32 %v6768_v49, %v6764_v19 }
 0x587   : > { %9809 = vmatpush3.bf16.msra.mxu1 %v6781_v33  ;;  %9780 = vmatprep.mubr.msk.bf16.mxu1 %vm5425_vm7, %v12702_v42  ;;  %v8498_v33 = vld [vmem:[%s13505_s7 + $0x20] sm:$0xf] }
 0x588   : > { %10868 = vmatprep.subr.msk.bf16.mxu1 %vm5650_vm6, %v8447_v26 }
 0x58e   : > { %9781 = vmatmul.mubr.msk.bf16.gmra.mrb[36].mxu1 %vm5425_vm7, %v12705_v32 }
 0x58f   : > { %9784 = vmatprep.mubr.msk.bf16.mxu1 %vm5425_vm7, %v12730_v29 }
 0x596   : > { %9785 = vmatmul.mubr.msk.bf16.gmra.mrb[40].mxu1 %vm5425_vm7, %v12733_v45 }
 0x597   : > { %9788 = vmatprep.mubr.msk.bf16.mxu1 %vm5425_vm7, %v12758_v53 }
 0x59e   : > { %9789 = vmatmul.mubr.msk.bf16.gmra.mrb[44].mxu1 %vm5425_vm7, %v12761_v30 }
 0x59f   : > { %9792 = vmatprep.mubr.msk.bf16.mxu1 %vm5425_vm7, %v12786_v34 }
 0x5a6   : > { %9793 = vmatmul.mubr.msk.bf16.gmra.mrb[48].mxu1 %vm5425_vm7, %v12789_v43 }
 0x5a7   : > { %9796 = vmatprep.mubr.msk.bf16.mxu1 %vm5425_vm7, %v12814_v62 }
 0x5ae   : > { %9797 = vmatmul.mubr.msk.bf16.gmra.mrb[52].mxu1 %vm5425_vm7, %v12817_v3 }
 0x5af   : > { %9800 = vmatprep.mubr.msk.bf16.mxu1 %vm5425_vm7, %v12837_v10 }
 0x5b6   : > { %9801 = vmatmul.mubr.msk.bf16.gmra.mrb[56].mxu1 %vm5425_vm7, %v12841_v8 }
 0x5b7   : > { %9804 = vmatprep.mubr.msk.bf16.mxu1 %vm5425_vm7, %v12851_v4 }
 0x5be   : > { %9805 = vmatmul.mubr.msk.bf16.gmra.mrb[60].mxu1 %vm5425_vm7, %v13162_v20 }
 0x5bf   : > { %9810 = vmatprep.mubr.msk.bf16.mxu1 %vm5425_vm7, %v12872_v5  ;;  %v5555_v5 = vld [vmem:[#allocation4 + $0x190] sm:$0x3] }
 0x5c0   : > { %v5592_v21 = vpack.c.bf16 %v5555_v5, %v5555_v5 }
 0x5c2   : > { %v6771_v7 = vshll.u32 %v5592_v21, 16  ;;  %v6979_v50 = vrot.slane %v5592_v21, 1 }
 0x5c4   : > { %v6773_v6 = vrot.slane %v6771_v7, 1 }
 0x5c6   : > { %9811 = vmatmul.mubr.msk.bf16.vlgmr.msra.gmra.mrb[32].mxu1 %vm5425_vm7, %v12882_v37  ;;  %v13204_v14 = vsel %vm1341_vm5, %v6769_v54, %v6773_v6 }
 0x5c7   : > { %9843 = vmatpush3.bf16.msra.mxu1 %v6987_v25  ;;  %9814 = vmatprep.mubr.msk.bf16.mxu1 %vm5425_vm7, %v12899_v63 }
 0x5c8   : > { %10869 = vmatprep.subr.msk.bf16.mxu1 %vm5650_vm6, %v8464_v38 }
 0x5ce   : > { %9815 = vmatmul.mubr.msk.bf16.gmra.mrb[36].mxu1 %vm5425_vm7, %v12904_v46 }
 0x5cf   : > { %9818 = vmatprep.mubr.msk.bf16.mxu1 %vm5425_vm7, %v12919_v51 }
 0x5d6   : > { %9819 = vmatmul.mubr.msk.bf16.gmra.mrb[40].mxu1 %vm5425_vm7, %v12924_v40 }
 0x5d7   : > { %9822 = vmatprep.mubr.msk.bf16.mxu1 %vm5425_vm7, %v12939_v0 }
 0x5de   : > { %9823 = vmatmul.mubr.msk.bf16.gmra.mrb[44].mxu1 %vm5425_vm7, %v12944_v56 }
 0x5df   : > { %9826 = vmatprep.mubr.msk.bf16.mxu1 %vm5425_vm7, %v12959_v24 }
 0x5e6   : > { %9827 = vmatmul.mubr.msk.bf16.gmra.mrb[48].mxu1 %vm5425_vm7, %v12964_v59 }
 0x5e7   : > { %9830 = vmatprep.mubr.msk.bf16.mxu1 %vm5425_vm7, %v12979_v41 }
 0x5ee   : > { %9831 = vmatmul.mubr.msk.bf16.gmra.mrb[52].mxu1 %vm5425_vm7, %v12984_v16 }
 0x5ef   : > { %9834 = vmatprep.mubr.msk.bf16.mxu1 %vm5425_vm7, %v12996_v9 }
 0x5f6   : > { %9835 = vmatmul.mubr.msk.bf16.gmra.mrb[56].mxu1 %vm5425_vm7, %v13001_v44 }
 0x5f7   : > { %9838 = vmatprep.mubr.msk.bf16.mxu1 %vm5425_vm7, %v13011_v57 }
 0x5fe   : > { %9839 = vmatmul.mubr.msk.bf16.gmra.mrb[60].mxu1 %vm5425_vm7, %v13204_v14 }
 0x5ff   : > { %9844 = vmatprep.mubr.msk.bf16.mxu1 %vm5425_vm7, %v13023_v1  ;;  %v6978_v1 = vrot.slane %v13162_v20, 1 }
 0x601   : > { %v13245_v58 = vsel %vm2218_vm4, %v6978_v1, %v6979_v50 }
 0x606   : > { %9845 = vmatmul.mubr.msk.bf16.vlgmr.msra.gmra.mrb[32].mxu1 %vm5425_vm7, %v13031_v39 }
 0x607   : > { %9877 = vmatpush3.bf16.msra.mxu1 %v7188_v28  ;;  %9848 = vmatprep.mubr.msk.bf16.mxu1 %vm5425_vm7, %v13041_v17 }
 0x608   : > { %10870 = vmatprep.subr.msk.bf16.mxu1 %vm5650_vm6, %v8481_v27 }
 0x60e   : > { %9849 = vmatmul.mubr.msk.bf16.gmra.mrb[36].mxu1 %vm5425_vm7, %v13046_v60 }
 0x60f   : > { %9852 = vmatprep.mubr.msk.bf16.mxu1 %vm5425_vm7, %v13055_v2 }
 0x616   : > { %9853 = vmatmul.mubr.msk.bf16.gmra.mrb[40].mxu1 %vm5425_vm7, %v13060_v22 }
 0x617   : > { %9856 = vmatprep.mubr.msk.bf16.mxu1 %vm5425_vm7, %v13069_v55 }
 0x61e   : > { %9857 = vmatmul.mubr.msk.bf16.gmra.mrb[44].mxu1 %vm5425_vm7, %v13074_v18 }
 0x61f   : > { %9860 = vmatprep.mubr.msk.bf16.mxu1 %vm5425_vm7, %v13083_v61 }
 0x626   : > { %9861 = vmatmul.mubr.msk.bf16.gmra.mrb[48].mxu1 %vm5425_vm7, %v13088_v13 }
 0x627   : > { %9864 = vmatprep.mubr.msk.bf16.mxu1 %vm5425_vm7, %v13097_v36 }
 0x62e   : > { %9865 = vmatmul.mubr.msk.bf16.gmra.mrb[52].mxu1 %vm5425_vm7, %v13102_v12 }
 0x62f   : > { %9868 = vmatprep.mubr.msk.bf16.mxu1 %vm5425_vm7, %v13111_v23 }
 0x636   : > { %9869 = vmatmul.mubr.msk.bf16.gmra.mrb[56].mxu1 %vm5425_vm7, %v13116_v48 }
 0x637   : > { %9872 = vmatprep.mubr.msk.bf16.mxu1 %vm5425_vm7, %v13123_v11 }
 0x63e   : > { %9873 = vmatmul.mubr.msk.bf16.gmra.mrb[60].mxu1 %vm5425_vm7, %v13245_v58 }
 0x63f   : > { %9878 = vmatprep.mubr.msk.bf16.mxu1 %vm5425_vm7, %v12670_v47  ;;  %v5556_v47 = vld [vmem:[#allocation4 + $0x198] sm:$0xff] }
 0x646   : > { %9879 = vmatmul.mubr.msk.bf16.vlgmr.msra.gmra.mrb[32].mxu1 %vm5425_vm7, %v12702_v42  ;;  %v5557_v42 = vld [vmem:[#allocation4 + $0x1a0] sm:$0xff] }
 0x647   : > { %9911 = vmatpush3.bf16.msra.mxu1 %v7400_v35  ;;  %9882 = vmatprep.mubr.msk.bf16.mxu1 %vm5425_vm7, %v12705_v32  ;;  %v5593_v32 = vpack.c.bf16 %v5557_v42, %v5556_v47 }
 0x648   : > { %10871 = vmatprep.subr.msk.bf16.mxu1 %vm5650_vm6, %v8498_v33 }
 0x64e   : > { %9883 = vmatmul.mubr.msk.bf16.gmra.mrb[36].mxu1 %vm5425_vm7, %v12730_v29  ;;  %v7606_v29 = vsel %vm5650_vm6, %v8498_v33, 0 }
 0x64f   : > { %9886 = vmatprep.mubr.msk.bf16.mxu1 %vm5425_vm7, %v12733_v45  ;;  %v5558_v45 = vld [vmem:[#allocation4 + $0x1a8] sm:$0x3] }
 0x656   : > { %9887 = vmatmul.mubr.msk.bf16.gmra.mrb[40].mxu1 %vm5425_vm7, %v12758_v53  ;;  %v5594_v53 = vpack.c.bf16 %v5558_v45, %v5558_v45 }
 0x657   : > { %9890 = vmatprep.mubr.msk.bf16.mxu1 %vm5425_vm7, %v12761_v30  ;;  %v7385_v30 = vshll.u32 %v5593_v32, 16 }
 0x65e   : > { %9891 = vmatmul.mubr.msk.bf16.gmra.mrb[44].mxu1 %vm5425_vm7, %v12786_v34  ;;  %v7383_v34 = vshrl.u32 %v5593_v32, 16 }
 0x65f   : > { %9894 = vmatprep.mubr.msk.bf16.mxu1 %vm5425_vm7, %v12789_v43  ;;  %v7387_v43 = vrot.slane %v7385_v30, 1 }
 0x666   : > { %9895 = vmatmul.mubr.msk.bf16.gmra.mrb[48].mxu1 %vm5425_vm7, %v12814_v62  ;;  %v7390_v62 = vshll.u32 %v5594_v53, 16 }
 0x667   : > { %9898 = vmatprep.mubr.msk.bf16.mxu1 %vm5425_vm7, %v12817_v3  ;;  %v7388_v3 = vor.u32 %v7387_v43, %v7383_v34 }
 0x66e   : > { %9899 = vmatmul.mubr.msk.bf16.gmra.mrb[52].mxu1 %vm5425_vm7, %v12837_v10  ;;  %v7392_v10 = vrot.slane %v7390_v62, 1 }
 0x66f   : > { %9902 = vmatprep.mubr.msk.bf16.mxu1 %vm5425_vm7, %v12841_v8 }
 0x670   : > { %v7393_v8 = vsel %vm1341_vm5, %v7388_v3, %v7392_v10 }
 0x676   : > { %9903 = vmatmul.mubr.msk.bf16.gmra.mrb[56].mxu1 %vm5425_vm7, %v12851_v4  ;;  %v7597_v4 = vrot.slane %v5593_v32, 1 }
 0x677   : > { %9906 = vmatprep.mubr.msk.bf16.mxu1 %vm5425_vm7, %v13162_v20 }
 0x67e   : > { %9907 = vmatmul.mubr.msk.bf16.gmra.mrb[60].mxu1 %vm5425_vm7, %v5593_v32 }
 0x67f   : > { %9912 = vmatprep.mubr.msk.bf16.mxu1 %vm5425_vm7, %v12882_v37  ;;  %v7598_v37 = vrot.slane %v5594_v53, 1 }
 0x686   : > { %9913 = vmatmul.mubr.msk.bf16.vlgmr.msra.gmra.mrb[32].mxu1 %vm5425_vm7, %v12899_v63  ;;  %v7599_v63 = vsel %vm2218_vm4, %v7597_v4, %v7598_v37 }
 0x687   : > { %9945 = vmatpush3.bf16.msra.mxu1 %v7606_v29  ;;  %9916 = vmatprep.mubr.msk.bf16.mxu1 %vm5425_vm7, %v12904_v46  ;;  %v13353_v46 = vld [vmem:[%s13506_s8] ss:$0 sm:$0xff] }
 0x68e   : > { %9917 = vmatmul.mubr.msk.bf16.gmra.mrb[36].mxu1 %vm5425_vm7, %v12919_v51 }
 0x68f   : > { %9920 = vmatprep.mubr.msk.bf16.mxu1 %vm5425_vm7, %v12924_v40 }
 0x696   : > { %9921 = vmatmul.mubr.msk.bf16.gmra.mrb[40].mxu1 %vm5425_vm7, %v12939_v0 }
 0x697   : > { %9924 = vmatprep.mubr.msk.bf16.mxu1 %vm5425_vm7, %v12944_v56 }
 0x69e   : > { %9925 = vmatmul.mubr.msk.bf16.gmra.mrb[44].mxu1 %vm5425_vm7, %v12959_v24  ;;  %v13359_v24 = vld [vmem:[%s13507_s9] ss:$0 sm:$0xff] }
 0x69f   : > { %9928 = vmatprep.mubr.msk.bf16.mxu1 %vm5425_vm7, %v12964_v59 }
 0x6a6   : > { %9929 = vmatmul.mubr.msk.bf16.gmra.mrb[48].mxu1 %vm5425_vm7, %v12979_v41 }
 0x6a7   : > { %9932 = vmatprep.mubr.msk.bf16.mxu1 %vm5425_vm7, %v12984_v16 }
 0x6ae   : > { %9933 = vmatmul.mubr.msk.bf16.gmra.mrb[52].mxu1 %vm5425_vm7, %v12996_v9 }
 0x6af   : > { %9936 = vmatprep.mubr.msk.bf16.mxu1 %vm5425_vm7, %v13001_v44  ;;  %v13366_v44 = vld [vmem:[%s13508_s10] ss:$0 sm:$0xff] }
 0x6b6   : > { %9937 = vmatmul.mubr.msk.bf16.gmra.mrb[56].mxu1 %vm5425_vm7, %v13011_v57 }
 0x6b7   : > { %9940 = vmatprep.mubr.msk.bf16.mxu1 %vm5425_vm7, %v13204_v14 }
 0x6be   : > { %9941 = vmatmul.mubr.msk.bf16.gmra.mrb[60].mxu1 %vm5425_vm7, %v7393_v8 }
 0x6bf   : > { %9946 = vmatprep.mubr.msk.bf16.mxu1 %vm5425_vm7, %v13031_v39 }
 0x6c6   : > { %9947 = vmatmul.mubr.msk.bf16.vlgmr.msra.gmra.mrb[32].mxu1 %vm5425_vm7, %v13041_v17 }
 0x6c7   : > { %9950 = vmatprep.mubr.msk.bf16.mxu1 %vm5425_vm7, %v13046_v60 }
 0x6ce   : > { %9951 = vmatmul.mubr.msk.bf16.gmra.mrb[36].mxu1 %vm5425_vm7, %v13055_v2 }
 0x6cf   : > { %9954 = vmatprep.mubr.msk.bf16.mxu1 %vm5425_vm7, %v13060_v22 }
 0x6d6   : > { %9955 = vmatmul.mubr.msk.bf16.gmra.mrb[40].mxu1 %vm5425_vm7, %v13069_v55 }
 0x6d7   : > { %9958 = vmatprep.mubr.msk.bf16.mxu1 %vm5425_vm7, %v13074_v18 }
 0x6de   : > { %9959 = vmatmul.mubr.msk.bf16.gmra.mrb[44].mxu1 %vm5425_vm7, %v13083_v61 }
 0x6df   : > { %9962 = vmatprep.mubr.msk.bf16.mxu1 %vm5425_vm7, %v13088_v13 }
 0x6e6   : > { %9963 = vmatmul.mubr.msk.bf16.gmra.mrb[48].mxu1 %vm5425_vm7, %v13097_v36 }
 0x6e7   : > { %9966 = vmatprep.mubr.msk.bf16.mxu1 %vm5425_vm7, %v13102_v12 }
 0x6ee   : > { %9967 = vmatmul.mubr.msk.bf16.gmra.mrb[52].mxu1 %vm5425_vm7, %v13111_v23 }
 0x6ef   : > { %9970 = vmatprep.mubr.msk.bf16.mxu1 %vm5425_vm7, %v13116_v48 }
 0x6f6   : > { %9971 = vmatmul.mubr.msk.bf16.gmra.mrb[56].mxu1 %vm5425_vm7, %v13123_v11 }
 0x6f7   : > { %9974 = vmatprep.mubr.msk.bf16.mxu1 %vm5425_vm7, %v13245_v58 }
 0x6fe   : > { %9975 = vmatmul.mubr.msk.bf16.gmra.mrb[60].mxu1 %vm5425_vm7, %v7599_v63 }
 0x799   : > { %v9948_v51 = vpop.f32.mrb[32].mxu1 }
 0x79a   : > { %v7642_v40 = vpop.f32.mrb[33].mxu1  ;;  %v10044_v41 = vadd.f32 %v9948_v51, %v13353_v46 }
 0x79b   : > { %v10045_v0 = vadd.f32 %v13353_v46, %v7642_v40  ;;  %v9949_v56 = vpop.f32.mrb[34].mxu1 }
 0x79c   : > { %v7645_v59 = vpop.f32.mrb[35].mxu1  ;;  %v7803_v17 = vmax.f32 %v10044_v41, 0.0  ;;  %v10046_v60 = vadd.f32 %v9949_v56, %v13353_v46 }
 0x79d   : > { %v7801_v16 = vmax.f32 %v10045_v0, 0.0  ;;  %v10047_v9 = vadd.f32 %v13353_v46, %v7645_v59 }
 0x79e   : > { %v7842_v36 = vmul.f32 %v13359_v24, %v7803_v17  ;;  %v7804_v12 = vmax.f32 %v10046_v60, 0.0 }
 0x79f   : > { %v7802_v57 = vmax.f32 %v10047_v9, 0.0  ;;  %v7840_v39 = vmul.f32 %v13359_v24, %v7801_v16 }
 0x7a0   : > { %v7843_v11 = vmul.f32 %v13359_v24, %v7804_v12  ;;  %v7881_v20 = vadd.f32 %v13366_v44, %v7842_v36 }
 0x7a1   : > { %v7841_v2 = vmul.f32 %v13359_v24, %v7802_v57  ;;  %v9952_v22 = vpop.f32.mrb[36].mxu1  ;;  %v7879_v55 = vadd.f32 %v13366_v44, %v7840_v39 }
 0x7a2   : > { %v7658_v18 = vpop.f32.mrb[37].mxu1  ;;  %v10048_v15 = vadd.f32 %v9952_v22, %v13353_v46  ;;  %v7882_v19 = vadd.f32 %v13366_v44, %v7843_v11 }
 0x7a3   : > { %7911 = vxpose.xlu1.b32.start [1/16] (narrow) %v7879_v55, 8  ;;  %v9953_v61 = vpop.f32.mrb[38].mxu1  ;;  %v10049_v23 = vadd.f32 %v13353_v46, %v7658_v18  ;;  %v7880_v48 = vadd.f32 %v13366_v44, %v7841_v2 }
 0x7a4   : > { %v7661_v13 = vpop.f32.mrb[39].mxu1  ;;  %v10050_v7 = vadd.f32 %v9953_v61, %v13353_v46  ;;  %v7807_v54 = vmax.f32 %v10048_v15, 0.0 }
 0x7a5   : > { %v7805_v26 = vmax.f32 %v10049_v23, 0.0  ;;  %v10051_v31 = vadd.f32 %v13353_v46, %v7661_v13 }
 0x7a6   : > { %v7808_v50 = vmax.f32 %v10050_v7, 0.0  ;;  %v7846_v35 = vmul.f32 %v13359_v24, %v7807_v54 }
 0x7a7   : > { %7912 = vxpose.xlu1.b32.cont [2/16] (narrow) %v7880_v48, 8  ;;  %v7844_v21 = vmul.f32 %v13359_v24, %v7805_v26  ;;  %v7806_v49 = vmax.f32 %v10051_v31, 0.0 }
 0x7a8   : > { %v7847_v42 = vmul.f32 %v13359_v24, %v7808_v50  ;;  %v7885_v53 = vadd.f32 %v13366_v44, %v7846_v35 }
 0x7a9   : > { %v9956_v52 = vpop.f32.mrb[40].mxu1  ;;  %v7845_v6 = vmul.f32 %v13359_v24, %v7806_v49  ;;  %v7883_v28 = vadd.f32 %v13366_v44, %v7844_v21 }
 0x7aa   : > { %v7674_v25 = vpop.f32.mrb[41].mxu1  ;;  %v10052_v3 = vadd.f32 %v9956_v52, %v13353_v46  ;;  %v7886_v37 = vadd.f32 %v13366_v44, %v7847_v42 }
 0x7ab   : > { %7913 = vxpose.xlu1.b32.cont [3/16] (narrow) %v7881_v20, 8  ;;  %v9957_v38 = vpop.f32.mrb[42].mxu1  ;;  %v10053_v33 = vadd.f32 %v13353_v46, %v7674_v25  ;;  %v7884_v47 = vadd.f32 %v13366_v44, %v7845_v6 }
 0x7ac   : > { %v7677_v5 = vpop.f32.mrb[43].mxu1  ;;  %v7811_v9 = vmax.f32 %v10052_v3, 0.0  ;;  %v10054_v57 = vadd.f32 %v9957_v38, %v13353_v46 }
 0x7ad   : > { %v7809_v32 = vmax.f32 %v10053_v33, 0.0  ;;  %v10055_v29 = vadd.f32 %v13353_v46, %v7677_v5 }
 0x7ae   : > { %v7850_v11 = vmul.f32 %v13359_v24, %v7811_v9  ;;  %v7812_v26 = vmax.f32 %v10054_v57, 0.0 }
 0x7af   : > { %7914 = vxpose.xlu1.b32.cont [4/16] (narrow) %v7882_v19, 8  ;;  %v7848_v63 = vmul.f32 %v13359_v24, %v7809_v32  ;;  %v7810_v51 = vmax.f32 %v10055_v29, 0.0 }
 0x7b0   : > { %v7851_v54 = vmul.f32 %v13359_v24, %v7812_v26 }
 0x7b1   : > { %v13383_v14 = vpop.f32.mrb[44].mxu1  ;;  %v7849_v60 = vmul.f32 %v13359_v24, %v7810_v51  ;;  %v7887_v55 = vadd.f32 %v13366_v44, %v7848_v63 }
 0x7b2   : > { %v7690_v27 = vpop.f32.mrb[45].mxu1 }
 0x7b3   : > { %7915 = vxpose.xlu1.b32.cont [5/16] (narrow) %v7883_v28, 8  ;;  %v13386_v1 = vpop.f32.mrb[46].mxu1  ;;  %v10057_v25 = vadd.f32 %v13353_v46, %v7690_v27  ;;  %v7888_v15 = vadd.f32 %v13366_v44, %v7849_v60  ;;  %v7889_v28 = vadd.f32 %v13366_v44, %v7850_v11 }
 0x7b4   : > { %v13388_v58 = vpop.f32.mrb[47].mxu1 }
 0x7b5   : > { %v7813_v50 = vmax.f32 %v10057_v25, 0.0  ;;  %v10059_v35 = vadd.f32 %v13353_v46, %v13388_v58  ;;  %v10056_v58 = vadd.f32 %v13383_v14, %v13353_v46 }
 0x7b7   : > { %7916 = vxpose.xlu1.b32.cont [6/16] (narrow) %v7884_v47, 8  ;;  %v7815_v14 = vmax.f32 %v10056_v58, 0.0 }
 0x7b9   : > { %v9964_v45 = vpop.f32.mrb[48].mxu1 }
 0x7ba   : > { %v10060_v30 = vadd.f32 %v9964_v45, %v13353_v46  ;;  %v7706_v34 = vpop.f32.mrb[49].mxu1 }
 0x7bb   : > { %v10061_v43 = vadd.f32 %v13353_v46, %v7706_v34  ;;  %7917 = vxpose.xlu1.b32.cont [7/16] (narrow) %v7885_v53, 8  ;;  %v9965_v62 = vpop.f32.mrb[50].mxu1 }
 0x7bc   : > { %v7819_v10 = vmax.f32 %v10060_v30, 0.0  ;;  %v10062_v8 = vadd.f32 %v9965_v62, %v13353_v46  ;;  %v7709_v4 = vpop.f32.mrb[51].mxu1 }
 0x7bd   : > { %v7817_v40 = vmax.f32 %v10061_v43, 0.0  ;;  %v10063_v0 = vadd.f32 %v13353_v46, %v7709_v4  ;;  %v7814_v4 = vmax.f32 %v10059_v35, 0.0 }
 0x7be   : > { %v7858_v56 = vmul.f32 %v13359_v24, %v7819_v10  ;;  %v7820_v59 = vmax.f32 %v10062_v8, 0.0  ;;  %v7890_v10 = vadd.f32 %v13366_v44, %v7851_v54  ;;  %v7852_v8 = vmul.f32 %v13359_v24, %v7813_v50 }
 0x7bf   : > { %v7856_v41 = vmul.f32 %v13359_v24, %v7817_v40  ;;  %v7818_v16 = vmax.f32 %v10063_v0, 0.0  ;;  %7918 = vxpose.xlu1.b32.cont [8/16] (narrow) %v7886_v37, 8  ;;  %v7853_v9 = vmul.f32 %v13359_v24, %v7814_v4 }
 0x7c0   : > { %v7859_v39 = vmul.f32 %v13359_v24, %v7820_v59  ;;  %v13408_v17 = vadd.f32 %v13366_v44, %v7858_v56  ;;  %v10058_v59 = vadd.f32 %v13386_v1, %v13353_v46  ;;  %v7891_v60 = vadd.f32 %v13366_v44, %v7852_v8 }
 0x7c1   : > { %v7857_v2 = vmul.f32 %v13359_v24, %v7818_v16  ;;  %v9968_v22 = vpop.f32.mrb[52].mxu1  ;;  %v13414_v18 = vadd.f32 %v13366_v44, %v7856_v41 }
 0x7c2   : > { %v10064_v61 = vadd.f32 %v9968_v22, %v13353_v46  ;;  %v7722_v13 = vpop.f32.mrb[53].mxu1  ;;  %v13418_v36 = vadd.f32 %v13366_v44, %v7859_v39 }
 0x7c3   : > { %v10065_v12 = vadd.f32 %v13353_v46, %v7722_v13  ;;  %7919 = vxpose.xlu1.b32.cont [9/16] (narrow) %v7887_v55, 8  ;;  %v9969_v23 = vpop.f32.mrb[54].mxu1  ;;  %v13422_v48 = vadd.f32 %v13366_v44, %v7857_v2 }
 0x7c4   : > { %v7823_v31 = vmax.f32 %v10064_v61, 0.0  ;;  %v10066_v52 = vadd.f32 %v9969_v23, %v13353_v46  ;;  %v7725_v20 = vpop.f32.mrb[55].mxu1  ;;  %v7854_v23 = vmul.f32 %v13359_v24, %v7815_v14 }
 0x7c5   : > { %v7821_v38 = vmax.f32 %v10065_v12, 0.0  ;;  %v10067_v5 = vadd.f32 %v13353_v46, %v7725_v20 }
 0x7c6   : > { %v7862_v21 = vmul.f32 %v13359_v24, %v7823_v31  ;;  %v7824_v49 = vmax.f32 %v10066_v52, 0.0  ;;  %v7816_v52 = vmax.f32 %v10058_v59, 0.0 }
 0x7c7   : > { %v7860_v19 = vmul.f32 %v13359_v24, %v7821_v38  ;;  %v7822_v7 = vmax.f32 %v10067_v5, 0.0  ;;  %7920 = vxpose.xlu1.b32.cont [10/16] (narrow) %v7888_v15, 8  ;;  %v7892_v38 = vadd.f32 %v13366_v44, %v7853_v9 }
 0x7c8   : > { %v7863_v6 = vmul.f32 %v13359_v24, %v7824_v49  ;;  %v13435_v27 = vadd.f32 %v13366_v44, %v7862_v21  ;;  %v7855_v54 = vmul.f32 %v13359_v24, %v7816_v52 }
 0x7c9   : > { %v7861_v33 = vmul.f32 %v13359_v24, %v7822_v7  ;;  %v9972_v47 = vpop.f32.mrb[56].mxu1  ;;  %v13441_v42 = vadd.f32 %v13366_v44, %v7860_v19 }
 0x7ca   : > { %v10068_v32 = vadd.f32 %v9972_v47, %v13353_v46  ;;  %v7738_v29 = vpop.f32.mrb[57].mxu1  ;;  %v13445_v45 = vadd.f32 %v13366_v44, %v7863_v6 }
 0x7cb   : > { %v10069_v53 = vadd.f32 %v13353_v46, %v7738_v29  ;;  %7921 = vxpose.xlu1.b32.cont [11/16] (narrow) %v7889_v28, 8  ;;  %v9973_v30 = vpop.f32.mrb[58].mxu1  ;;  %v7900_v34 = vadd.f32 %v13366_v44, %v7861_v33  ;;  %v7893_v28 = vadd.f32 %v13366_v44, %v7854_v23  ;;  %v7894_v33 = vadd.f32 %v13366_v44, %v7855_v54 }
 0x7cc   : > { %v7827_v43 = vmax.f32 %v10068_v32, 0.0  ;;  %v10070_v62 = vadd.f32 %v9973_v30, %v13353_v46  ;;  %v7741_v3 = vpop.f32.mrb[59].mxu1 }
 0x7cd   : > { %v7825_v37 = vmax.f32 %v10069_v53, 0.0  ;;  %v10071_v63 = vadd.f32 %v13353_v46, %v7741_v3 }
 0x7ce   : > { %v7866_v51 = vmul.f32 %v13359_v24, %v7827_v43  ;;  %v7828_v40 = vmax.f32 %v10070_v62, 0.0 }
 0x7cf   : > { %v7864_v0 = vmul.f32 %v13359_v24, %v7825_v37  ;;  %v7826_v56 = vmax.f32 %v10071_v63, 0.0  ;;  %7922 = vxpose.xlu1.b32.cont [12/16] (narrow) %v7890_v10, 8 }
 0x7d0   : > { %v7867_v41 = vmul.f32 %v13359_v24, %v7828_v40  ;;  %v7905_v16 = vadd.f32 %v13366_v44, %v7866_v51 }
 0x7d1   : > { %v7865_v57 = vmul.f32 %v13359_v24, %v7826_v56  ;;  %v9976_v39 = vpop.f32.mrb[60].mxu1  ;;  %v7903_v2 = vadd.f32 %v13366_v44, %v7864_v0 }
 0x7d2   : > { %v10072_v22 = vadd.f32 %v9976_v39, %v13353_v46  ;;  %v7754_v55 = vpop.f32.mrb[61].mxu1  ;;  %v7906_v61 = vadd.f32 %v13366_v44, %v7867_v41 }
 0x7d3   : > { %v10073_v1 = vadd.f32 %v13353_v46, %v7754_v55  ;;  %7923 = vxpose.xlu1.b32.cont [13/16] (narrow) %v7891_v60, 8  ;;  %v9977_v13 = vpop.f32.mrb[62].mxu1  ;;  %v7904_v12 = vadd.f32 %v13366_v44, %v7865_v57 }
 0x7d4   : > { %v7831_v11 = vmax.f32 %v10072_v22, 0.0  ;;  %v10074_v26 = vadd.f32 %v9977_v13, %v13353_v46  ;;  %v7757_v31 = vpop.f32.mrb[63].mxu1 }
 0x7d5   : > { %v7829_v20 = vmax.f32 %v10073_v1, 0.0  ;;  %v10075_v25 = vadd.f32 %v13353_v46, %v7757_v31 }
 0x7d6   : > { %v7870_v5 = vmul.f32 %v13359_v24, %v7831_v11  ;;  %v7832_v15 = vmax.f32 %v10074_v26, 0.0 }
 0x7d7   : > { %v7868_v21 = vmul.f32 %v13359_v24, %v7829_v20  ;;  %v7830_v49 = vmax.f32 %v10075_v25, 0.0  ;;  %7924 = vxpose.xlu1.b32.cont [14/16] (narrow) %v7892_v38, 8 }
 0x7d8   : > { %v7871_v19 = vmul.f32 %v13359_v24, %v7832_v15  ;;  %v7909_v7 = vadd.f32 %v13366_v44, %v7870_v5 }
 0x7d9   : > { %v7869_v6 = vmul.f32 %v13359_v24, %v7830_v49  ;;  %v7907_v46 = vadd.f32 %v13366_v44, %v7868_v21 }
 0x7da   : > { %v7910_v50 = vadd.f32 %v13366_v44, %v7871_v19 }
 0x7db   : > { %7925 = vxpose.xlu1.b32.cont [15/16] (narrow) %v7893_v28, 8  ;;  %v7908_v35 = vadd.f32 %v13366_v44, %v7869_v6 }
 0x7df   : > { %7926 = vxpose.xlu1.b32.end [16/16] (narrow) %v7894_v33, 8 }
 0x7e3   : > { %7943 = vxpose.xlu1.b32.start [1/16] (narrow) %v13414_v18, 8 }
 0x7e7   : > { %7944 = vxpose.xlu1.b32.cont [2/16] (narrow) %v13422_v48, 8 }
 0x7eb   : > { %7945 = vxpose.xlu1.b32.cont [3/16] (narrow) %v13408_v17, 8 }
 0x7ef   : > { %7946 = vxpose.xlu1.b32.cont [4/16] (narrow) %v13418_v36, 8 }
 0x7f3   : > { %7947 = vxpose.xlu1.b32.cont [5/16] (narrow) %v13441_v42, 8 }
 0x7f7   : > { %7948 = vxpose.xlu1.b32.cont [6/16] (narrow) %v7900_v34, 8 }
 0x7fb   : > { %7949 = vxpose.xlu1.b32.cont [7/16] (narrow) %v13435_v27, 8 }
 0x7ff   : > { %7950 = vxpose.xlu1.b32.cont [8/16] (narrow) %v13445_v45, 8 }
 0x803   : > { %7951 = vxpose.xlu1.b32.cont [9/16] (narrow) %v7903_v2, 8 }
 0x807   : > { %7952 = vxpose.xlu1.b32.cont [10/16] (narrow) %v7904_v12, 8 }
 0x80b   : > { %7953 = vxpose.xlu1.b32.cont [11/16] (narrow) %v7905_v16, 8 }
 0x80f   : > { %7954 = vxpose.xlu1.b32.cont [12/16] (narrow) %v7906_v61, 8 }
 0x813   : > { %7955 = vxpose.xlu1.b32.cont [13/16] (narrow) %v7907_v46, 8 }
 0x817   : > { %7956 = vxpose.xlu1.b32.cont [14/16] (narrow) %v7908_v35, 8 }
 0x81b   : > { %7957 = vxpose.xlu1.b32.cont [15/16] (narrow) %v7909_v7, 8 }
 0x81f   : > { %7958 = vxpose.xlu1.b32.end [16/16] (narrow) %v7910_v50, 8 }
 0x823   : > { %v7927_v24 = vpop.trf.xlu1 }
 0x824   : > { %7975 = vst [vmem:[%s406_s28] sm:$0xff] %v7927_v24 }
 0x863   : > { %v7959_v44 = vpop.trf.xlu1 }
 0x864   : > { %7976 = vst [vmem:[%s406_s28 + $0x8] sm:$0xff] %v7959_v44 }
 0x865 PF: > { %s21_s17 = sadd.s32 1, %s10888_s17  }
 0x866   : > { %p18_p4 = scmp.ge.s32.totalorder %s21_s17, 4  }
 0x868   :  { %20 = sbr.rel (!%p18_p4) target bundleno = 1 (0x1), region = 127 }

</bundles_post_ra>
